<compile_context>
chip_gen: v7x
topology: tpu7x:2x2x1
jax: 0.10.0
libtpu: 0.0.40
codegen_flags: <defaults>
</compile_context>

<pallas_src>
import numpy as np

import jax
import jax.numpy as jnp
from jax.experimental import pallas as pl
from jax.experimental.pallas import tpu as pltpu


# ----------------------------------------------------------------------------- kernel

def _cnn_fused_kernel(xd_ref, b1m_ref, b1v_ref, b2m_ref, b2v_ref,
                      w3_ref, b3v_ref, w4_ref, b4v_ref, w5_ref, b5v_ref, o_ref):
    f32, bf16 = jnp.float32, jnp.bfloat16
    N = xd_ref.shape[0]

    # xd[:, r, t, :] = x[:, 4*t + r, :]   (mod-4 row de-interleave done in the wrapper)
    xd = xd_ref[...]                                                   # (N, 4, 7, 28) bf16

    # ---- conv1 (5x5, 1->32, VALID) as one banded MXU matmul --------------------------
    # LHS rows ordered (P, q, s) with output row ho = 4*s + 2*q + P, so that
    #   * height pooling  = max of the P=0 / P=1 half-slabs (contiguous), and
    #   * the pooled rows come out ordered (q, s) = [even hp | odd hp], which makes
    #     conv2's tap slices contiguous as well.
    def x_rows(m):                       # x rows 4*s + m, s = 0..5  ->  (N, 6, 28)
        return xd[:, m % 4, m // 4:m // 4 + 6, :]

    slabs = []
    for P in range(2):
        for q in range(2):
            slabs.append(jnp.concatenate([x_rows(2 * q + P + i) for i in range(5)], axis=2))
    lhs1 = jnp.concatenate(slabs, axis=1)                              # (N, 24, 140) bf16

    y1 = jnp.dot(lhs1.reshape(N * 24, 140), b1m_ref[...],
                 preferred_element_type=f32)                           # (N*24, 768)
    y1 = jnp.maximum(y1 + b1v_ref[...], 0.0).reshape(N, 24, 768)

    # ---- maxpool1 2x2/2: both directions are aligned half-split maxima ---------------
    yr = jnp.maximum(y1[:, :12, :], y1[:, 12:, :])                     # rows: hp = 2*s + q
    xp = jnp.maximum(yr[:, :, :384], yr[:, :, 384:]).astype(bf16)      # (N, 12, 384), cols wp*32+c

    # ---- conv2 (5x5, 32->64, VALID) as one banded MXU matmul -------------------------
    def xp_rows(m):                      # pooled rows hp = 2*hp2 + m, hp2 = 0..3 -> (N, 4, 384)
        q, off = m % 2, m // 2
        return xp[:, q * 6 + off:q * 6 + off + 4, :]

    slabs2 = [jnp.concatenate([xp_rows(P2 + i) for i in range(5)], axis=2)
              for P2 in range(2)]
    lhs2 = jnp.concatenate(slabs2, axis=1)                             # (N, 8, 1920) bf16

    y2 = jnp.dot(lhs2.reshape(N * 8, 1920), b2m_ref[...],
                 preferred_element_type=f32)                           # (N*8, 512)
    y2 = jnp.maximum(y2 + b2v_ref[...], 0.0).reshape(N, 8, 512)

    # ---- maxpool2 2x2/2 ---------------------------------------------------------------
    y2r = jnp.maximum(y2[:, :4, :], y2[:, 4:, :])                      # (N, 4, 512)
    p2 = jnp.maximum(y2r[:, :, :256], y2r[:, :, 256:])                 # (N, 4, 256) rows hp2, cols wp2*64+d

    # ---- flatten (torch NCHW order is folded into the fc1 weight-row permutation) -----
    flat = jnp.concatenate([p2[:, hp, :] for hp in range(4)], axis=1).astype(bf16)  # (N, 1024)

    # ---- fc1 -> relu -> fc21 -> relu -> fc24 (hidden padded 200->256, out 10->128) ----
    h = jnp.maximum(jnp.dot(flat, w3_ref[...], preferred_element_type=f32) + b3v_ref[...], 0.0)
    h = jnp.maximum(jnp.dot(h.astype(bf16), w4_ref[...], preferred_element_type=f32) + b4v_ref[...], 0.0)
    o_ref[...] = jnp.dot(h.astype(bf16), w5_ref[...], preferred_element_type=f32) + b5v_ref[...]


# ----------------------------------------------------------------------------- wrapper

def cnn_forward(params, x_nchw, *, block_n=None):
    N = x_nchw.shape[0]
    if block_n is None or block_n > N:
        block_n = N
    assert N % block_n == 0, "batch must be divisible by block_n"

    # mod-4 row de-interleave (layout plumbing only) so every conv1 tap is a contiguous,
    # batch-vectorized sublane slice inside the kernel; cast to bf16 to halve the input DMA.
    x_d = (x_nchw[:, 0, :, :].astype(jnp.bfloat16)
           .reshape(N, 7, 4, 28).transpose(0, 2, 1, 3))                # (N, 4, 7, 28)

    weights = [params[k] for k in ("conv1_band", "conv1_brow", "conv2_band", "conv2_brow",
                                   "fc1_w", "fc1_b", "fc21_w", "fc21_b", "fc24_w", "fc24_b")]

    def resident(w):                 # whole array VMEM-resident across the batch grid
        nd = w.ndim
        return pl.BlockSpec(w.shape, lambda b, _nd=nd: (0,) * _nd)

    out = pl.pallas_call(
        _cnn_fused_kernel,
        out_shape=jax.ShapeDtypeStruct((N, 128), jnp.float32),
        grid=(N // block_n,),
        in_specs=[pl.BlockSpec((block_n, 4, 7, 28), lambda b: (b, 0, 0, 0))]
                 + [resident(w) for w in weights],
        out_specs=pl.BlockSpec((block_n, 128), lambda b: (b, 0)),
        compiler_params=pltpu.CompilerParams(dimension_semantics=("parallel",)),
    )(x_d, *weights)
    return out[:, :10]


# ----------------------------------------------------------------------------- packing

def pack_params(raw):
    bf16, f32 = jnp.bfloat16, jnp.float32

    c1 = np.asarray(raw["conv1_w"], np.float32)           # (32, 1, 5, 5)  [c, 1, i, j]
    c2 = np.asarray(raw["conv2_w"], np.float32)           # (64, 32, 5, 5) [d, c, i, j]

    # conv1 band: rows i*28 + w, cols (wo%2)*384 + (wo//2)*32 + c  (parity-split columns)
    K1 = np.transpose(c1[:, 0], (1, 2, 0))                # (5, 5, 32) [i, j, c]
    B1 = np.zeros((5, 28, 2, 12, 32), np.float32)
    for i in range(5):
        for j in range(5):
            for wo in range(24):
                B1[i, wo + j, wo % 2, wo // 2, :] = K1[i, j, :]
    B1 = B1.reshape(140, 768)

    # conv2 band: rows i*384 + wp*32 + c, cols (wo%2)*256 + (wo//2)*64 + d
    K2 = np.transpose(c2, (2, 3, 1, 0))                   # (5, 5, 32, 64) [i, j, c, d]
    B2 = np.zeros((5, 12, 32, 2, 4, 64), np.float32)
    for i in range(5):
        for j in range(5):
            for wo in range(8):
                B2[i, wo + j, :, wo % 2, wo // 2, :] = K2[i, j, :, :]
    B2 = B2.reshape(1920, 512)

    # fc1: permute rows to match the in-kernel flatten order (hp*256 + wp*64 + d), which
    # reproduces torch.flatten of NCHW (feature f = d*16 + hp*4 + wp); pad 200->256.
    w1 = np.asarray(raw["fc1_w"], np.float32).reshape(200, 64, 4, 4)   # [o, d, hp, wp]
    w1 = np.transpose(w1, (2, 3, 1, 0)).reshape(1024, 200)
    w1 = np.pad(w1, ((0, 0), (0, 56)))                                 # (1024, 256)
    w2 = np.pad(np.asarray(raw["fc21_w"], np.float32).T, ((0, 56), (0, 56)))    # (256, 256)
    w3 = np.pad(np.asarray(raw["fc24_w"], np.float32).T, ((0, 56), (0, 118)))   # (256, 128)

    return {
        "conv1_band": jnp.asarray(B1, bf16),
        "conv1_brow": jnp.asarray(np.tile(np.asarray(raw["conv1_b"]), 24).reshape(1, 768), f32),
        "conv2_band": jnp.asarray(B2, bf16),
        "conv2_brow": jnp.asarray(np.tile(np.asarray(raw["conv2_b"]), 8).reshape(1, 512), f32),
        "fc1_w": jnp.asarray(w1, bf16),
        "fc1_b": jnp.asarray(np.pad(np.asarray(raw["fc1_b"]), (0, 56)).reshape(1, 256), f32),
        "fc21_w": jnp.asarray(w2, bf16),
        "fc21_b": jnp.asarray(np.pad(np.asarray(raw["fc21_b"]), (0, 56)).reshape(1, 256), f32),
        "fc24_w": jnp.asarray(w3, bf16),
        "fc24_b": jnp.asarray(np.pad(np.asarray(raw["fc24_b"]), (0, 118)).reshape(1, 128), f32),
    }


def init_params(key):
    ks = jax.random.split(key, 10)

    def u(k, shape, fan_in):
        bound = 1.0 / float(fan_in) ** 0.5
        return jax.random.uniform(k, shape, jnp.float32, -bound, bound)

    raw = {
        "conv1_w": u(ks[0], (32, 1, 5, 5), 1 * 5 * 5),
        "conv1_b": u(ks[1], (32,), 1 * 5 * 5),
        "conv2_w": u(ks[2], (64, 32, 5, 5), 32 * 5 * 5),
        "conv2_b": u(ks[3], (64,), 32 * 5 * 5),
        "fc1_w": u(ks[4], (200, 1024), 1024),
        "fc1_b": u(ks[5], (200,), 1024),
        "fc21_w": u(ks[6], (200, 200), 200),
        "fc21_b": u(ks[7], (200,), 200),
        "fc24_w": u(ks[8], (10, 200), 200),
        "fc24_b": u(ks[9], (10,), 200),
    }
    return raw, pack_params(raw)


# ----------------------------------------------------------------------------- reference

def reference_forward(raw, x):
    """Pure-JAX f32 reference (NCHW, OIHW weights) mirroring the PyTorch forward."""
    dn = ("NCHW", "OIHW", "NCHW")
    y = jax.lax.conv_general_dilated(x, raw["conv1_w"], (1, 1), "VALID", dimension_numbers=dn)
    y = jax.nn.relu(y + raw["conv1_b"][None, :, None, None])
    y = jax.lax.reduce_window(y, -jnp.inf, jax.lax.max, (1, 1, 2, 2), (1, 1, 2, 2), "VALID")
    y = jax.lax.conv_general_dilated(y, raw["conv2_w"], (1, 1), "VALID", dimension_numbers=dn)
    y = jax.nn.relu(y + raw["conv2_b"][None, :, None, None])
    y = jax.lax.reduce_window(y, -jnp.inf, jax.lax.max, (1, 1, 2, 2), (1, 1, 2, 2), "VALID")
    y = y.reshape(y.shape[0], -1)
    y = jax.nn.relu(y @ raw["fc1_w"].T + raw["fc1_b"])
    y = jax.nn.relu(y @ raw["fc21_w"].T + raw["fc21_b"])
    return y @ raw["fc24_w"].T + raw["fc24_b"]


if __name__ == "__main__":
    key = jax.random.PRNGKey(0)
    k_param, k_x = jax.random.split(key)
    raw, params = init_params(k_param)

    # batch=2, single-channel 28x28 (required so flatten -> 1024 features for fc1)
    x = jax.random.normal(k_x, (2, 1, 28, 28), jnp.float32)

    out = jax.block_until_ready(jax.jit(cnn_forward)(params, x))
    assert out.shape == (2, 10), out.shape
    assert bool(jnp.all(jnp.isfinite(out)))

    ref = jax.block_until_ready(jax.jit(reference_forward)(raw, x))
    assert jnp.allclose(out, ref, rtol=5e-2, atol=5e-2), float(jnp.max(jnp.abs(out - ref)))

    print("KERNEL_OK")
</pallas_src>

<mosaic_0001>
module attributes {stable_mosaic.version = 11 : i64} {
  func.func @_cnn_fused_kernel(%arg0: i32, %arg1: memref<2x4x7x28xbf16, #tpu.memory_space<vmem>>, %arg2: memref<140x768xbf16, #tpu.memory_space<vmem>>, %arg3: memref<1x768xf32, #tpu.memory_space<vmem>>, %arg4: memref<1920x512xbf16, #tpu.memory_space<vmem>>, %arg5: memref<1x512xf32, #tpu.memory_space<vmem>>, %arg6: memref<1024x256xbf16, #tpu.memory_space<vmem>>, %arg7: memref<1x256xf32, #tpu.memory_space<vmem>>, %arg8: memref<256x256xbf16, #tpu.memory_space<vmem>>, %arg9: memref<1x256xf32, #tpu.memory_space<vmem>>, %arg10: memref<256x128xbf16, #tpu.memory_space<vmem>>, %arg11: memref<1x128xf32, #tpu.memory_space<vmem>>, %arg12: memref<2x128xf32, #tpu.memory_space<vmem>>) attributes {dimension_semantics = [#tpu.dimension_semantics<parallel>], iteration_bounds = array<i64: 1>, scalar_prefetch = 0 : i64, scratch_operands = 0 : i64, tpu.core_type = #tpu.core_type<tc>, window_params = [{transform_indices = @transform_0, window_bounds = array<i64: 2, 4, 7, 28>}, {pipeline_mode = #tpu.pipeline_mode<synchronous>, transform_indices = @transform_1, window_bounds = array<i64: 140, 768>}, {pipeline_mode = #tpu.pipeline_mode<synchronous>, transform_indices = @transform_2, window_bounds = array<i64: 1, 768>}, {pipeline_mode = #tpu.pipeline_mode<synchronous>, transform_indices = @transform_3, window_bounds = array<i64: 1920, 512>}, {pipeline_mode = #tpu.pipeline_mode<synchronous>, transform_indices = @transform_4, window_bounds = array<i64: 1, 512>}, {pipeline_mode = #tpu.pipeline_mode<synchronous>, transform_indices = @transform_5, window_bounds = array<i64: 1024, 256>}, {pipeline_mode = #tpu.pipeline_mode<synchronous>, transform_indices = @transform_6, window_bounds = array<i64: 1, 256>}, {pipeline_mode = #tpu.pipeline_mode<synchronous>, transform_indices = @transform_7, window_bounds = array<i64: 256, 256>}, {pipeline_mode = #tpu.pipeline_mode<synchronous>, transform_indices = @transform_8, window_bounds = array<i64: 1, 256>}, {pipeline_mode = #tpu.pipeline_mode<synchronous>, transform_indices = @transform_9, window_bounds = array<i64: 256, 128>}, {pipeline_mode = #tpu.pipeline_mode<synchronous>, transform_indices = @transform_10, window_bounds = array<i64: 1, 128>}, {transform_indices = @transform_11, window_bounds = array<i64: 2, 128>}]} {
    %c0 = arith.constant 0 : index
    %c0_0 = arith.constant 0 : index
    %c0_1 = arith.constant 0 : index
    %c0_2 = arith.constant 0 : index
    %0 = vector.load %arg1[%c0, %c0_0, %c0_1, %c0_2] : memref<2x4x7x28xbf16, #tpu.memory_space<vmem>>, vector<2x4x7x28xbf16>
    %1 = vector.extract_strided_slice %0 {offsets = [0, 0, 0, 0], sizes = [2, 1, 6, 28], strides = [1, 1, 1, 1]} : vector<2x4x7x28xbf16> to vector<2x1x6x28xbf16>
    %2 = vector.shape_cast %1 : vector<2x1x6x28xbf16> to vector<2x6x28xbf16>
    %3 = vector.extract_strided_slice %0 {offsets = [0, 1, 0, 0], sizes = [2, 1, 6, 28], strides = [1, 1, 1, 1]} : vector<2x4x7x28xbf16> to vector<2x1x6x28xbf16>
    %4 = vector.shape_cast %3 : vector<2x1x6x28xbf16> to vector<2x6x28xbf16>
    %5 = vector.extract_strided_slice %0 {offsets = [0, 2, 0, 0], sizes = [2, 1, 6, 28], strides = [1, 1, 1, 1]} : vector<2x4x7x28xbf16> to vector<2x1x6x28xbf16>
    %6 = vector.shape_cast %5 : vector<2x1x6x28xbf16> to vector<2x6x28xbf16>
    %7 = vector.extract_strided_slice %0 {offsets = [0, 3, 0, 0], sizes = [2, 1, 6, 28], strides = [1, 1, 1, 1]} : vector<2x4x7x28xbf16> to vector<2x1x6x28xbf16>
    %8 = vector.shape_cast %7 : vector<2x1x6x28xbf16> to vector<2x6x28xbf16>
    %9 = vector.extract_strided_slice %0 {offsets = [0, 0, 1, 0], sizes = [2, 1, 6, 28], strides = [1, 1, 1, 1]} : vector<2x4x7x28xbf16> to vector<2x1x6x28xbf16>
    %10 = vector.shape_cast %9 : vector<2x1x6x28xbf16> to vector<2x6x28xbf16>
    %11 = tpu.concatenate %2, %4, %6, %8, %10 in 2 : vector<2x6x28xbf16>, vector<2x6x28xbf16>, vector<2x6x28xbf16>, vector<2x6x28xbf16>, vector<2x6x28xbf16> -> vector<2x6x140xbf16>
    %12 = vector.extract_strided_slice %0 {offsets = [0, 2, 0, 0], sizes = [2, 1, 6, 28], strides = [1, 1, 1, 1]} : vector<2x4x7x28xbf16> to vector<2x1x6x28xbf16>
    %13 = vector.shape_cast %12 : vector<2x1x6x28xbf16> to vector<2x6x28xbf16>
    %14 = vector.extract_strided_slice %0 {offsets = [0, 3, 0, 0], sizes = [2, 1, 6, 28], strides = [1, 1, 1, 1]} : vector<2x4x7x28xbf16> to vector<2x1x6x28xbf16>
    %15 = vector.shape_cast %14 : vector<2x1x6x28xbf16> to vector<2x6x28xbf16>
    %16 = vector.extract_strided_slice %0 {offsets = [0, 0, 1, 0], sizes = [2, 1, 6, 28], strides = [1, 1, 1, 1]} : vector<2x4x7x28xbf16> to vector<2x1x6x28xbf16>
    %17 = vector.shape_cast %16 : vector<2x1x6x28xbf16> to vector<2x6x28xbf16>
    %18 = vector.extract_strided_slice %0 {offsets = [0, 1, 1, 0], sizes = [2, 1, 6, 28], strides = [1, 1, 1, 1]} : vector<2x4x7x28xbf16> to vector<2x1x6x28xbf16>
    %19 = vector.shape_cast %18 : vector<2x1x6x28xbf16> to vector<2x6x28xbf16>
    %20 = vector.extract_strided_slice %0 {offsets = [0, 2, 1, 0], sizes = [2, 1, 6, 28], strides = [1, 1, 1, 1]} : vector<2x4x7x28xbf16> to vector<2x1x6x28xbf16>
    %21 = vector.shape_cast %20 : vector<2x1x6x28xbf16> to vector<2x6x28xbf16>
    %22 = tpu.concatenate %13, %15, %17, %19, %21 in 2 : vector<2x6x28xbf16>, vector<2x6x28xbf16>, vector<2x6x28xbf16>, vector<2x6x28xbf16>, vector<2x6x28xbf16> -> vector<2x6x140xbf16>
    %23 = vector.extract_strided_slice %0 {offsets = [0, 1, 0, 0], sizes = [2, 1, 6, 28], strides = [1, 1, 1, 1]} : vector<2x4x7x28xbf16> to vector<2x1x6x28xbf16>
    %24 = vector.shape_cast %23 : vector<2x1x6x28xbf16> to vector<2x6x28xbf16>
    %25 = vector.extract_strided_slice %0 {offsets = [0, 2, 0, 0], sizes = [2, 1, 6, 28], strides = [1, 1, 1, 1]} : vector<2x4x7x28xbf16> to vector<2x1x6x28xbf16>
    %26 = vector.shape_cast %25 : vector<2x1x6x28xbf16> to vector<2x6x28xbf16>
    %27 = vector.extract_strided_slice %0 {offsets = [0, 3, 0, 0], sizes = [2, 1, 6, 28], strides = [1, 1, 1, 1]} : vector<2x4x7x28xbf16> to vector<2x1x6x28xbf16>
    %28 = vector.shape_cast %27 : vector<2x1x6x28xbf16> to vector<2x6x28xbf16>
    %29 = vector.extract_strided_slice %0 {offsets = [0, 0, 1, 0], sizes = [2, 1, 6, 28], strides = [1, 1, 1, 1]} : vector<2x4x7x28xbf16> to vector<2x1x6x28xbf16>
    %30 = vector.shape_cast %29 : vector<2x1x6x28xbf16> to vector<2x6x28xbf16>
    %31 = vector.extract_strided_slice %0 {offsets = [0, 1, 1, 0], sizes = [2, 1, 6, 28], strides = [1, 1, 1, 1]} : vector<2x4x7x28xbf16> to vector<2x1x6x28xbf16>
    %32 = vector.shape_cast %31 : vector<2x1x6x28xbf16> to vector<2x6x28xbf16>
    %33 = tpu.concatenate %24, %26, %28, %30, %32 in 2 : vector<2x6x28xbf16>, vector<2x6x28xbf16>, vector<2x6x28xbf16>, vector<2x6x28xbf16>, vector<2x6x28xbf16> -> vector<2x6x140xbf16>
    %34 = vector.extract_strided_slice %0 {offsets = [0, 3, 0, 0], sizes = [2, 1, 6, 28], strides = [1, 1, 1, 1]} : vector<2x4x7x28xbf16> to vector<2x1x6x28xbf16>
    %35 = vector.shape_cast %34 : vector<2x1x6x28xbf16> to vector<2x6x28xbf16>
    %36 = vector.extract_strided_slice %0 {offsets = [0, 0, 1, 0], sizes = [2, 1, 6, 28], strides = [1, 1, 1, 1]} : vector<2x4x7x28xbf16> to vector<2x1x6x28xbf16>
    %37 = vector.shape_cast %36 : vector<2x1x6x28xbf16> to vector<2x6x28xbf16>
    %38 = vector.extract_strided_slice %0 {offsets = [0, 1, 1, 0], sizes = [2, 1, 6, 28], strides = [1, 1, 1, 1]} : vector<2x4x7x28xbf16> to vector<2x1x6x28xbf16>
    %39 = vector.shape_cast %38 : vector<2x1x6x28xbf16> to vector<2x6x28xbf16>
    %40 = vector.extract_strided_slice %0 {offsets = [0, 2, 1, 0], sizes = [2, 1, 6, 28], strides = [1, 1, 1, 1]} : vector<2x4x7x28xbf16> to vector<2x1x6x28xbf16>
    %41 = vector.shape_cast %40 : vector<2x1x6x28xbf16> to vector<2x6x28xbf16>
    %42 = vector.extract_strided_slice %0 {offsets = [0, 3, 1, 0], sizes = [2, 1, 6, 28], strides = [1, 1, 1, 1]} : vector<2x4x7x28xbf16> to vector<2x1x6x28xbf16>
    %43 = vector.shape_cast %42 : vector<2x1x6x28xbf16> to vector<2x6x28xbf16>
    %44 = tpu.concatenate %35, %37, %39, %41, %43 in 2 : vector<2x6x28xbf16>, vector<2x6x28xbf16>, vector<2x6x28xbf16>, vector<2x6x28xbf16>, vector<2x6x28xbf16> -> vector<2x6x140xbf16>
    %45 = tpu.concatenate %11, %22, %33, %44 in 1 : vector<2x6x140xbf16>, vector<2x6x140xbf16>, vector<2x6x140xbf16>, vector<2x6x140xbf16> -> vector<2x24x140xbf16>
    %46 = vector.shape_cast %45 : vector<2x24x140xbf16> to vector<48x140xbf16>
    %c0_3 = arith.constant 0 : index
    %c0_4 = arith.constant 0 : index
    %47 = vector.load %arg2[%c0_3, %c0_4] : memref<140x768xbf16, #tpu.memory_space<vmem>>, vector<140x768xbf16>
    %cst = arith.constant dense<0.000000e+00> : vector<48x768xf32>
    %48 = tpu.matmul %46, %47, %cst {dimension_numbers = #tpu.dot_dimension_numbers<[1], [0], [0], [1], [0, 0, 1, 1], [], []>} : vector<48x140xbf16>, vector<140x768xbf16>, vector<48x768xf32> -> vector<48x768xf32>
    %c0_5 = arith.constant 0 : index
    %c0_6 = arith.constant 0 : index
    %49 = vector.load %arg3[%c0_5, %c0_6] : memref<1x768xf32, #tpu.memory_space<vmem>>, vector<1x768xf32>
    %50 = vector.broadcast %49 : vector<1x768xf32> to vector<48x768xf32>
    %51 = arith.addf %48, %50 : vector<48x768xf32>
    %cst_7 = arith.constant 0.000000e+00 : f32
    %52 = vector.broadcast %cst_7 : f32 to vector<48x768xf32>
    %53 = arith.maximumf %51, %52 : vector<48x768xf32>
    %54 = vector.shape_cast %53 : vector<48x768xf32> to vector<2x24x768xf32>
    %55 = vector.extract_strided_slice %54 {offsets = [0, 0, 0], sizes = [2, 12, 768], strides = [1, 1, 1]} : vector<2x24x768xf32> to vector<2x12x768xf32>
    %56 = vector.extract_strided_slice %54 {offsets = [0, 12, 0], sizes = [2, 12, 768], strides = [1, 1, 1]} : vector<2x24x768xf32> to vector<2x12x768xf32>
    %57 = arith.maximumf %55, %56 : vector<2x12x768xf32>
    %58 = vector.extract_strided_slice %57 {offsets = [0, 0, 0], sizes = [2, 12, 384], strides = [1, 1, 1]} : vector<2x12x768xf32> to vector<2x12x384xf32>
    %59 = vector.extract_strided_slice %57 {offsets = [0, 0, 384], sizes = [2, 12, 384], strides = [1, 1, 1]} : vector<2x12x768xf32> to vector<2x12x384xf32>
    %60 = arith.maximumf %58, %59 : vector<2x12x384xf32>
    %61 = arith.truncf %60 : vector<2x12x384xf32> to vector<2x12x384xbf16>
    %62 = vector.extract_strided_slice %61 {offsets = [0, 0, 0], sizes = [2, 4, 384], strides = [1, 1, 1]} : vector<2x12x384xbf16> to vector<2x4x384xbf16>
    %63 = vector.extract_strided_slice %61 {offsets = [0, 6, 0], sizes = [2, 4, 384], strides = [1, 1, 1]} : vector<2x12x384xbf16> to vector<2x4x384xbf16>
    %64 = vector.extract_strided_slice %61 {offsets = [0, 1, 0], sizes = [2, 4, 384], strides = [1, 1, 1]} : vector<2x12x384xbf16> to vector<2x4x384xbf16>
    %65 = vector.extract_strided_slice %61 {offsets = [0, 7, 0], sizes = [2, 4, 384], strides = [1, 1, 1]} : vector<2x12x384xbf16> to vector<2x4x384xbf16>
    %66 = vector.extract_strided_slice %61 {offsets = [0, 2, 0], sizes = [2, 4, 384], strides = [1, 1, 1]} : vector<2x12x384xbf16> to vector<2x4x384xbf16>
    %67 = tpu.concatenate %62, %63, %64, %65, %66 in 2 : vector<2x4x384xbf16>, vector<2x4x384xbf16>, vector<2x4x384xbf16>, vector<2x4x384xbf16>, vector<2x4x384xbf16> -> vector<2x4x1920xbf16>
    %68 = vector.extract_strided_slice %61 {offsets = [0, 6, 0], sizes = [2, 4, 384], strides = [1, 1, 1]} : vector<2x12x384xbf16> to vector<2x4x384xbf16>
    %69 = vector.extract_strided_slice %61 {offsets = [0, 1, 0], sizes = [2, 4, 384], strides = [1, 1, 1]} : vector<2x12x384xbf16> to vector<2x4x384xbf16>
    %70 = vector.extract_strided_slice %61 {offsets = [0, 7, 0], sizes = [2, 4, 384], strides = [1, 1, 1]} : vector<2x12x384xbf16> to vector<2x4x384xbf16>
    %71 = vector.extract_strided_slice %61 {offsets = [0, 2, 0], sizes = [2, 4, 384], strides = [1, 1, 1]} : vector<2x12x384xbf16> to vector<2x4x384xbf16>
    %72 = vector.extract_strided_slice %61 {offsets = [0, 8, 0], sizes = [2, 4, 384], strides = [1, 1, 1]} : vector<2x12x384xbf16> to vector<2x4x384xbf16>
    %73 = tpu.concatenate %68, %69, %70, %71, %72 in 2 : vector<2x4x384xbf16>, vector<2x4x384xbf16>, vector<2x4x384xbf16>, vector<2x4x384xbf16>, vector<2x4x384xbf16> -> vector<2x4x1920xbf16>
    %74 = tpu.concatenate %67, %73 in 1 : vector<2x4x1920xbf16>, vector<2x4x1920xbf16> -> vector<2x8x1920xbf16>
    %75 = vector.shape_cast %74 : vector<2x8x1920xbf16> to vector<16x1920xbf16>
    %c0_8 = arith.constant 0 : index
    %c0_9 = arith.constant 0 : index
    %76 = vector.load %arg4[%c0_8, %c0_9] : memref<1920x512xbf16, #tpu.memory_space<vmem>>, vector<1920x512xbf16>
    %cst_10 = arith.constant dense<0.000000e+00> : vector<16x512xf32>
    %77 = tpu.matmul %75, %76, %cst_10 {dimension_numbers = #tpu.dot_dimension_numbers<[1], [0], [0], [1], [0, 0, 1, 1], [], []>} : vector<16x1920xbf16>, vector<1920x512xbf16>, vector<16x512xf32> -> vector<16x512xf32>
    %c0_11 = arith.constant 0 : index
    %c0_12 = arith.constant 0 : index
    %78 = vector.load %arg5[%c0_11, %c0_12] : memref<1x512xf32, #tpu.memory_space<vmem>>, vector<1x512xf32>
    %79 = vector.broadcast %78 : vector<1x512xf32> to vector<16x512xf32>
    %80 = arith.addf %77, %79 : vector<16x512xf32>
    %cst_13 = arith.constant 0.000000e+00 : f32
    %81 = vector.broadcast %cst_13 : f32 to vector<16x512xf32>
    %82 = arith.maximumf %80, %81 : vector<16x512xf32>
    %83 = vector.shape_cast %82 : vector<16x512xf32> to vector<2x8x512xf32>
    %84 = vector.extract_strided_slice %83 {offsets = [0, 0, 0], sizes = [2, 4, 512], strides = [1, 1, 1]} : vector<2x8x512xf32> to vector<2x4x512xf32>
    %85 = vector.extract_strided_slice %83 {offsets = [0, 4, 0], sizes = [2, 4, 512], strides = [1, 1, 1]} : vector<2x8x512xf32> to vector<2x4x512xf32>
    %86 = arith.maximumf %84, %85 : vector<2x4x512xf32>
    %87 = vector.extract_strided_slice %86 {offsets = [0, 0, 0], sizes = [2, 4, 256], strides = [1, 1, 1]} : vector<2x4x512xf32> to vector<2x4x256xf32>
    %88 = vector.extract_strided_slice %86 {offsets = [0, 0, 256], sizes = [2, 4, 256], strides = [1, 1, 1]} : vector<2x4x512xf32> to vector<2x4x256xf32>
    %89 = arith.maximumf %87, %88 : vector<2x4x256xf32>
    %90 = vector.extract_strided_slice %89 {offsets = [0, 0, 0], sizes = [2, 1, 256], strides = [1, 1, 1]} : vector<2x4x256xf32> to vector<2x1x256xf32>
    %91 = vector.shape_cast %90 : vector<2x1x256xf32> to vector<2x256xf32>
    %92 = vector.extract_strided_slice %89 {offsets = [0, 1, 0], sizes = [2, 1, 256], strides = [1, 1, 1]} : vector<2x4x256xf32> to vector<2x1x256xf32>
    %93 = vector.shape_cast %92 : vector<2x1x256xf32> to vector<2x256xf32>
    %94 = vector.extract_strided_slice %89 {offsets = [0, 2, 0], sizes = [2, 1, 256], strides = [1, 1, 1]} : vector<2x4x256xf32> to vector<2x1x256xf32>
    %95 = vector.shape_cast %94 : vector<2x1x256xf32> to vector<2x256xf32>
    %96 = vector.extract_strided_slice %89 {offsets = [0, 3, 0], sizes = [2, 1, 256], strides = [1, 1, 1]} : vector<2x4x256xf32> to vector<2x1x256xf32>
    %97 = vector.shape_cast %96 : vector<2x1x256xf32> to vector<2x256xf32>
    %98 = tpu.concatenate %91, %93, %95, %97 in 1 : vector<2x256xf32>, vector<2x256xf32>, vector<2x256xf32>, vector<2x256xf32> -> vector<2x1024xf32>
    %99 = arith.truncf %98 : vector<2x1024xf32> to vector<2x1024xbf16>
    %c0_14 = arith.constant 0 : index
    %c0_15 = arith.constant 0 : index
    %100 = vector.load %arg6[%c0_14, %c0_15] : memref<1024x256xbf16, #tpu.memory_space<vmem>>, vector<1024x256xbf16>
    %cst_16 = arith.constant dense<0.000000e+00> : vector<2x256xf32>
    %101 = tpu.matmul %99, %100, %cst_16 {dimension_numbers = #tpu.dot_dimension_numbers<[1], [0], [0], [1], [0, 0, 1, 1], [], []>} : vector<2x1024xbf16>, vector<1024x256xbf16>, vector<2x256xf32> -> vector<2x256xf32>
    %c0_17 = arith.constant 0 : index
    %c0_18 = arith.constant 0 : index
    %102 = vector.load %arg7[%c0_17, %c0_18] : memref<1x256xf32, #tpu.memory_space<vmem>>, vector<1x256xf32>
    %103 = vector.broadcast %102 : vector<1x256xf32> to vector<2x256xf32>
    %104 = arith.addf %101, %103 : vector<2x256xf32>
    %cst_19 = arith.constant 0.000000e+00 : f32
    %105 = vector.broadcast %cst_19 : f32 to vector<2x256xf32>
    %106 = arith.maximumf %104, %105 : vector<2x256xf32>
    %107 = arith.truncf %106 : vector<2x256xf32> to vector<2x256xbf16>
    %c0_20 = arith.constant 0 : index
    %c0_21 = arith.constant 0 : index
    %108 = vector.load %arg8[%c0_20, %c0_21] : memref<256x256xbf16, #tpu.memory_space<vmem>>, vector<256x256xbf16>
    %cst_22 = arith.constant dense<0.000000e+00> : vector<2x256xf32>
    %109 = tpu.matmul %107, %108, %cst_22 {dimension_numbers = #tpu.dot_dimension_numbers<[1], [0], [0], [1], [0, 0, 1, 1], [], []>} : vector<2x256xbf16>, vector<256x256xbf16>, vector<2x256xf32> -> vector<2x256xf32>
    %c0_23 = arith.constant 0 : index
    %c0_24 = arith.constant 0 : index
    %110 = vector.load %arg9[%c0_23, %c0_24] : memref<1x256xf32, #tpu.memory_space<vmem>>, vector<1x256xf32>
    %111 = vector.broadcast %110 : vector<1x256xf32> to vector<2x256xf32>
    %112 = arith.addf %109, %111 : vector<2x256xf32>
    %cst_25 = arith.constant 0.000000e+00 : f32
    %113 = vector.broadcast %cst_25 : f32 to vector<2x256xf32>
    %114 = arith.maximumf %112, %113 : vector<2x256xf32>
    %115 = arith.truncf %114 : vector<2x256xf32> to vector<2x256xbf16>
    %c0_26 = arith.constant 0 : index
    %c0_27 = arith.constant 0 : index
    %116 = vector.load %arg10[%c0_26, %c0_27] : memref<256x128xbf16, #tpu.memory_space<vmem>>, vector<256x128xbf16>
    %cst_28 = arith.constant dense<0.000000e+00> : vector<2x128xf32>
    %117 = tpu.matmul %115, %116, %cst_28 {dimension_numbers = #tpu.dot_dimension_numbers<[1], [0], [0], [1], [0, 0, 1, 1], [], []>} : vector<2x256xbf16>, vector<256x128xbf16>, vector<2x128xf32> -> vector<2x128xf32>
    %c0_29 = arith.constant 0 : index
    %c0_30 = arith.constant 0 : index
    %118 = vector.load %arg11[%c0_29, %c0_30] : memref<1x128xf32, #tpu.memory_space<vmem>>, vector<1x128xf32>
    %119 = vector.broadcast %118 : vector<1x128xf32> to vector<2x128xf32>
    %120 = arith.addf %117, %119 : vector<2x128xf32>
    %c0_31 = arith.constant 0 : index
    %c0_32 = arith.constant 0 : index
    %121 = vector.load %arg12[%c0_31, %c0_32] : memref<2x128xf32, #tpu.memory_space<vmem>>, vector<2x128xf32>
    tpu.vector_store %arg12[%c0_31, %c0_32], %120 {strides = array<i32>} : memref<2x128xf32, #tpu.memory_space<vmem>>, vector<2x128xf32>,
    return
  }
  func.func @transform_0(%arg0: i32) -> (i32, i32, i32, i32) {
    %c0_i32 = arith.constant 0 : i32
    %c0_i32_0 = arith.constant 0 : i32
    %c0_i32_1 = arith.constant 0 : i32
    %c0_i32_2 = arith.constant 0 : i32
    return %arg0, %c0_i32, %c0_i32_0, %c0_i32_1 : i32, i32, i32, i32
  }
  func.func @transform_1(%arg0: i32) -> (i32, i32) {
    %c0_i32 = arith.constant 0 : i32
    %c0_i32_0 = arith.constant 0 : i32
    %c0_i32_1 = arith.constant 0 : i32
    return %c0_i32, %c0_i32_0 : i32, i32
  }
  func.func @transform_2(%arg0: i32) -> (i32, i32) {
    %c0_i32 = arith.constant 0 : i32
    %c0_i32_0 = arith.constant 0 : i32
    %c0_i32_1 = arith.constant 0 : i32
    return %c0_i32, %c0_i32_0 : i32, i32
  }
  func.func @transform_3(%arg0: i32) -> (i32, i32) {
    %c0_i32 = arith.constant 0 : i32
    %c0_i32_0 = arith.constant 0 : i32
    %c0_i32_1 = arith.constant 0 : i32
    return %c0_i32, %c0_i32_0 : i32, i32
  }
  func.func @transform_4(%arg0: i32) -> (i32, i32) {
    %c0_i32 = arith.constant 0 : i32
    %c0_i32_0 = arith.constant 0 : i32
    %c0_i32_1 = arith.constant 0 : i32
    return %c0_i32, %c0_i32_0 : i32, i32
  }
  func.func @transform_5(%arg0: i32) -> (i32, i32) {
    %c0_i32 = arith.constant 0 : i32
    %c0_i32_0 = arith.constant 0 : i32
    %c0_i32_1 = arith.constant 0 : i32
    return %c0_i32, %c0_i32_0 : i32, i32
  }
  func.func @transform_6(%arg0: i32) -> (i32, i32) {
    %c0_i32 = arith.constant 0 : i32
    %c0_i32_0 = arith.constant 0 : i32
    %c0_i32_1 = arith.constant 0 : i32
    return %c0_i32, %c0_i32_0 : i32, i32
  }
  func.func @transform_7(%arg0: i32) -> (i32, i32) {
    %c0_i32 = arith.constant 0 : i32
    %c0_i32_0 = arith.constant 0 : i32
    %c0_i32_1 = arith.constant 0 : i32
    return %c0_i32, %c0_i32_0 : i32, i32
  }
  func.func @transform_8(%arg0: i32) -> (i32, i32) {
    %c0_i32 = arith.constant 0 : i32
    %c0_i32_0 = arith.constant 0 : i32
    %c0_i32_1 = arith.constant 0 : i32
    return %c0_i32, %c0_i32_0 : i32, i32
  }
  func.func @transform_9(%arg0: i32) -> (i32, i32) {
    %c0_i32 = arith.constant 0 : i32
    %c0_i32_0 = arith.constant 0 : i32
    %c0_i32_1 = arith.constant 0 : i32
    return %c0_i32, %c0_i32_0 : i32, i32
  }
  func.func @transform_10(%arg0: i32) -> (i32, i32) {
    %c0_i32 = arith.constant 0 : i32
    %c0_i32_0 = arith.constant 0 : i32
    %c0_i32_1 = arith.constant 0 : i32
    return %c0_i32, %c0_i32_0 : i32, i32
  }
  func.func @transform_11(%arg0: i32) -> (i32, i32) {
    %c0_i32 = arith.constant 0 : i32
    %c0_i32_0 = arith.constant 0 : i32
    return %arg0, %c0_i32 : i32, i32
  }
}

</mosaic_0001>

<bundles_post_ra>
// kernel: cnn_forward.1
= control target key start
LH: loop header
LB: loop body
LE: loop exit
PB: predicated region body
PF: predicated region fallthrough
CT: control target
= control target key end

     0   :  { %16 = vsyncpa [#allocation3], 0  ;;  %s9582_s0 = inlined_call_operand.vmem [shape: bf16[2,4,7,28], index: 0, kind: input, shape index: {}]   ;;  %s9583_s1 = inlined_call_operand.hbm [shape: bf16[140,768], index: 1, kind: input, shape index: {}]   ;;  %s9584_s2 = inlined_call_operand.hbm [shape: f32[1,768], index: 2, kind: input, shape index: {}]   ;;  %s9585_s3 = inlined_call_operand.hbm [shape: bf16[1920,512], index: 3, kind: input, shape index: {}]   ;;  %s9586_s4 = inlined_call_operand.hbm [shape: f32[1,512], index: 4, kind: input, shape index: {}]   ;;  %s9587_s5 = inlined_call_operand.hbm [shape: bf16[1024,256], index: 5, kind: input, shape index: {}]   ;;  %s9588_s6 = inlined_call_operand.hbm [shape: f32[1,256], index: 6, kind: input, shape index: {}]   ;;  %s9589_s7 = inlined_call_operand.hbm [shape: bf16[256,256], index: 7, kind: input, shape index: {}]   ;;  %s9590_s8 = inlined_call_operand.hbm [shape: f32[1,256], index: 8, kind: input, shape index: {}]   ;;  %s9591_s9 = inlined_call_operand.hbm [shape: bf16[256,128], index: 9, kind: input, shape index: {}]   ;;  %s9592_s10 = inlined_call_operand.hbm [shape: f32[1,128], index: 10, kind: input, shape index: {}]   ;;  %s9593_s11 = inlined_call_operand.hbm [shape: f32[2,128], index: 11, kind: output, shape index: {}]  }
   0x1   :  { %17 = vsyncpa [#allocation6], 0 }
   0x2   :  { %18 = vsyncpa [#allocation9], 0 }
   0x3   :  { %19 = vsyncpa [#allocation12], 0 }
   0x4   :  { %20 = vsyncpa [#allocation15], 0 }
   0x5   :  { %21 = vsyncpa [#allocation18], 0 }
   0x6   :  { %22 = vsyncpa [#allocation4], 0  ;;  %s8765_s17 = smov [#allocation5]   ;;  %s8766_s19 = smov [#allocation8]  }
   0x7   :  { %s43_s18 = sshll.u32 %s8765_s17, 4  ;;  %s65_s20 = sshll.u32 %s8766_s19, 4  ;;  %s44_s18 = int_to_ptr.vmem [resolvable:$true] %s43_s18  ;;  %s66_s20 = int_to_ptr.vmem [resolvable:$true] %s65_s20 }
   0x8   :  { %s8509_s23 = scalar_lea.hbm %s9584_s2, 96 }
   0x9   :  { %p8510_p0 = scmp.ne.s32.totalorder %s9584_s2, %s8509_s23  ;;  %p8513_p1 = scmp.lt.u32.totalorder %s8509_s23, %s9584_s2 }
   0xb   :  { %p8515_p2 = pnand %p8513_p1, %p8510_p0 }
   0xd   :  { %8518 = shalt.err (!%p8515_p2)
}
   0xe   :  { %s8519_s28 = scalar_lea.vmem %s44_s18, 96  ;;  %p8524_p4 = scmp.lt.s32.totalorder %s44_s18, %s44_s18 }
   0xf   :  { %p8520_p3 = scmp.ne.s32.totalorder %s44_s18, %s8519_s28  ;;  %p8525_p5 = scmp.lt.s32.totalorder %s8519_s28, %s8519_s28 }
  0x11   :  { %p8526_p6 = por %p8525_p5, %p8524_p4 }
  0x13   :  { %p8527_p7 = pnand %p8526_p6, %p8520_p3 }
  0x15   :  { %8530 = shalt.err (!%p8527_p7)
}
  0x16   :  { %46 = dma.hbm_to_vmem [thread:$0]  %s9584_s2, 96, %s44_s18, [#allocation6]  }
  0x17   :  { %s8531_s14 = scalar_lea.hbm %s9586_s4, 64 }
  0x18   :  { %p8532_p8 = scmp.ne.s32.totalorder %s9586_s4, %s8531_s14  ;;  %p8535_p9 = scmp.lt.u32.totalorder %s8531_s14, %s9586_s4 }
  0x1a   :  { %p8537_p10 = pnand %p8535_p9, %p8532_p8 }
  0x1c   :  { %8540 = shalt.err (!%p8537_p10)
}
  0x1d   :  { %s8541_s21 = scalar_lea.vmem %s66_s20, 64  ;;  %p8546_p12 = scmp.lt.s32.totalorder %s66_s20, %s66_s20 }
  0x1e   :  { %p8542_p11 = scmp.ne.s32.totalorder %s66_s20, %s8541_s21  ;;  %p8547_p13 = scmp.lt.s32.totalorder %s8541_s21, %s8541_s21 }
  0x20   :  { %p8548_p0 = por %p8547_p13, %p8546_p12 }
  0x22   :  { %p8549_p1 = pnand %p8548_p0, %p8542_p11 }
  0x24   :  { %8552 = shalt.err (!%p8549_p1)
}
  0x25   :  { %68 = dma.hbm_to_vmem [thread:$0]  %s9586_s4, 64, %s66_s20, [#allocation9]  }
  0x26   :  { %s8767_s22 = smov [#allocation11]   ;;  %s8768_s24 = smov [#allocation14]  }
  0x27   :  { %s87_s23 = sshll.u32 %s8767_s22, 4  ;;  %s109_s25 = sshll.u32 %s8768_s24, 4  ;;  %s88_s23 = int_to_ptr.vmem [resolvable:$true] %s87_s23  ;;  %s110_s25 = int_to_ptr.vmem [resolvable:$true] %s109_s25 }
  0x28   :  { %s8553_s28 = scalar_lea.hbm %s9588_s6, 32 }
  0x29   :  { %p8554_p2 = scmp.ne.s32.totalorder %s9588_s6, %s8553_s28  ;;  %p8557_p3 = scmp.lt.u32.totalorder %s8553_s28, %s9588_s6 }
  0x2b   :  { %p8559_p4 = pnand %p8557_p3, %p8554_p2 }
  0x2d   :  { %8562 = shalt.err (!%p8559_p4)
}
  0x2e   :  { %s8563_s4 = scalar_lea.vmem %s88_s23, 32  ;;  %p8568_p6 = scmp.lt.s32.totalorder %s88_s23, %s88_s23 }
  0x2f   :  { %p8564_p5 = scmp.ne.s32.totalorder %s88_s23, %s8563_s4  ;;  %p8569_p7 = scmp.lt.s32.totalorder %s8563_s4, %s8563_s4 }
  0x31   :  { %p8570_p8 = por %p8569_p7, %p8568_p6 }
  0x33   :  { %p8571_p9 = pnand %p8570_p8, %p8564_p5 }
  0x35   :  { %8574 = shalt.err (!%p8571_p9)
}
  0x36   :  { %90 = dma.hbm_to_vmem [thread:$0]  %s9588_s6, 32, %s88_s23, [#allocation12]  }
  0x37   :  { %s8575_s17 = scalar_lea.hbm %s9590_s8, 32 }
  0x38   :  { %p8576_p10 = scmp.ne.s32.totalorder %s9590_s8, %s8575_s17  ;;  %p8579_p11 = scmp.lt.u32.totalorder %s8575_s17, %s9590_s8 }
  0x3a   :  { %p8581_p12 = pnand %p8579_p11, %p8576_p10 }
  0x3c   :  { %8584 = shalt.err (!%p8581_p12)
}
  0x3d   :  { %s8585_s22 = scalar_lea.vmem %s110_s25, 32  ;;  %p8590_p0 = scmp.lt.s32.totalorder %s110_s25, %s110_s25 }
  0x3e   :  { %p8586_p13 = scmp.ne.s32.totalorder %s110_s25, %s8585_s22  ;;  %p8591_p1 = scmp.lt.s32.totalorder %s8585_s22, %s8585_s22 }
  0x40   :  { %p8592_p2 = por %p8591_p1, %p8590_p0 }
  0x42   :  { %p8593_p3 = pnand %p8592_p2, %p8586_p13 }
  0x44   :  { %8596 = shalt.err (!%p8593_p3)
}
  0x45   :  { %112 = dma.hbm_to_vmem [thread:$0]  %s9590_s8, 32, %s110_s25, [#allocation15]  }
  0x46   :  { %s8769_s24 = smov [#allocation2]   ;;  %s8597_s29 = scalar_lea.hbm %s9583_s1, 6912 }
  0x47   :  { %s30_s26 = sshll.u32 %s8769_s24, 4  ;;  %p8598_p4 = scmp.ne.s32.totalorder %s9583_s1, %s8597_s29  ;;  %s31_s26 = int_to_ptr.vmem [resolvable:$true] %s30_s26 }
  0x48   :  { %p8601_p5 = scmp.lt.u32.totalorder %s8597_s29, %s9583_s1 }
  0x4a   :  { %p8603_p6 = pnand %p8601_p5, %p8598_p4 }
  0x4c   :  { %8606 = shalt.err (!%p8603_p6)
}
  0x4d   :  { %s8607_s20 = scalar_lea.vmem %s31_s26, 6912  ;;  %p8612_p8 = scmp.lt.s32.totalorder %s31_s26, %s31_s26 }
  0x4e   :  { %p8608_p7 = scmp.ne.s32.totalorder %s31_s26, %s8607_s20  ;;  %p8613_p9 = scmp.lt.s32.totalorder %s8607_s20, %s8607_s20 }
  0x50   :  { %p8614_p10 = por %p8613_p9, %p8612_p8 }
  0x52   :  { %p8615_p11 = pnand %p8614_p10, %p8608_p7 }
  0x54   :  { %8618 = shalt.err (!%p8615_p11)
}
  0x55   :  { %s8770_s8 = smov 384   ;;  %s8771_s25 = smov 24  }
  0x56   :  { %36 = dma.hbm_to_vmem [thread:$0]  %s9583_s1, 6912, %s31_s26, [#allocation3], %s8770_s8, %s8770_s8, %s8771_s25  }
  0x57   :  { %s8772_s16 = smov [#allocation7]   ;;  %s8619_s2 = scalar_lea.hbm %s9585_s3, 61440 }
  0x58   :  { %s52_s17 = sshll.u32 %s8772_s16, 4  ;;  %p8620_p12 = scmp.ne.s32.totalorder %s9585_s3, %s8619_s2  ;;  %s53_s17 = int_to_ptr.vmem [resolvable:$true] %s52_s17 }
  0x59   :  { %p8623_p13 = scmp.lt.u32.totalorder %s8619_s2, %s9585_s3 }
  0x5b   :  { %p8625_p0 = pnand %p8623_p13, %p8620_p12 }
  0x5d   :  { %8628 = shalt.err (!%p8625_p0)
}
  0x5e   :  { %s8629_s24 = scalar_lea.vmem %s53_s17, 61440  ;;  %p8634_p2 = scmp.lt.s32.totalorder %s53_s17, %s53_s17 }
  0x5f   :  { %p8630_p1 = scmp.ne.s32.totalorder %s53_s17, %s8629_s24  ;;  %p8635_p3 = scmp.lt.s32.totalorder %s8629_s24, %s8629_s24 }
  0x61   :  { %p8636_p4 = por %p8635_p3, %p8634_p2 }
  0x63   :  { %p8637_p5 = pnand %p8636_p4, %p8630_p1 }
  0x65   :  { %8640 = shalt.err (!%p8637_p5)
}
  0x66   :  { %s8773_s1 = smov 256   ;;  %s8774_s26 = smov 16  }
  0x67   :  { %58 = dma.hbm_to_vmem [thread:$0]  %s9585_s3, 61440, %s53_s17, [#allocation6], %s8773_s1, %s8773_s1, %s8774_s26  }
  0x68   :  { %s8775_s29 = smov [#allocation10]   ;;  %s8641_s4 = scalar_lea.hbm %s9587_s5, 16384 }
  0x69   :  { %s74_s30 = sshll.u32 %s8775_s29, 4  ;;  %p8642_p6 = scmp.ne.s32.totalorder %s9587_s5, %s8641_s4  ;;  %s75_s30 = int_to_ptr.vmem [resolvable:$true] %s74_s30 }
  0x6a   :  { %p8645_p7 = scmp.lt.u32.totalorder %s8641_s4, %s9587_s5 }
  0x6c   :  { %p8647_p8 = pnand %p8645_p7, %p8642_p6 }
  0x6e   :  { %8650 = shalt.err (!%p8647_p8)
}
  0x6f   :  { %s8651_s15 = scalar_lea.vmem %s75_s30, 16384  ;;  %p8656_p10 = scmp.lt.s32.totalorder %s75_s30, %s75_s30 }
  0x70   :  { %p8652_p9 = scmp.ne.s32.totalorder %s75_s30, %s8651_s15  ;;  %p8657_p11 = scmp.lt.s32.totalorder %s8651_s15, %s8651_s15 }
  0x72   :  { %p8658_p12 = por %p8657_p11, %p8656_p10 }
  0x74   :  { %p8659_p13 = pnand %p8658_p12, %p8652_p9 }
  0x76   :  { %8662 = shalt.err (!%p8659_p13)
}
  0x77   :  { %s8776_s3 = smov 128   ;;  %s8777_s16 = smov 8  }
  0x78   :  { %80 = dma.hbm_to_vmem [thread:$0]  %s9587_s5, 16384, %s75_s30, [#allocation9], %s8776_s3, %s8776_s3, %s8777_s16  }
  0x79   :  { %s8778_s21 = smov [#allocation13]   ;;  %s8779_s18 = smov [#allocation16]  }
  0x7a   :  { %s96_s2 = sshll.u32 %s8778_s21, 4  ;;  %s118_s22 = sshll.u32 %s8779_s18, 4  ;;  %s97_s2 = int_to_ptr.vmem [resolvable:$true] %s96_s2  ;;  %s119_s22 = int_to_ptr.vmem [resolvable:$true] %s118_s22 }
  0x7b   :  { %s8663_s24 = scalar_lea.hbm %s9589_s7, 4096 }
  0x7c   :  { %p8664_p0 = scmp.ne.s32.totalorder %s9589_s7, %s8663_s24  ;;  %p8667_p1 = scmp.lt.u32.totalorder %s8663_s24, %s9589_s7 }
  0x7e   :  { %p8669_p2 = pnand %p8667_p1, %p8664_p0 }
  0x80   :  { %8672 = shalt.err (!%p8669_p2)
}
  0x81   :  { %s8673_s5 = scalar_lea.vmem %s97_s2, 4096  ;;  %p8678_p4 = scmp.lt.s32.totalorder %s97_s2, %s97_s2 }
  0x82   :  { %p8674_p3 = scmp.ne.s32.totalorder %s97_s2, %s8673_s5  ;;  %p8679_p5 = scmp.lt.s32.totalorder %s8673_s5, %s8673_s5 }
  0x84   :  { %p8680_p6 = por %p8679_p5, %p8678_p4 }
  0x86   :  { %p8681_p7 = pnand %p8680_p6, %p8674_p3 }
  0x88   :  { %8684 = shalt.err (!%p8681_p7)
}
  0x89   :  { %102 = dma.hbm_to_vmem [thread:$0]  %s9589_s7, 4096, %s97_s2, [#allocation12], %s8776_s3, %s8776_s3, %s8777_s16  }
  0x8a   :  { %s8685_s4 = scalar_lea.hbm %s9591_s9, 2048 }
  0x8b   :  { %p8686_p8 = scmp.ne.s32.totalorder %s9591_s9, %s8685_s4  ;;  %p8689_p9 = scmp.lt.u32.totalorder %s8685_s4, %s9591_s9 }
  0x8d   :  { %p8691_p10 = pnand %p8689_p9, %p8686_p8 }
  0x8f   :  { %8694 = shalt.err (!%p8691_p10)
}
  0x90   :  { %s8695_s15 = scalar_lea.vmem %s119_s22, 2048  ;;  %p8700_p12 = scmp.lt.s32.totalorder %s119_s22, %s119_s22 }
  0x91   :  { %p8696_p11 = scmp.ne.s32.totalorder %s119_s22, %s8695_s15  ;;  %p8701_p13 = scmp.lt.s32.totalorder %s8695_s15, %s8695_s15 }
  0x93   :  { %p8702_p0 = por %p8701_p13, %p8700_p12 }
  0x95   :  { %p8703_p1 = pnand %p8702_p0, %p8696_p11 }
  0x97   :  { %8706 = shalt.err (!%p8703_p1)
}
  0x98   :  { %s8780_s7 = smov 64   ;;  %s8781_s3 = smov 4  }
  0x99   :  { %124 = dma.hbm_to_vmem [thread:$0]  %s9591_s9, 2048, %s119_s22, [#allocation15], %s8780_s7, %s8780_s7, %s8781_s3  }
  0x9a   :  { %s8782_s19 = smov [#allocation17]   ;;  %s8707_s6 = scalar_lea.hbm %s9592_s10, 16 }
  0x9b   :  { %s131_s21 = sshll.u32 %s8782_s19, 4  ;;  %p8708_p2 = scmp.ne.s32.totalorder %s9592_s10, %s8707_s6  ;;  %s132_s21 = int_to_ptr.vmem [resolvable:$true] %s131_s21 }
  0x9c   :  { %p8711_p3 = scmp.lt.u32.totalorder %s8707_s6, %s9592_s10 }
  0x9e   :  { %p8713_p4 = pnand %p8711_p3, %p8708_p2 }
  0xa0   :  { %8716 = shalt.err (!%p8713_p4)
}
  0xa1   :  { %s8717_s27 = scalar_lea.vmem %s132_s21, 16  ;;  %s8721_s9 = scalar_lea.vmem %s132_s21, 32 }
  0xa2   :  { %p8718_p5 = scmp.ne.s32.totalorder %s132_s21, %s8717_s27  ;;  %p8722_p6 = scmp.lt.s32.totalorder %s132_s21, %s132_s21 }
  0xa3   :  { %p8723_p7 = scmp.lt.s32.totalorder %s8721_s9, %s8717_s27 }
  0xa5   :  { %p8724_p8 = por %p8723_p7, %p8722_p6 }
  0xa7   :  { %p8725_p9 = pnand %p8724_p8, %p8718_p5 }
  0xa9   :  { %8728 = shalt.err (!%p8725_p9)
}
  0xaa   :  { %134 = dma.hbm_to_vmem [thread:$0]  %s9592_s10, 16, %s132_s21, [#allocation18]  }
  0xab   :  { %8751 = dma.done.wait [#allocation3], 6912  }
  0xac   :  { %8752 = vsyncadd [#allocation3], 4294960384 }
  0xad   :  { %8753 = dma.done.wait [#allocation6], 61536  }
  0xae   :  { %8754 = vsyncadd [#allocation6], 4294905760 }
  0xaf   :  { %8755 = dma.done.wait [#allocation9], 16448  }
  0xb0   :  { %8756 = vsyncadd [#allocation9], 4294950848 }
  0xb1   :  { %8757 = dma.done.wait [#allocation12], 4128  }
  0xb2   :  { %8758 = vsyncadd [#allocation12], 4294963168 }
  0xb3   :  { %8759 = dma.done.wait [#allocation15], 2080  }
  0xb4   :  { %8760 = vsyncadd [#allocation15], 4294965216 }
  0xb5   :  { %8761 = dma.done.wait [#allocation18], 16  }
  0xb6   :  { %8762 = vsyncadd [#allocation18], 4294967280  ;;  %v169_v0 = vld [vmem:[%s9582_s0 + $0xc] sm:$0xf]  ;;  %v8975_v1 = vld [vmem:[%s9582_s0 + $0x8] sm:$0xf] }
  0xb7   :  { %v8980_v2 = vld [vmem:[%s9582_s0 + $0x4] sm:$0xf]  ;;  %v8982_v3 = vcombine.low %v169_v0, %v169_v0  ;;  %v6563_v4 = vcombine.low %v8975_v1, %v8975_v1  ;;  %v8991_v6 = vld [vmem:[%s9582_s0] sm:$0xf]  ;;  %s8783_s8 = smov 28   ;;  %s8784_s15 = smov 56  }
  0xb8   :  { %v6561_v5 = vcombine.low %v8980_v2, %v8980_v2  ;;  %v6567_v7 = vcombine.low %v8991_v6, %v8991_v6  ;;  %v7447_v11 = vld [vmem:[#allocation2 + $0x4] ss:$24 sps:$4 sm:$0xff]   ;;  %v170_v15 = vld [vmem:[%s9582_s0 + $0x10] sm:$0xf]  ;;  %v7451_v16 = vld [vmem:[#allocation2] ss:$24 sps:$4 sm:$0xff]  }
  0xb9   :  { %250 = vrot.lane.b32.xlu0 %v8982_v3, %s8783_s8  ;;  %312 = vrot.lane.b32.xlu1 %v6563_v4, %s8783_s8  ;;  %v7449_v12 = vld [vmem:[#allocation2 + $0xc] ss:$24 sps:$4 sm:$0xff]   ;;  %v279_v18 = vshll.u32 %v6563_v4, 16  ;;  %v7452_v19 = vld [vmem:[#allocation2 + $0x8] ss:$24 sps:$4 sm:$0xff]   ;;  %v277_v26 = vshrl.u32 %v6563_v4, 16  ;;  %v6568_v28 = vcombine.low %v170_v15, %v170_v15 }
  0xba   :  { %v261_v8 = vshll.u32 %v6561_v5, 16  ;;  %v211_v9 = vshrl.u32 %v6567_v7, 16  ;;  %v213_v10 = vshll.u32 %v6567_v7, 16  ;;  %v259_v14 = vshrl.u32 %v6561_v5, 16  ;;  %846 = vmatprep.subr.bf16.mxu0 %v7447_v11  ;;  %909 = vmatprep.subr.bf16.mxu1 %v7449_v12  ;;  %v7453_v21 = vld [vmem:[#allocation2 + $0x34] ss:$24 sps:$4 sm:$0xff]  }
  0xbb   :  { %847 = vmatpush1.bf16.msra.mxu0 %v7451_v16  ;;  %910 = vmatpush1.bf16.msra.mxu1 %v7452_v19  ;;  %v7455_v22 = vld [vmem:[#allocation2 + $0x3c] ss:$24 sps:$4 sm:$0xff]   ;;  %v7457_v23 = vld [vmem:[#allocation2 + $0x30] ss:$24 sps:$4 sm:$0xff]   ;;  %v281_v27 = vrot.slane %v279_v18, 1  ;;  %s8785_s7 = smov 84  }
  0xbc   :  { %v215_v13 = vrot.slane %v213_v10, 1  ;;  %v263_v17 = vrot.slane %v261_v8, 1  ;;  %848 = vmatprep.subr.bf16.mxu0 %v7453_v21  ;;  %v7458_v24 = vld [vmem:[#allocation2 + $0x38] ss:$24 sps:$4 sm:$0xff]   ;;  %v7459_v29 = vld [vmem:[#allocation2 + $0x64] ss:$24 sps:$4 sm:$0xff]   ;;  %911 = vmatprep.subr.bf16.mxu1 %v7455_v22 }
  0xbd   :  { %190 = vrot.lane.b32.xlu0 %v6563_v4, %s8784_s15  ;;  %180 = vrot.lane.b32.xlu1 %v6561_v5, %s8783_s8  ;;  %v7461_v30 = vld [vmem:[#allocation2 + $0x6c] ss:$24 sps:$4 sm:$0xff]   ;;  %v7463_v31 = vld [vmem:[#allocation2 + $0x60] ss:$24 sps:$4 sm:$0xff]   ;;  %v7467_v34 = vld [vmem:[#allocation2 + $0x9c] ss:$24 sps:$4 sm:$0xff]   ;;  %v9015_v35 = vor.u32 %v281_v27, %v277_v26 }
  0xbe   :  { %v9003_v20 = vor.u32 %v215_v13, %v211_v9  ;;  %v9009_v25 = vor.u32 %v263_v17, %v259_v14  ;;  %v7464_v32 = vld [vmem:[#allocation2 + $0x68] ss:$24 sps:$4 sm:$0xff]   ;;  %v7465_v33 = vld [vmem:[#allocation2 + $0x94] ss:$24 sps:$4 sm:$0xff]   ;;  %v220_v36 = vshll.u32 %v6568_v28, 16  ;;  %s8786_s17 = smov 112  }
  0xbf   :  { %849 = vmatpush1.bf16.msra.mxu0 %v7457_v23  ;;  %912 = vmatpush1.bf16.msra.mxu1 %v7458_v24  ;;  %v171_v37 = vld [vmem:[%s9582_s0 + $0x14] sm:$0xf]  ;;  %v7469_v38 = vld [vmem:[#allocation2 + $0x90] ss:$24 sps:$4 sm:$0xff]   ;;  %v7471_v40 = vld [vmem:[#allocation2 + $0xc4] ss:$24 sps:$4 sm:$0xff]  }
  0xc0   :  { %850 = vmatprep.subr.bf16.mxu0 %v7459_v29  ;;  %913 = vmatprep.subr.bf16.mxu1 %v7461_v30  ;;  %v7470_v39 = vld [vmem:[#allocation2 + $0x98] ss:$24 sps:$4 sm:$0xff]   ;;  %v7473_v41 = vld [vmem:[#allocation2 + $0xcc] ss:$24 sps:$4 sm:$0xff]   ;;  %v218_v42 = vshrl.u32 %v6568_v28, 16  ;;  %v222_v43 = vrot.slane %v220_v36, 1  ;;  %v6562_v44 = vcombine.low %v171_v37, %v171_v37 }
  0xc1   :  { %316 = vrot.lane.b32.xlu1 %v8982_v3, %s8784_s15  ;;  %254 = vrot.lane.b32.xlu0 %v9003_v20, %s8784_s15  ;;  %v173_v45 = vld [vmem:[%s9582_s0 + $0x1c] sm:$0xf]  ;;  %v7475_v46 = vld [vmem:[#allocation2 + $0xc0] ss:$24 sps:$4 sm:$0xff]   ;;  %v7477_v48 = vld [vmem:[#allocation2 + $0xf4] ss:$24 sps:$4 sm:$0xff]  }
  0xc2   :  { %v7476_v47 = vld [vmem:[#allocation2 + $0xc8] ss:$24 sps:$4 sm:$0xff]   ;;  %v7479_v49 = vld [vmem:[#allocation2 + $0xfc] ss:$24 sps:$4 sm:$0xff]   ;;  %v9031_v50 = vor.u32 %v222_v43, %v218_v42  ;;  %v9033_v51 = vcombine.low %v173_v45, %v173_v45  ;;  %v172_v52 = vld [vmem:[%s9582_s0 + $0x18] sm:$0xf] }
  0xc3   :  { %851 = vmatpush1.bf16.msra.mxu0 %v7463_v31  ;;  %914 = vmatpush1.bf16.msra.mxu1 %v7464_v32  ;;  %v268_v53 = vshll.u32 %v6562_v44, 16  ;;  %v7481_v54 = vld [vmem:[#allocation2 + $0xf0] ss:$24 sps:$4 sm:$0xff]   ;;  %v7483_v56 = vld [vmem:[#allocation2 + $0x124] ss:$24 sps:$4 sm:$0xff]   ;;  %v6564_v58 = vcombine.low %v172_v52, %v172_v52  ;;  %v266_v59 = vshrl.u32 %v6562_v44, 16 }
  0xc4   :  { %852 = vmatprep.subr.bf16.mxu0 %v7465_v33  ;;  %915 = vmatprep.subr.bf16.mxu1 %v7467_v34  ;;  %v7482_v55 = vld [vmem:[#allocation2 + $0xf8] ss:$24 sps:$4 sm:$0xff]   ;;  %v7485_v57 = vld [vmem:[#allocation2 + $0x12c] ss:$24 sps:$4 sm:$0xff]   ;;  %v7488_v62 = vld [vmem:[#allocation2 + $0x128] ss:$24 sps:$4 sm:$0xff]  }
  0xc5   :  { %200 = vrot.lane.b32.xlu1 %v8982_v3, %s8785_s7  ;;  %272 = vrot.lane.b32.xlu0 %v9009_v25, %s8785_s7  ;;  %v270_v60 = vrot.slane %v268_v53, 1  ;;  %v7487_v61 = vld [vmem:[#allocation2 + $0x120] ss:$24 sps:$4 sm:$0xff]   ;;  %v7489_v63 = vld [vmem:[#allocation2 + $0x154] ss:$24 sps:$4 sm:$0xff]   ;;  %v286_v7 = vshll.u32 %v6564_v58, 16 }
  0xc6   :  { %v7491_v0 = vld [vmem:[#allocation2 + $0x15c] ss:$24 sps:$4 sm:$0xff]   ;;  %v7493_v4 = vld [vmem:[#allocation2 + $0x150] ss:$24 sps:$4 sm:$0xff]   ;;  %vm421_vm0 = vcmask 1045504   ;;  %v284_v13 = vshrl.u32 %v6564_v58, 16 }
  0xc7   :  { %853 = vmatpush1.bf16.msra.mxu0 %v7469_v38  ;;  %916 = vmatpush1.bf16.msra.mxu1 %v7470_v39  ;;  %v271_v5 = vor.u32 %v270_v60, %v266_v59  ;;  %v7494_v8 = vld [vmem:[#allocation2 + $0x158] ss:$24 sps:$4 sm:$0xff]   ;;  %v7495_v9 = vld [vmem:[#allocation2 + $0x184] ss:$24 sps:$4 sm:$0x3f]   ;;  %v288_v14 = vrot.slane %v286_v7, 1 }
  0xc8   :  { %854 = vmatprep.subr.bf16.mxu0 %v7471_v40  ;;  %917 = vmatprep.subr.bf16.mxu1 %v7473_v41  ;;  %v7497_v10 = vld [vmem:[#allocation2 + $0x18c] ss:$24 sps:$4 sm:$0x3f]   ;;  %v7499_v11 = vld [vmem:[#allocation2 + $0x180] ss:$24 sps:$4 sm:$0x3f]  }
  0xc9   :  { %290 = vrot.lane.b32.xlu1 %v9015_v35, %s8786_s17  ;;  %320 = vrot.lane.b32.xlu0 %v9003_v20, %s8785_s7  ;;  %v7500_v12 = vld [vmem:[#allocation2 + $0x188] ss:$24 sps:$4 sm:$0x3f]   ;;  %v829_v15 = vsel %vm421_vm0, %v7499_v11, 0  ;;  %v7503_v16 = vld [vmem:[#allocation2 + $0x14] ss:$24 sps:$4 sm:$0xff]   ;;  %v289_v18 = vor.u32 %v288_v14, %v284_v13 }
  0xca   :  { %v835_v17 = vsel %vm421_vm0, %v7500_v12, 0  ;;  %v361_v19 = vshll.u32 %v8982_v3, 16  ;;  %v368_v23 = vshll.u32 %v9033_v51, 16  ;;  %v366_v24 = vshrl.u32 %v9033_v51, 16  ;;  %v7506_v52 = vld [vmem:[#allocation2 + $0x44] ss:$24 sps:$4 sm:$0xff]  }
  0xcb   :  { %855 = vmatpush1.bf16.msra.mxu0 %v7475_v46  ;;  %918 = vmatpush1.bf16.msra.mxu1 %v7476_v47  ;;  %vm228_vm1 = vcmask 228352   ;;  %vm240_vm2 = vcmask 687104   ;;  %vm235_vm3 = vcmask 457728   ;;  %vm245_vm4 = vcmask 916480   ;;  %v7504_v59 = vld [vmem:[#allocation2 + $0x40] ss:$24 sps:$4 sm:$0xff]  }
  0xcc   :  { %856 = vmatprep.subr.bf16.mxu0 %v7477_v48  ;;  %919 = vmatprep.subr.bf16.mxu1 %v7479_v49  ;;  %v363_v21 = vrot.slane %v361_v19, 1  ;;  %vm412_vm5 = vcmask 1042432   ;;  %vm818_vm6 = vcmask 97280   ;;  %v7501_v48 = vld [vmem:[#allocation2 + $0x10] ss:$24 sps:$4 sm:$0xff]   ;;  %vm430_vm7 = vcmask 1040384  }
  0xcd   :  { %224 = vrot.lane.b32.xlu1 %v9003_v20, %s8786_s17  ;;  %324 = vrot.lane.b32.xlu0 %v9009_v25, %s8786_s17  ;;  %v7509_v60 = vld [vmem:[#allocation2 + $0x74] ss:$24 sps:$4 sm:$0xff]   ;;  %v7510_v7 = vld [vmem:[#allocation2 + $0xa0] ss:$24 sps:$4 sm:$0xff]   ;;  %v7513_v11 = vld [vmem:[#allocation2 + $0xd0] ss:$24 sps:$4 sm:$0xff]  }
  0xce   :  { %v7518_v12 = vld [vmem:[#allocation2 + $0x104] ss:$24 sps:$4 sm:$0xff]   ;;  %vm1095_vm8 = vcmask 1043456   ;;  %vm1324_vm9 = vcmask 1041408   ;;  %vm5132_vm10 = vcmask 1041409  }
  0xcf   :  { %857 = vmatpush1.bf16.msra.mxu0 %v7481_v54  ;;  %920 = vmatpush1.bf16.msra.mxu1 %v7482_v55 }
  0xd0   :  { %858 = vmatprep.subr.bf16.mxu0 %v7483_v56  ;;  %921 = vmatprep.subr.bf16.mxu1 %v7485_v57 }
  0xd1   :  { %256 = vrot.lane.b32.xlu1 %v9031_v50, %s8784_s15  ;;  %252 = vrot.lane.b32.xlu0 %v9033_v51, %s8783_s8 }
  0xd3   :  { %859 = vmatpush1.bf16.msra.mxu0 %v7487_v61  ;;  %922 = vmatpush1.bf16.msra.mxu1 %v7488_v62 }
  0xd4   :  { %860 = vmatprep.subr.bf16.mxu0 %v7489_v63  ;;  %923 = vmatprep.subr.bf16.mxu1 %v7491_v0  ;;  %v7507_v63 = vld [vmem:[#allocation2 + $0x70] ss:$24 sps:$4 sm:$0xff]   ;;  %v7512_v0 = vld [vmem:[#allocation2 + $0xa4] ss:$24 sps:$4 sm:$0xff]  }
  0xd5   :  { %346 = vrot.lane.b32.xlu1 %v9003_v20, %s8783_s8  ;;  %314 = vrot.lane.b32.xlu0 %v6564_v58, %s8783_s8  ;;  %v359_v20 = vshrl.u32 %v8982_v3, 16 }
  0xd7   :  { %861 = vmatpush1.bf16.msra.mxu0 %v7493_v4  ;;  %924 = vmatpush1.bf16.msra.mxu1 %v7494_v8  ;;  %v364_v22 = vor.u32 %v363_v21, %v359_v20  ;;  %v7515_v8 = vld [vmem:[#allocation2 + $0xd4] ss:$24 sps:$4 sm:$0xff]   ;;  %v7519_v21 = vld [vmem:[#allocation2 + $0x130] ss:$24 sps:$4 sm:$0xff]  }
  0xd8   :  { %6625 = vmatprep.subr.msk.bf16.mxu0 %vm421_vm0, %v7495_v9  ;;  %6629 = vmatprep.subr.msk.bf16.mxu1 %vm421_vm0, %v7497_v10 }
  0xd9   :  { %274 = vrot.lane.b32.xlu1 %v271_v5, %s8785_s7  ;;  %182 = vrot.lane.b32.xlu0 %v6562_v44, %s8783_s8 }
  0xdb   :  { %863 = vmatpush1.bf16.msra.mxu0 %v829_v15  ;;  %926 = vmatpush1.bf16.msra.mxu1 %v835_v17  ;;  %v7516_v15 = vld [vmem:[#allocation2 + $0x100] ss:$24 sps:$4 sm:$0xff]  }
  0xdc   :  { %972 = vmatprep.subr.bf16.mxu0 %v7503_v16  ;;  %v7521_v16 = vld [vmem:[#allocation2 + $0x134] ss:$24 sps:$4 sm:$0xff]   ;;  %v8504_v17 = vld [vmem:[%s9582_s0 + $0x18] sm:$0xf] }
  0xdd   :  { %350 = vrot.lane.b32.xlu1 %v9009_v25, %s8784_s15  ;;  %318 = vrot.lane.b32.xlu0 %v9033_v51, %s8784_s15  ;;  %v370_v25 = vrot.slane %v368_v23, 1  ;;  %v8505_v23 = vld [vmem:[%s9582_s0 + $0x14] sm:$0xf] }
  0xdf   :  { %v371_v3 = vor.u32 %v370_v25, %v366_v24 }
  0xe1   :  { %292 = vrot.lane.b32.xlu1 %v289_v18, %s8786_s17  ;;  %192 = vrot.lane.b32.xlu0 %v6564_v58, %s8784_s15 }
  0xe5   :  { %354 = vrot.lane.b32.xlu1 %v9015_v35, %s8785_s7  ;;  %322 = vrot.lane.b32.xlu0 %v9031_v50, %s8785_s7 }
  0xe9   :  { %326 = vrot.lane.b32.xlu1 %v271_v5, %s8786_s17  ;;  %202 = vrot.lane.b32.xlu0 %v9033_v51, %s8785_s7 }
  0xed   :  { %226 = vrot.lane.b32.xlu1 %v9031_v50, %s8786_s17  ;;  %372 = vrot.lane.b32.xlu0 %v364_v22, %s8786_s17  ;;  %v7524_v22 = vld [vmem:[#allocation2 + $0x164] ss:$24 sps:$4 sm:$0xff]  }
  0xf1   :  { %352 = vrot.lane.b32.xlu1 %v271_v5, %s8784_s15  ;;  %348 = vrot.lane.b32.xlu0 %v9031_v50, %s8783_s8 }
  0xf5   :  { %374 = vrot.lane.b32.xlu1 %v371_v3, %s8786_s17  ;;  %356 = vrot.lane.b32.xlu0 %v289_v18, %s8785_s7 }
 0x12b   :  { %v251_v26 = vpop.permute.xlu0 %250  ;;  %v313_v27 = vpop.permute.xlu1 %312 }
 0x12c   :  { %v296_v34 = vsel %vm228_vm1, %v8975_v1, %v251_v26  ;;  %v330_v42 = vsel %vm228_vm1, %v8980_v2, %v313_v27 }
 0x12f   :  { %v191_v28 = vpop.permute.xlu0 %190  ;;  %v181_v29 = vpop.permute.xlu1 %180 }
 0x130   :  { %v231_v36 = vsel %vm228_vm1, %v8991_v6, %v181_v29 }
 0x131   :  { %v237_v43 = vsel %vm235_vm3, %v231_v36, %v191_v28  ;;  %v8507_v36 = vld [vmem:[%s9582_s0 + $0x10] sm:$0xf] }
 0x133   :  { %v317_v30 = vpop.permute.xlu1 %316  ;;  %v255_v31 = vpop.permute.xlu0 %254 }
 0x134   :  { %v301_v35 = vsel %vm235_vm3, %v296_v34, %v255_v31  ;;  %v335_v1 = vsel %vm235_vm3, %v330_v42, %v317_v30  ;;  %v7522_v31 = vld [vmem:[#allocation2 + $0x160] ss:$24 sps:$4 sm:$0xff]   ;;  %v8506_v34 = vld [vmem:[%s9582_s0 + $0xc] sm:$0xf] }
 0x135   :  { %v7527_v42 = vld [vmem:[#allocation2 + $0x190] ss:$24 sps:$4 sm:$0x3f]  }
 0x137   :  { %v201_v32 = vpop.permute.xlu1 %200  ;;  %v273_v33 = vpop.permute.xlu0 %272 }
 0x138   :  { %v305_v37 = vsel %vm240_vm2, %v301_v35, %v273_v33  ;;  %v242_v44 = vsel %vm240_vm2, %v237_v43, %v201_v32  ;;  %v7525_v33 = vld [vmem:[#allocation2 + $0x194] ss:$24 sps:$4 sm:$0x3f]  }
 0x13b   :  { %v291_v38 = vpop.permute.xlu1 %290  ;;  %v321_v39 = vpop.permute.xlu0 %320 }
 0x13c   :  { %v309_v40 = vsel %vm245_vm4, %v305_v37, %v291_v38  ;;  %v397_v41 = vrot.slane %v291_v38, 5  ;;  %v339_v6 = vsel %vm240_vm2, %v335_v1, %v321_v39 }
 0x13d   :  { %v396_v45 = vrot.slane %v309_v40, 5 }
 0x13f   :  { %v225_v46 = vpop.permute.xlu1 %224  ;;  %v9089_v47 = vpop.permute.xlu0 %324 }
 0x140   :  { %v247_v49 = vsel %vm245_vm4, %v242_v44, %v225_v46  ;;  %v416_v50 = vsel %vm412_vm5, %v225_v46, %v397_v41  ;;  %v9095_v2 = vsel %vm245_vm4, %v339_v6, %v9089_v47  ;;  %v403_v51 = vrot.slane %v9089_v47, 2 }
 0x141   :  { %v402_v53 = vrot.slane %v9095_v2, 2  ;;  %v414_v54 = vsel %vm412_vm5, %v247_v49, %v396_v45 }
 0x142   :  { %v9103_v55 = vsel %vm421_vm0, %v416_v50, %v403_v51 }
 0x143   :  { %v257_v56 = vpop.permute.xlu1 %256  ;;  %6626 = vmatprep.mubr.msk.bf16.mxu0 %vm818_vm6, %v9103_v55  ;;  %6630 = vmatprep.mubr.msk.bf16.mxu1 %vm818_vm6, %v9103_v55  ;;  %v253_v57 = vpop.permute.xlu0 %252  ;;  %v9112_v58 = vsel %vm421_vm0, %v414_v54, %v402_v53 }
 0x144   :  { %879 = vmatmul.mubr.bf16.vlgmr.msra.gmra.mrb[0].mxu0 %v9112_v58  ;;  %942 = vmatmul.mubr.bf16.vlgmr.msra.gmra.mrb[0].mxu1 %v9112_v58  ;;  %v299_v18 = vsel %vm228_vm1, %v8504_v17, %v253_v57 }
 0x145   :  { %973 = vmatpush1.bf16.msra.mxu0 %v7501_v48  ;;  %v303_v25 = vsel %vm235_vm3, %v299_v18, %v257_v56 }
 0x146   :  { %974 = vmatprep.subr.bf16.mxu0 %v7506_v52 }
 0x147   :  { %v347_v61 = vpop.permute.xlu1 %346  ;;  %v315_v62 = vpop.permute.xlu0 %314 }
 0x148   :  { %v333_v24 = vsel %vm228_vm1, %v8505_v23, %v315_v62  ;;  %v378_v35 = vsel %vm228_vm1, %v8506_v34, %v347_v61  ;;  %v7533_v23 = vld [vmem:[#allocation7 + $0x204] ss:$16 sps:$4 sm:$0xff]  }
 0x149   :  { %975 = vmatpush1.bf16.msra.mxu0 %v7504_v59  ;;  %4438 = vmatprep.subr.bf16.mxu1 %v7533_v23  ;;  %v7557_v34 = vld [vmem:[#allocation7 + $0x284] ss:$16 sps:$4 sm:$0xff]  }
 0x14a   :  { %976 = vmatprep.subr.bf16.mxu0 %v7509_v60 }
 0x14b   :  { %v275_v4 = vpop.permute.xlu1 %274  ;;  %v183_v5 = vpop.permute.xlu0 %182 }
 0x14c   :  { %v307_v3 = vsel %vm240_vm2, %v303_v25, %v275_v4  ;;  %v234_v37 = vsel %vm228_vm1, %v8507_v36, %v183_v5  ;;  %v8508_v4 = vld [vmem:[%s9582_s0 + $0x1c] sm:$0xf]  ;;  %v7555_v36 = vld [vmem:[#allocation7 + $0x280] ss:$16 sps:$4 sm:$0xff]   ;;  %s8788_s0 = smov [#allocation19]  }
 0x14d   :  { %977 = vmatpush1.bf16.msra.mxu0 %v7507_v63  ;;  %v7536_v25 = vld [vmem:[#allocation7 + $0x24] ss:$16 sps:$4 sm:$0xff]   ;;  %s6547_s29 = sshll.u32 %s8788_s0, 4  ;;  %s6548_s29 = int_to_ptr.vmem [resolvable:$true] %s6547_s29 }
 0x14e   :  { %978 = vmatprep.subr.bf16.mxu0 %v7512_v0  ;;  %s8729_s30 = scalar_lea.vmem %s6548_s29, 32  ;;  %p8734_p11 = scmp.lt.s32.totalorder %s6548_s29, %s6548_s29 }
 0x14f   :  { %v351_v9 = vpop.permute.xlu1 %350  ;;  %v319_v10 = vpop.permute.xlu0 %318  ;;  %p8730_p10 = scmp.ne.s32.totalorder %s6548_s29, %s8729_s30  ;;  %p8735_p12 = scmp.lt.s32.totalorder %s8729_s30, %s8729_s30 }
 0x150   :  { %v337_v26 = vsel %vm235_vm3, %v333_v24, %v319_v10  ;;  %v383_v38 = vsel %vm235_vm3, %v378_v35, %v351_v9  ;;  %v7534_v24 = vld [vmem:[#allocation7 + $0x20] ss:$16 sps:$4 sm:$0xff]  }
 0x151   :  { %979 = vmatpush1.bf16.msra.mxu0 %v7510_v7  ;;  %v7552_v35 = vld [vmem:[#allocation7 + $0x80] ss:$16 sps:$4 sm:$0xff]   ;;  %p8736_p13 = por %p8735_p12, %p8734_p11 }
 0x152   :  { %980 = vmatprep.subr.bf16.mxu0 %v7515_v8 }
 0x153   :  { %v293_v13 = vpop.permute.xlu1 %292  ;;  %v193_v14 = vpop.permute.xlu0 %192  ;;  %p8737_p0 = pnand %p8736_p13, %p8730_p10 }
 0x154   :  { %v311_v27 = vsel %vm245_vm4, %v307_v3, %v293_v13  ;;  %v399_v40 = vrot.slane %v293_v13, 5  ;;  %v239_v41 = vsel %vm235_vm3, %v234_v37, %v193_v14  ;;  %v7537_v3 = vld [vmem:[#allocation7 + $0x220] ss:$16 sps:$4 sm:$0xff]   ;;  %v7560_v37 = vld [vmem:[#allocation7 + $0xa4] ss:$16 sps:$4 sm:$0xff]  }
 0x155   :  { %981 = vmatpush1.bf16.msra.mxu0 %v7513_v11  ;;  %v398_v39 = vrot.slane %v311_v27, 5  ;;  %v7540_v27 = vld [vmem:[#allocation7 + $0x40] ss:$16 sps:$4 sm:$0xff]  }
 0x156   :  { %982 = vmatprep.subr.bf16.mxu0 %v7518_v12 }
 0x157   :  { %v355_v19 = vpop.permute.xlu1 %354  ;;  %v323_v20 = vpop.permute.xlu0 %322 }
 0x158   :  { %v341_v28 = vsel %vm240_vm2, %v337_v26, %v323_v20  ;;  %v387_v1 = vsel %vm240_vm2, %v383_v38, %v355_v19  ;;  %v7528_v20 = vld [vmem:[#allocation7] ss:$16 sps:$4 sm:$0xff]   ;;  %v7539_v26 = vld [vmem:[#allocation7 + $0x224] ss:$16 sps:$4 sm:$0xff]  }
 0x159   :  { %983 = vmatpush1.bf16.msra.mxu0 %v7516_v15  ;;  %v7563_v38 = vld [vmem:[#allocation7 + $0x2a4] ss:$16 sps:$4 sm:$0xff]  }
 0x15a   :  { %984 = vmatprep.subr.bf16.mxu0 %v7521_v16 }
 0x15b   :  { %v327_v29 = vpop.permute.xlu1 %326  ;;  %v203_v30 = vpop.permute.xlu0 %202 }
 0x15c   :  { %v345_v32 = vsel %vm245_vm4, %v341_v28, %v327_v29  ;;  %v405_v44 = vrot.slane %v327_v29, 2  ;;  %v244_v45 = vsel %vm240_vm2, %v239_v41, %v203_v30  ;;  %v7543_v28 = vld [vmem:[#allocation7 + $0x240] ss:$16 sps:$4 sm:$0xff]   ;;  %v7548_v29 = vld [vmem:[#allocation7 + $0x64] ss:$16 sps:$4 sm:$0xff]  }
 0x15d   :  { %985 = vmatpush1.bf16.msra.mxu0 %v7519_v21  ;;  %v404_v43 = vrot.slane %v345_v32, 2  ;;  %v7530_v21 = vld [vmem:[#allocation7 + $0x4] ss:$16 sps:$4 sm:$0xff]   ;;  %v7549_v32 = vld [vmem:[#allocation7 + $0x260] ss:$16 sps:$4 sm:$0xff]  }
 0x15e   :  { %986 = vmatprep.subr.bf16.mxu0 %v7524_v22  ;;  %v7531_v22 = vld [vmem:[#allocation7 + $0x200] ss:$16 sps:$4 sm:$0xff]   ;;  %v7551_v30 = vld [vmem:[#allocation7 + $0x264] ss:$16 sps:$4 sm:$0xff]  }
 0x15f   :  { %v227_v6 = vpop.permute.xlu1 %226  ;;  %v373_v46 = vpop.permute.xlu0 %372  ;;  %4439 = vmatpush1.bf16.msra.mxu1 %v7531_v22  ;;  %v7566_v41 = vld [vmem:[#allocation7 + $0xc4] ss:$16 sps:$4 sm:$0xff]  }
 0x160   :  { %v249_v48 = vsel %vm245_vm4, %v244_v45, %v227_v6  ;;  %v420_v49 = vsel %vm412_vm5, %v227_v6, %v399_v40  ;;  %v391_v50 = vsel %vm245_vm4, %v387_v1, %v373_v46  ;;  %v409_v52 = vrot.slane %v373_v46, 7  ;;  %4440 = vmatprep.subr.bf16.mxu1 %v7539_v26  ;;  %v7561_v40 = vld [vmem:[#allocation7 + $0x2a0] ss:$16 sps:$4 sm:$0xff]   ;;  %v7575_v45 = vld [vmem:[#allocation7 + $0x2e4] ss:$16 sps:$4 sm:$0xff]  }
 0x161   :  { %v418_v54 = vsel %vm412_vm5, %v249_v48, %v398_v39  ;;  %v429_v56 = vsel %vm421_vm0, %v420_v49, %v405_v44  ;;  %v408_v57 = vrot.slane %v391_v50, 7  ;;  %987 = vmatpush1.bf16.msra.mxu0 %v7522_v31  ;;  %v7546_v31 = vld [vmem:[#allocation7 + $0x60] ss:$16 sps:$4 sm:$0xff]   ;;  %v7578_v48 = vld [vmem:[#allocation7 + $0x104] ss:$16 sps:$4 sm:$0xff]  }
 0x162   :  { %v434_v59 = vsel %vm430_vm7, %v403_v51, %v409_v52  ;;  %v427_v60 = vsel %vm421_vm0, %v418_v54, %v404_v43  ;;  %6633 = vmatprep.subr.msk.bf16.mxu0 %vm421_vm0, %v7525_v33  ;;  %v841_v51 = vsel %vm421_vm0, %v7527_v42, 0  ;;  %v456_v13 = vunpack.c.h.b16 %v429_v56  ;;  %v7554_v33 = vld [vmem:[#allocation7 + $0x84] ss:$16 sps:$4 sm:$0xff]   ;;  %v7558_v39 = vld [vmem:[#allocation7 + $0xa0] ss:$16 sps:$4 sm:$0xff]  }
 0x163   :  { %v6570_v61 = vcombine.low %v434_v59, %v429_v56  ;;  %v353_v62 = vpop.permute.xlu1 %352  ;;  %v349_v63 = vpop.permute.xlu0 %348  ;;  %v432_v0 = vsel %vm430_vm7, %v402_v53, %v408_v57  ;;  %v455_v17 = vunpack.c.h.b16 %v427_v60  ;;  %4441 = vmatpush1.bf16.msra.mxu1 %v7537_v3  ;;  %v7569_v42 = vld [vmem:[#allocation7 + $0x2c4] ss:$16 sps:$4 sm:$0xff]   ;;  %v7564_v1 = vld [vmem:[#allocation7 + $0xc0] ss:$16 sps:$4 sm:$0xff]  }
 0x164   :  { %v381_v5 = vsel %vm228_vm1, %v8508_v4, %v349_v63  ;;  %v6569_v47 = vcombine.low %v432_v0, %v427_v60  ;;  %v7570_v6 = vld [vmem:[#allocation7 + $0xe0] ss:$16 sps:$4 sm:$0xff]   ;;  %v7581_v49 = vld [vmem:[#allocation7 + $0x304] ss:$16 sps:$4 sm:$0xff]  }
 0x165   :  { %6627 = vmatprep.mubr.msk.bf16.mxu0 %vm818_vm6, %v6570_v61  ;;  %6631 = vmatprep.mubr.msk.bf16.mxu1 %vm818_vm6, %v6570_v61  ;;  %v385_v2 = vsel %vm235_vm3, %v381_v5, %v353_v62  ;;  %v7573_v46 = vld [vmem:[#allocation7 + $0x2e0] ss:$16 sps:$4 sm:$0xff]   ;;  %v7584_v54 = vld [vmem:[#allocation7 + $0x124] ss:$16 sps:$4 sm:$0xff]  }
 0x166   :  { %889 = vmatmul.mubr.bf16.gmra.mrb[4].mxu0 %v6569_v47  ;;  %952 = vmatmul.mubr.bf16.gmra.mrb[4].mxu1 %v6569_v47  ;;  %v7576_v50 = vld [vmem:[#allocation7 + $0x100] ss:$16 sps:$4 sm:$0xff]   ;;  %v7587_v56 = vld [vmem:[#allocation7 + $0x324] ss:$16 sps:$4 sm:$0xff]  }
 0x167   :  { %v375_v7 = vpop.permute.xlu1 %374  ;;  %v357_v8 = vpop.permute.xlu0 %356  ;;  %989 = vmatpush1.bf16.msra.mxu0 %v841_v51  ;;  %v7579_v52 = vld [vmem:[#allocation7 + $0x300] ss:$16 sps:$4 sm:$0xff]   ;;  %v7590_v60 = vld [vmem:[#allocation7 + $0x144] ss:$16 sps:$4 sm:$0xff]  }
 0x168   :  { %v411_v53 = vrot.slane %v375_v7, 7  ;;  %v389_v9 = vsel %vm240_vm2, %v385_v2, %v357_v8  ;;  %4395 = vmatprep.subr.bf16.mxu0 %v7530_v21  ;;  %v7582_v57 = vld [vmem:[#allocation7 + $0x120] ss:$16 sps:$4 sm:$0xff]   ;;  %v7596_v0 = vld [vmem:[#allocation7 + $0x164] ss:$16 sps:$4 sm:$0xff]  }
 0x169   :  { %v393_v10 = vsel %vm245_vm4, %v389_v9, %v375_v7  ;;  %v7585_v59 = vld [vmem:[#allocation7 + $0x320] ss:$16 sps:$4 sm:$0xff]   ;;  %v7599_v4 = vld [vmem:[#allocation7 + $0x364] ss:$16 sps:$4 sm:$0xff]   ;;  %v7629_v21 = vld [vmem:[#allocation7 + $0xc] ss:$16 sps:$4 sm:$0xff]  }
 0x16a   :  { %v438_v11 = vsel %vm430_vm7, %v405_v44, %v411_v53  ;;  %v410_v12 = vrot.slane %v393_v10, 7  ;;  %v7572_v44 = vld [vmem:[#allocation7 + $0xe4] ss:$16 sps:$4 sm:$0xff]   ;;  %v7588_v62 = vld [vmem:[#allocation7 + $0x140] ss:$16 sps:$4 sm:$0xff]  }
 0x16b   :  { %v458_v14 = vunpack.c.l.b16 %v438_v11  ;;  %v7591_v63 = vld [vmem:[#allocation7 + $0x340] ss:$16 sps:$4 sm:$0xff]   ;;  %v7602_v51 = vld [vmem:[#allocation7 + $0x184] ss:$16 sps:$4 sm:$0xff]  }
 0x16c   :  { %v436_v15 = vsel %vm430_vm7, %v404_v43, %v410_v12  ;;  %v7567_v43 = vld [vmem:[#allocation7 + $0x2c0] ss:$16 sps:$4 sm:$0xff]   ;;  %v7605_v7 = vld [vmem:[#allocation7 + $0x384] ss:$16 sps:$4 sm:$0xff]  }
 0x16d   :  { %v550_v16 = vpack.c.b16 %v458_v14, %v456_v13  ;;  %v457_v18 = vunpack.c.l.b16 %v436_v15  ;;  %v7594_v5 = vld [vmem:[#allocation7 + $0x160] ss:$16 sps:$4 sm:$0xff]   ;;  %v7608_v53 = vld [vmem:[#allocation7 + $0x1a4] ss:$16 sps:$4 sm:$0xff]  }
 0x16e   :  { %v7600_v2 = vld [vmem:[#allocation7 + $0x180] ss:$16 sps:$4 sm:$0xff]   ;;  %v7611_v9 = vld [vmem:[#allocation7 + $0x3a4] ss:$16 sps:$4 sm:$0xff]  }
 0x16f   :  { %6628 = vmatprep.mubr.msk.bf16.mxu0 %vm818_vm6, %v550_v16  ;;  %6632 = vmatprep.mubr.msk.bf16.mxu1 %vm818_vm6, %v550_v16  ;;  %v549_v19 = vpack.c.b16 %v457_v18, %v455_v17  ;;  %v7603_v8 = vld [vmem:[#allocation7 + $0x380] ss:$16 sps:$4 sm:$0xff]   ;;  %v7614_v12 = vld [vmem:[#allocation7 + $0x1c4] ss:$16 sps:$4 sm:$0xff]  }
 0x170   :  { %v7606_v10 = vld [vmem:[#allocation7 + $0x1a0] ss:$16 sps:$4 sm:$0xff]   ;;  %v7617_v13 = vld [vmem:[#allocation7 + $0x3c4] ss:$16 sps:$4 sm:$0xff]  }
 0x171   :  { %899 = vmatmul.mubr.bf16.gmra.mrb[8].mxu0 %v549_v19  ;;  %962 = vmatmul.mubr.bf16.gmra.mrb[8].mxu1 %v549_v19  ;;  %v7609_v11 = vld [vmem:[#allocation7 + $0x3a0] ss:$16 sps:$4 sm:$0xff]   ;;  %v7623_v17 = vld [vmem:[#allocation7 + $0x3e4] ss:$16 sps:$4 sm:$0xff]  }
 0x172   :  { %6634 = vmatprep.mubr.msk.bf16.mxu0 %vm818_vm6, %v9103_v55  ;;  %v7542_v55 = vld [vmem:[#allocation7 + $0x44] ss:$16 sps:$4 sm:$0xff]   ;;  %v7612_v14 = vld [vmem:[#allocation7 + $0x1c0] ss:$16 sps:$4 sm:$0xff]  }
 0x173   :  { %v7615_v15 = vld [vmem:[#allocation7 + $0x3c0] ss:$16 sps:$4 sm:$0xff]  }
 0x174   :  { %v7618_v18 = vld [vmem:[#allocation7 + $0x1e0] ss:$16 sps:$4 sm:$0xff]  }
 0x179   :  { %1005 = vmatmul.mubr.bf16.vlgmr.msra.gmra.mrb[12].mxu0 %v9112_v58  ;;  %v7545_v58 = vld [vmem:[#allocation7 + $0x244] ss:$16 sps:$4 sm:$0xff]  }
 0x17a   :  { %6635 = vmatprep.mubr.msk.bf16.mxu0 %vm818_vm6, %v6570_v61  ;;  %4396 = vmatpush1.bf16.msra.mxu0 %v7528_v20  ;;  %v7593_v61 = vld [vmem:[#allocation7 + $0x344] ss:$16 sps:$4 sm:$0xff]  }
 0x17b   :  { %4397 = vmatprep.subr.bf16.mxu0 %v7536_v25  ;;  %4442 = vmatprep.subr.bf16.mxu1 %v7545_v58  ;;  %v7626_v20 = vld [vmem:[#allocation7 + $0x404] ss:$16 sps:$4 sm:$0xff]  }
 0x17c   :  { %4443 = vmatpush1.bf16.msra.mxu1 %v7543_v28 }
 0x17d   :  { %4444 = vmatprep.subr.bf16.mxu1 %v7551_v30  ;;  %v9179_v30 = vld [vmem:[#allocation5] sm:$0x3f] }
 0x17e   :  { %4398 = vmatpush1.bf16.msra.mxu0 %v7534_v24 }
 0x17f   :  { %4399 = vmatprep.subr.bf16.mxu0 %v7542_v55 }
 0x180   :  { %4445 = vmatpush1.bf16.msra.mxu1 %v7549_v32 }
 0x181   :  { %1015 = vmatmul.mubr.bf16.gmra.mrb[16].mxu0 %v6569_v47  ;;  %4446 = vmatprep.subr.bf16.mxu1 %v7557_v34  ;;  %v7597_v47 = vld [vmem:[#allocation7 + $0x360] ss:$16 sps:$4 sm:$0xff]  }
 0x182   :  { %6636 = vmatprep.mubr.msk.bf16.mxu0 %vm818_vm6, %v550_v16  ;;  %4400 = vmatpush1.bf16.msra.mxu0 %v7540_v27  ;;  %v7620_v16 = vld [vmem:[#allocation7 + $0x1e4] ss:$16 sps:$4 sm:$0xff]   ;;  %v515_v27 = vlaneseq }
 0x183   :  { %4401 = vmatprep.subr.bf16.mxu0 %v7548_v29 }
 0x184   :  { %4447 = vmatpush1.bf16.msra.mxu1 %v7555_v36  ;;  %v9174_v28 = vshrl.u32 %v515_v27, 7 }
 0x185   :  { %4448 = vmatprep.subr.bf16.mxu1 %v7563_v38 }
 0x186   :  { %4402 = vmatpush1.bf16.msra.mxu0 %v7546_v31  ;;  %v9177_v29 = vsub.s32 0, %v9174_v28  ;;  %v525_v31 = vsub.s32 2, %v9174_v28  ;;  %v9183_v32 = vsub.s32 1, %v9174_v28 }
 0x187   :  { %4403 = vmatprep.subr.bf16.mxu0 %v7554_v33  ;;  %v529_v33 = vsub.s32 3, %v9174_v28 }
 0x188   :  { %4449 = vmatpush1.bf16.msra.mxu1 %v7561_v40  ;;  %v9188_v34 = vrot.slane %v9179_v30, %v9177_v29  ;;  %v9197_v36 = vrot.slane %v9179_v30, %v9183_v32 }
 0x189   :  { %1025 = vmatmul.mubr.bf16.gmra.mrb[20].mxu0 %v549_v19  ;;  %4450 = vmatprep.subr.bf16.mxu1 %v7569_v42  ;;  %v7621_v19 = vld [vmem:[#allocation7 + $0x3e0] ss:$16 sps:$4 sm:$0xff]  }
 0x18a   :  { %4404 = vmatpush1.bf16.msra.mxu0 %v7552_v35  ;;  %v9193_v35 = vrot.slane %v9179_v30, %v525_v31 }
 0x18b   :  { %4405 = vmatprep.subr.bf16.mxu0 %v7560_v37  ;;  %v9202_v37 = vrot.slane %v9179_v30, %v529_v33 }
 0x18c   :  { %4451 = vmatpush1.bf16.msra.mxu1 %v7567_v43 }
 0x18d   :  { %4452 = vmatprep.subr.bf16.mxu1 %v7575_v45 }
 0x18e   :  { %4406 = vmatpush1.bf16.msra.mxu0 %v7558_v39 }
 0x18f   :  { %4407 = vmatprep.subr.bf16.mxu0 %v7566_v41 }
 0x190   :  { %4453 = vmatpush1.bf16.msra.mxu1 %v7573_v46 }
 0x191   :  { %4454 = vmatprep.subr.bf16.mxu1 %v7581_v49  ;;  %v537_v49 = vsub.s32 5, %v9174_v28 }
 0x192   :  { %4408 = vmatpush1.bf16.msra.mxu0 %v7564_v1 }
 0x193   :  { %4409 = vmatprep.subr.bf16.mxu0 %v7572_v44 }
 0x194   :  { %4455 = vmatpush1.bf16.msra.mxu1 %v7579_v52 }
 0x195   :  { %4456 = vmatprep.subr.bf16.mxu1 %v7587_v56 }
 0x196   :  { %4410 = vmatpush1.bf16.msra.mxu0 %v7570_v6 }
 0x197   :  { %4411 = vmatprep.subr.bf16.mxu0 %v7578_v48  ;;  %v533_v48 = vsub.s32 4, %v9174_v28 }
 0x198   :  { %4457 = vmatpush1.bf16.msra.mxu1 %v7585_v59 }
 0x199   :  { %4458 = vmatprep.subr.bf16.mxu1 %v7593_v61 }
 0x19a   :  { %4412 = vmatpush1.bf16.msra.mxu0 %v7576_v50 }
 0x19b   :  { %4413 = vmatprep.subr.bf16.mxu0 %v7584_v54 }
 0x19c   :  { %4459 = vmatpush1.bf16.msra.mxu1 %v7591_v63 }
 0x19d   :  { %4460 = vmatprep.subr.bf16.mxu1 %v7599_v4 }
 0x19e   :  { %4414 = vmatpush1.bf16.msra.mxu0 %v7582_v57 }
 0x19f   :  { %4415 = vmatprep.subr.bf16.mxu0 %v7590_v60 }
 0x1a0   :  { %4461 = vmatpush1.bf16.msra.mxu1 %v7597_v47 }
 0x1a1   :  { %4462 = vmatprep.subr.bf16.mxu1 %v7605_v7 }
 0x1a2   :  { %4416 = vmatpush1.bf16.msra.mxu0 %v7588_v62 }
 0x1a3   :  { %4417 = vmatprep.subr.bf16.mxu0 %v7596_v0 }
 0x1a4   :  { %4463 = vmatpush1.bf16.msra.mxu1 %v7603_v8 }
 0x1a5   :  { %4464 = vmatprep.subr.bf16.mxu1 %v7611_v9 }
 0x1a6   :  { %4418 = vmatpush1.bf16.msra.mxu0 %v7594_v5 }
 0x1a7   :  { %4419 = vmatprep.subr.bf16.mxu0 %v7602_v51 }
 0x1a8   :  { %4465 = vmatpush1.bf16.msra.mxu1 %v7609_v11 }
 0x1a9   :  { %4466 = vmatprep.subr.bf16.mxu1 %v7617_v13 }
 0x1aa   :  { %4420 = vmatpush1.bf16.msra.mxu0 %v7600_v2 }
 0x1ab   :  { %4421 = vmatprep.subr.bf16.mxu0 %v7608_v53 }
 0x1ac   :  { %4467 = vmatpush1.bf16.msra.mxu1 %v7615_v15 }
 0x1ad   :  { %4468 = vmatprep.subr.bf16.mxu1 %v7623_v17 }
 0x1ae   :  { %4422 = vmatpush1.bf16.msra.mxu0 %v7606_v10 }
 0x1af   :  { %4423 = vmatprep.subr.bf16.mxu0 %v7614_v12 }
 0x1b0   :  { %4469 = vmatpush1.bf16.msra.mxu1 %v7621_v19 }
 0x1b1   :  { %4481 = vmatprep.subr.bf16.mxu1 %v7626_v20 }
 0x1b2   :  { %4424 = vmatpush1.bf16.msra.mxu0 %v7612_v14 }
 0x1b3   :  { %4425 = vmatprep.subr.bf16.mxu0 %v7620_v16 }
 0x1b6   :  { %4426 = vmatpush1.bf16.msra.mxu0 %v7618_v18 }
 0x1b7   :  { %4739 = vmatprep.subr.bf16.mxu0 %v7629_v21 }
 0x217   :  { %v880_v22 = vpop.f32.mrb[0].mxu0  ;;  %v943_v23 = vpop.f32.mrb[0].mxu1 }
 0x218   :  { %v882_v24 = vpop.f32.mrb[1].mxu0  ;;  %v945_v25 = vpop.f32.mrb[1].mxu1  ;;  %v881_v41 = vadd.f32 %v880_v22, %v9188_v34  ;;  %v944_v1 = vadd.f32 %v943_v23, %v9193_v35 }
 0x219   :  { %v884_v3 = vpop.f32.mrb[2].mxu0  ;;  %v947_v26 = vpop.f32.mrb[2].mxu1  ;;  %v883_v43 = vadd.f32 %v882_v24, %v9197_v36  ;;  %v946_v44 = vadd.f32 %v945_v25, %v9202_v37 }
 0x21a   :  { %v886_v55 = vpop.f32.mrb[3].mxu0  ;;  %v949_v58 = vpop.f32.mrb[3].mxu1  ;;  %v885_v38 = vadd.f32 %v884_v3, %v9188_v34  ;;  %v948_v39 = vadd.f32 %v947_v26, %v9193_v35  ;;  %v1035_v60 = vmax.f32 %v881_v41, 0.0  ;;  %v1037_v5 = vmax.f32 %v944_v1, 0.0 }
 0x21b   :  { %v887_v40 = vadd.f32 %v886_v55, %v9197_v36  ;;  %v950_v42 = vadd.f32 %v949_v58, %v9202_v37  ;;  %v1036_v47 = vmax.f32 %v883_v43, 0.0  ;;  %v1038_v53 = vmax.f32 %v946_v44, 0.0 }
 0x21c   :  { %v1041_v45 = vmax.f32 %v885_v38, 0.0  ;;  %v1043_v50 = vmax.f32 %v948_v39, 0.0  ;;  %v9236_v43 = vrot.slane %v9179_v30, %v533_v48  ;;  %v9239_v44 = vrot.slane %v9179_v30, %v537_v49 }
 0x21d   :  { %v1042_v52 = vmax.f32 %v887_v40, 0.0  ;;  %v1044_v61 = vmax.f32 %v950_v42, 0.0 }
 0x21e   :  { %v1096_v9 = vrot.slane %v1041_v45, 4  ;;  %v1102_v12 = vrot.slane %v1043_v50, 4 }
 0x21f   :  { %v1099_v13 = vrot.slane %v1042_v52, 4  ;;  %v1105_v16 = vrot.slane %v1044_v61, 4 }
 0x239   :  { %v890_v6 = vpop.f32.mrb[4].mxu0  ;;  %v953_v46 = vpop.f32.mrb[4].mxu1 }
 0x23a   :  { %v891_v54 = vadd.f32 %v890_v6, %v9188_v34  ;;  %v954_v56 = vadd.f32 %v953_v46, %v9193_v35  ;;  %v892_v57 = vpop.f32.mrb[5].mxu0  ;;  %v955_v59 = vpop.f32.mrb[5].mxu1 }
 0x23b   :  { %v893_v62 = vadd.f32 %v892_v57, %v9197_v36  ;;  %v956_v63 = vadd.f32 %v955_v59, %v9202_v37  ;;  %v894_v0 = vpop.f32.mrb[6].mxu0  ;;  %v957_v4 = vpop.f32.mrb[6].mxu1 }
 0x23c   :  { %v1047_v51 = vmax.f32 %v891_v54, 0.0  ;;  %v1049_v7 = vmax.f32 %v954_v56, 0.0  ;;  %v896_v2 = vpop.f32.mrb[7].mxu0  ;;  %v959_v8 = vpop.f32.mrb[7].mxu1  ;;  %v9219_v19 = vadd.f32 %v894_v0, %v9188_v34  ;;  %v958_v38 = vadd.f32 %v957_v4, %v9193_v35 }
 0x23d   :  { %v1048_v10 = vmax.f32 %v893_v62, 0.0  ;;  %v1050_v11 = vmax.f32 %v956_v63, 0.0  ;;  %v897_v41 = vadd.f32 %v896_v2, %v9197_v36  ;;  %v960_v6 = vadd.f32 %v959_v8, %v9202_v37 }
 0x23e   :  { %v1097_v14 = vrot.slane %v1047_v51, 4  ;;  %v1103_v15 = vrot.slane %v1049_v7, 4  ;;  %v1053_v56 = vmax.f32 %v9219_v19, 0.0  ;;  %v1055_v57 = vmax.f32 %v958_v38, 0.0 }
 0x23f   :  { %v1100_v17 = vrot.slane %v1048_v10, 4  ;;  %v1106_v18 = vrot.slane %v1050_v11, 4  ;;  %v1054_v2 = vmax.f32 %v897_v41, 0.0  ;;  %v1056_v8 = vmax.f32 %v960_v6, 0.0 }
 0x240   :  { %v1098_v20 = vsel %vm1095_vm8, %v1096_v9, %v1097_v14  ;;  %v1162_v21 = vmax.f32 %v1041_v45, %v1097_v14  ;;  %v1104_v22 = vsel %vm1095_vm8, %v1102_v12, %v1103_v15  ;;  %v9223_v23 = vmax.f32 %v1043_v50, %v1103_v15 }
 0x241   :  { %v1156_v24 = vmax.f32 %v1035_v60, %v1098_v20  ;;  %v9225_v25 = vmax.f32 %v1037_v5, %v1104_v22  ;;  %v1101_v3 = vsel %vm1095_vm8, %v1099_v13, %v1100_v17  ;;  %v9228_v26 = vmax.f32 %v1042_v52, %v1100_v17 }
 0x242   :  { %v9230_v55 = vmax.f32 %v1036_v47, %v1101_v3  ;;  %v1107_v58 = vsel %vm1095_vm8, %v1105_v16, %v1106_v18  ;;  %v1165_v27 = vmax.f32 %v1044_v61, %v1106_v18 }
 0x243   :  { %v1159_v39 = vmax.f32 %v1038_v53, %v1107_v58 }
 0x244   :  { %v1183_v40 = vmax.f32 %v1162_v21, %v1165_v27  ;;  %v900_v42 = vpop.f32.mrb[8].mxu0  ;;  %v963_v1 = vpop.f32.mrb[8].mxu1 }
 0x245   :  { %v1180_v45 = vmax.f32 %v1156_v24, %v1159_v39  ;;  %v901_v46 = vadd.f32 %v900_v42, %v9188_v34  ;;  %v964_v50 = vadd.f32 %v963_v1, %v9193_v35  ;;  %v902_v52 = vpop.f32.mrb[9].mxu0  ;;  %v965_v54 = vpop.f32.mrb[9].mxu1 }
 0x246   :  { %v903_v59 = vadd.f32 %v902_v52, %v9197_v36  ;;  %v966_v48 = vadd.f32 %v965_v54, %v9202_v37  ;;  %v904_v60 = vpop.f32.mrb[10].mxu0  ;;  %v967_v61 = vpop.f32.mrb[10].mxu1 }
 0x247   :  { %v9247_v30 = vpack.c.bf16 %v1183_v40, %v1180_v45  ;;  %v1059_v49 = vmax.f32 %v901_v46, 0.0  ;;  %v1061_v62 = vmax.f32 %v964_v50, 0.0  ;;  %v905_v63 = vadd.f32 %v904_v60, %v9188_v34  ;;  %v906_v0 = vpop.f32.mrb[11].mxu0  ;;  %v969_v4 = vpop.f32.mrb[11].mxu1 }
 0x248   :  { %v1060_v5 = vmax.f32 %v903_v59, 0.0  ;;  %v1062_v47 = vmax.f32 %v966_v48, 0.0  ;;  %v968_v51 = vadd.f32 %v967_v61, %v9193_v35  ;;  %v907_v7 = vadd.f32 %v906_v0, %v9197_v36 }
 0x249   :  { %v1065_v53 = vmax.f32 %v905_v63, 0.0  ;;  %v970_v9 = vadd.f32 %v969_v4, %v9202_v37  ;;  %v1114_v10 = vrot.slane %v1059_v49, 4  ;;  %v1120_v11 = vrot.slane %v1061_v62, 4 }
 0x24a   :  { %v1067_v12 = vmax.f32 %v968_v51, 0.0  ;;  %v1066_v13 = vmax.f32 %v907_v7, 0.0  ;;  %v1117_v14 = vrot.slane %v1060_v5, 4  ;;  %v1123_v34 = vrot.slane %v1062_v47, 4 }
 0x24b   :  { %v1115_v15 = vrot.slane %v1065_v53, 4  ;;  %v1068_v16 = vmax.f32 %v970_v9, 0.0  ;;  %v9254_v35 = vshrl.u32 %v9247_v30, 16  ;;  %v9257_v36 = vshll.u32 %v9247_v30, 16 }
 0x24c   :  { %v1121_v17 = vrot.slane %v1067_v12, 4  ;;  %v1118_v18 = vrot.slane %v1066_v13, 4  ;;  %v1006_v19 = vpop.f32.mrb[12].mxu0  ;;  %v9261_v24 = vrot.slane %v9247_v30, 1 }
 0x24d   :  { %v1116_v37 = vsel %vm1095_vm8, %v1114_v10, %v1115_v15  ;;  %v1174_v20 = vmax.f32 %v1059_v49, %v1115_v15  ;;  %v1124_v21 = vrot.slane %v1068_v16, 4  ;;  %v1008_v22 = vpop.f32.mrb[13].mxu0  ;;  %v1007_v50 = vadd.f32 %v1006_v19, %v9236_v43 }
 0x24e   :  { %v1168_v3 = vmax.f32 %v1053_v56, %v1116_v37  ;;  %v1122_v58 = vsel %vm1095_vm8, %v1120_v11, %v1121_v17  ;;  %v9264_v27 = vmax.f32 %v1061_v62, %v1121_v17  ;;  %v1119_v38 = vsel %vm1095_vm8, %v1117_v14, %v1118_v18  ;;  %v1010_v39 = vpop.f32.mrb[14].mxu0 }
 0x24f   :  { %v9267_v40 = vmax.f32 %v1055_v57, %v1122_v58  ;;  %v9269_v41 = vmax.f32 %v1054_v2, %v1119_v38  ;;  %v9271_v42 = vmax.f32 %v1060_v5, %v1118_v18  ;;  %v1125_v1 = vsel %vm1095_vm8, %v1123_v34, %v1124_v21  ;;  %v1012_v45 = vpop.f32.mrb[15].mxu0 }
 0x250   :  { %v1171_v6 = vmax.f32 %v1056_v8, %v1125_v1  ;;  %v1177_v46 = vmax.f32 %v1062_v47, %v1124_v21  ;;  %v1009_v52 = vadd.f32 %v1008_v22, %v9239_v44  ;;  %v1011_v54 = vadd.f32 %v1010_v39, %v9236_v43 }
 0x251   :  { %v1013_v56 = vadd.f32 %v1012_v45, %v9239_v44  ;;  %v1276_v57 = vrot.slane %v9254_v35, 5  ;;  %v1277_v59 = vrot.slane %v9257_v36, 6  ;;  %v1204_v62 = vrot.slane %v9247_v30, 3 }
 0x252   :  { %v1186_v48 = vmax.f32 %v1168_v3, %v1171_v6  ;;  %v1189_v60 = vmax.f32 %v1174_v20, %v1177_v46  ;;  %v1045_v61 = vmax.f32 %v1011_v54, 0.0  ;;  %v1039_v4 = vmax.f32 %v1007_v50, 0.0 }
 0x253   :  { %v1046_v49 = vmax.f32 %v1013_v56, 0.0  ;;  %v1278_v63 = vor.u32 %v1277_v59, %v1276_v57  ;;  %v1040_v5 = vmax.f32 %v1009_v52, 0.0  ;;  %v1326_v51 = vsel %vm1324_vm9, %v9247_v30, %v9261_v24 }
 0x254   :  { %v9281_v0 = vpack.c.bf16 %v1189_v60, %v1186_v48  ;;  %v1016_v47 = vpop.f32.mrb[16].mxu0  ;;  %v1215_v53 = vrot.slane %v9257_v36, 1  ;;  %v1252_v9 = vrot.slane %v9254_v35, 3  ;;  %v1108_v10 = vrot.slane %v1045_v61, 4 }
 0x255   :  { %v1017_v7 = vadd.f32 %v1016_v47, %v9236_v43  ;;  %v1018_v2 = vpop.f32.mrb[17].mxu0  ;;  %v1300_v8 = vrot.slane %v1278_v63, 1  ;;  %v1111_v34 = vrot.slane %v1046_v49, 4 }
 0x256   :  { %v1019_v11 = vadd.f32 %v1018_v2, %v9239_v44  ;;  %v1020_v12 = vpop.f32.mrb[18].mxu0  ;;  %v9291_v13 = vshrl.u32 %v9281_v0, 16  ;;  %v9294_v14 = vshll.u32 %v9281_v0, 16  ;;  %v1207_v17 = vrot.slane %v9281_v0, 3 }
 0x257   :  { %v1051_v15 = vmax.f32 %v1017_v7, 0.0  ;;  %v1022_v16 = vpop.f32.mrb[19].mxu0  ;;  %v9298_v18 = vrot.slane %v9281_v0, 1  ;;  %v1021_v37 = vadd.f32 %v1020_v12, %v9236_v43  ;;  %v1333_v3 = vsel %vm1324_vm9, %v1204_v62, %v1300_v8 }
 0x258   :  { %v1052_v19 = vmax.f32 %v1019_v11, 0.0  ;;  %v1285_v20 = vrot.slane %v9291_v13, 5  ;;  %v1286_v21 = vrot.slane %v9294_v14, 6  ;;  %v1216_v38 = vor.u32 %v1215_v53, %v9254_v35 }
 0x259   :  { %v1109_v22 = vrot.slane %v1051_v15, 4  ;;  %v1365_v58 = vsel %vm1324_vm9, %v9281_v0, %v9298_v18  ;;  %v1023_v1 = vadd.f32 %v1022_v16, %v9239_v44  ;;  %v1236_v52 = vrot.slane %v9294_v14, 1 }
 0x25a   :  { %v1112_v39 = vrot.slane %v1052_v19, 4  ;;  %v1287_v45 = vor.u32 %v1286_v21, %v1285_v20  ;;  %v9309_v6 = vcombine.low %v1326_v51, %v1365_v58  ;;  %v1303_v54 = vrot.slane %v1216_v38, 1 }
 0x25b   :  { %v1110_v46 = vsel %vm1095_vm8, %v1108_v10, %v1109_v22  ;;  %v1166_v50 = vmax.f32 %v1045_v61, %v1109_v22  ;;  %v1237_v51 = vor.u32 %v1236_v52, %v9291_v13  ;;  %v1058_v16 = vmax.f32 %v1023_v1, 0.0 }
 0x25c   :  { %v1160_v56 = vmax.f32 %v1039_v4, %v1110_v46  ;;  %v1113_v57 = vsel %vm1095_vm8, %v1111_v34, %v1112_v39  ;;  %v1167_v59 = vmax.f32 %v1046_v49, %v1112_v39  ;;  %v1026_v48 = vpop.f32.mrb[20].mxu0  ;;  %v1312_v60 = vrot.slane %v1287_v45, 1 }
 0x25d   :  { %v1184_v62 = vmax.f32 %v9228_v26, %v1166_v50  ;;  %v1161_v63 = vmax.f32 %v1040_v5, %v1113_v57  ;;  %v1027_v47 = vadd.f32 %v1026_v48, %v9236_v43  ;;  %v1028_v7 = vpop.f32.mrb[21].mxu0  ;;  %v1057_v34 = vmax.f32 %v1021_v37, 0.0 }
 0x25e   :  { %v1181_v2 = vmax.f32 %v9230_v55, %v1160_v56  ;;  %v1185_v61 = vmax.f32 %v9223_v23, %v1167_v59  ;;  %v1029_v8 = vadd.f32 %v1028_v7, %v9239_v44  ;;  %v1030_v4 = vpop.f32.mrb[22].mxu0  ;;  %v1372_v53 = vsel %vm1324_vm9, %v1207_v17, %v1312_v60 }
 0x25f   :  { %v1182_v49 = vmax.f32 %v9225_v25, %v1161_v63  ;;  %v1063_v10 = vmax.f32 %v1027_v47, 0.0  ;;  %v1031_v26 = vadd.f32 %v1030_v4, %v9236_v43  ;;  %v1032_v5 = vpop.f32.mrb[23].mxu0  ;;  %v9323_v11 = vcombine.low %v1333_v3, %v1372_v53 }
 0x260   :  { %v9325_v12 = vpack.c.bf16 %v1184_v62, %v1181_v2  ;;  %v1064_v15 = vmax.f32 %v1029_v8, 0.0  ;;  %v1033_v55 = vadd.f32 %v1032_v5, %v9239_v44  ;;  %v1342_v25 = vsel %vm1324_vm9, %v1216_v38, %v1303_v54 }
 0x261   :  { %v9328_v23 = vpack.c.bf16 %v1185_v61, %v1182_v49  ;;  %v1069_v19 = vmax.f32 %v1031_v26, 0.0  ;;  %4470 = vmatprep.mubr.bf16.mxu1 %v9323_v11  ;;  %v1126_v17 = vrot.slane %v1063_v10, 4  ;;  %v1315_v21 = vrot.slane %v1237_v51, 1 }
 0x262   :  { %v1129_v20 = vrot.slane %v1064_v15, 4  ;;  %v1070_v43 = vmax.f32 %v1033_v55, 0.0  ;;  %v9333_v3 = vrot.slane %v9325_v12, 1  ;;  %v1205_v44 = vrot.slane %v9325_v12, 3 }
 0x263   :  { %v1127_v22 = vrot.slane %v1069_v19, 4  ;;  %v9336_v37 = vshrl.u32 %v9328_v23, 16  ;;  %v9340_v39 = vrot.slane %v9328_v23, 1  ;;  %v9343_v1 = vshll.u32 %v9328_v23, 16 }
 0x264   :  { %v1130_v58 = vrot.slane %v1070_v43, 4  ;;  %v9346_v38 = vshrl.u32 %v9325_v12, 16  ;;  %v1206_v50 = vrot.slane %v9328_v23, 3  ;;  %v9355_v62 = vshll.u32 %v9325_v12, 16 }
 0x265   :  { %v1128_v45 = vsel %vm1095_vm8, %v1126_v17, %v1127_v22  ;;  %v1178_v46 = vmax.f32 %v1063_v10, %v1127_v22  ;;  %v1282_v52 = vrot.slane %v9336_v37, 5  ;;  %v1283_v59 = vrot.slane %v9343_v1, 6  ;;  %v7624_v22 = vld [vmem:[#allocation7 + $0x400] ss:$16 sps:$4 sm:$0xff]  }
 0x266   :  { %v1172_v54 = vmax.f32 %v1057_v34, %v1128_v45  ;;  %v1131_v56 = vsel %vm1095_vm8, %v1129_v20, %v1130_v58  ;;  %v1179_v57 = vmax.f32 %v1064_v15, %v1130_v58  ;;  %v1279_v63 = vrot.slane %v9346_v38, 5  ;;  %v7627_v58 = vld [vmem:[#allocation7 + $0x8] ss:$16 sps:$4 sm:$0xff]  }
 0x267   :  { %v1190_v48 = vmax.f32 %v9271_v42, %v1178_v46  ;;  %v1173_v60 = vmax.f32 %v1058_v16, %v1131_v56  ;;  %v9360_v2 = vor.u32 %v1283_v59, %v1282_v52  ;;  %v1381_v61 = vsel %vm1324_vm9, %v1237_v51, %v1315_v21  ;;  %v7632_v56 = vld [vmem:[#allocation7 + $0x424] ss:$16 sps:$4 sm:$0xff]  }
 0x268   :  { %v1187_v47 = vmax.f32 %v9269_v41, %v1172_v54  ;;  %v1191_v7 = vmax.f32 %v9264_v27, %v1179_v57  ;;  %v1280_v4 = vrot.slane %v9355_v62, 6  ;;  %v1222_v42 = vrot.slane %v9355_v62, 1 }
 0x269   :  { %v1188_v8 = vmax.f32 %v9267_v40, %v1173_v60  ;;  %v9366_v53 = vcombine.low %v1342_v25, %v1381_v61  ;;  %v1328_v41 = vsel %vm1324_vm9, %v9325_v12, %v9333_v3  ;;  %v1330_v27 = vsel %vm1324_vm9, %v9328_v23, %v9340_v39  ;;  %v7635_v60 = vld [vmem:[#allocation7 + $0x2c] ss:$16 sps:$4 sm:$0xff]   ;;  %v7630_v61 = vld [vmem:[#allocation7 + $0x420] ss:$16 sps:$4 sm:$0xff]  }
 0x26a   :  { %v9368_v49 = vpack.c.bf16 %v1190_v48, %v1187_v47  ;;  %v1302_v51 = vrot.slane %v9360_v2, 1  ;;  %v1281_v40 = vor.u32 %v1280_v4, %v1279_v63  ;;  %v1253_v26 = vrot.slane %v9257_v36, 4 }
 0x26b   :  { %v9377_v10 = vpack.c.bf16 %v1191_v7, %v1188_v8  ;;  %v1261_v5 = vrot.slane %v9291_v13, 3  ;;  %v1223_v55 = vor.u32 %v1222_v42, %v9346_v38  ;;  %v1262_v16 = vrot.slane %v9294_v14, 4 }
 0x26c   :  { %v9382_v34 = vrot.slane %v9368_v49, 1  ;;  %v9385_v15 = vshrl.u32 %v9368_v49, 16  ;;  %v1208_v13 = vrot.slane %v9368_v49, 3  ;;  %v9403_v20 = vshll.u32 %v9368_v49, 16 }
 0x26d   :  { %v9390_v19 = vrot.slane %v9377_v10, 1  ;;  %v9393_v25 = vshrl.u32 %v9377_v10, 16  ;;  %v9396_v36 = vshll.u32 %v9377_v10, 16  ;;  %v1301_v43 = vrot.slane %v1281_v40, 1 }
 0x26e   :  { %v1367_v17 = vsel %vm1324_vm9, %v9368_v49, %v9382_v34  ;;  %v1288_v14 = vrot.slane %v9385_v15, 5  ;;  %v1289_v57 = vrot.slane %v9403_v20, 6  ;;  %v1243_v48 = vrot.slane %v9403_v20, 1 }
 0x26f   :  { %v6644_v21 = vcombine.low %v1328_v41, %v1367_v17  ;;  %v1369_v45 = vsel %vm1324_vm9, %v9377_v10, %v9390_v19  ;;  %v1291_v46 = vrot.slane %v9393_v25, 5  ;;  %v1292_v52 = vrot.slane %v9396_v36, 6  ;;  %v7633_v41 = vld [vmem:[#allocation7 + $0x28] ss:$16 sps:$4 sm:$0xff]  }
 0x270   :  { %v9411_v54 = vcombine.low %v1330_v27, %v1369_v45  ;;  %v1336_v59 = vsel %vm1324_vm9, %v1205_v44, %v1301_v43  ;;  %v1304_v47 = vrot.slane %v1223_v55, 1  ;;  %v1254_v7 = vor.u32 %v1253_v26, %v1252_v9  ;;  %v7638_v26 = vld [vmem:[#allocation7 + $0x444] ss:$16 sps:$4 sm:$0xff]   ;;  %v7641_v43 = vld [vmem:[#allocation7 + $0x4c] ss:$16 sps:$4 sm:$0xff]  }
 0x271   :  { %4427 = vmatprep.mubr.bf16.mxu0 %v6644_v21  ;;  %v1293_v63 = vor.u32 %v1292_v52, %v1291_v46  ;;  %v1263_v2 = vor.u32 %v1262_v16, %v1261_v5  ;;  %v1290_v8 = vor.u32 %v1289_v57, %v1288_v14  ;;  %v1244_v4 = vor.u32 %v1243_v48, %v9385_v15  ;;  %v7636_v52 = vld [vmem:[#allocation7 + $0x440] ss:$16 sps:$4 sm:$0xff]  }
 0x272   :  { %4428 = vmatmul.mubr.bf16.vlgmr.msra.gmra.mrb[24].mxu0 %v9309_v6  ;;  %4471 = vmatmul.mubr.bf16.vlgmr.msra.gmra.mrb[12].mxu1 %v9411_v54  ;;  %v6637_v44 = vrot.slane %v9247_v30, 7  ;;  %v6640_v42 = vrot.slane %v9281_v0, 7  ;;  %v1209_v27 = vrot.slane %v9377_v10, 3  ;;  %v1345_v9 = vsel %vm1324_vm9, %v1223_v55, %v1304_v47 }
 0x273   :  { %4482 = vmatpush1.bf16.msra.mxu1 %v7624_v22  ;;  %4740 = vmatpush1.bf16.msra.mxu0 %v7627_v58  ;;  %v1314_v35 = vrot.slane %v1293_v63, 1  ;;  %v1229_v40 = vrot.slane %v9343_v1, 1  ;;  %v1313_v5 = vrot.slane %v1290_v8, 1  ;;  %v1316_v16 = vrot.slane %v1244_v4, 1 }
 0x274   :  { %4771 = vmatprep.mubr.bf16.mxu0 %v6644_v21  ;;  %4483 = vmatprep.subr.bf16.mxu1 %v7632_v56  ;;  %v1351_v17 = vsel %vm1324_vm9, %v1254_v7, %v6637_v44  ;;  %v1390_v30 = vsel %vm1324_vm9, %v1263_v2, %v6640_v42  ;;  %v1339_v0 = vsel %vm1324_vm9, %v1206_v50, %v1302_v51  ;;  %v1250_v46 = vrot.slane %v9396_v36, 1  ;;  %v7639_v56 = vld [vmem:[#allocation7 + $0x48] ss:$16 sps:$4 sm:$0xff]  }
 0x275   :  { %4741 = vmatprep.subr.bf16.mxu0 %v7635_v60  ;;  %v1378_v14 = vsel %vm1324_vm9, %v1209_v27, %v1314_v35  ;;  %v9432_v55 = vcombine.low %v1351_v17, %v1390_v30  ;;  %v1230_v21 = vor.u32 %v1229_v40, %v9336_v37  ;;  %v1375_v58 = vsel %vm1324_vm9, %v1208_v13, %v1313_v5  ;;  %v7644_v60 = vld [vmem:[#allocation7 + $0x464] ss:$16 sps:$4 sm:$0xff]   ;;  %v7647_v13 = vld [vmem:[#allocation7 + $0x6c] ss:$16 sps:$4 sm:$0xff]   ;;  %v7645_v44 = vld [vmem:[#allocation7 + $0x68] ss:$16 sps:$4 sm:$0xff]  }
 0x276   :  { %v9435_v22 = vcombine.low %v1339_v0, %v1378_v14  ;;  %v1384_v45 = vsel %vm1324_vm9, %v1244_v4, %v1316_v16  ;;  %v9440_v50 = vcombine.low %v1336_v59, %v1375_v58  ;;  %v1258_v48 = vrot.slane %v9336_v37, 3  ;;  %v7642_v4 = vld [vmem:[#allocation7 + $0x460] ss:$16 sps:$4 sm:$0xff]   ;;  %v7651_v17 = vld [vmem:[#allocation7 + $0x88] ss:$16 sps:$4 sm:$0xff]  }
 0x277   :  { %4484 = vmatpush1.bf16.msra.mxu1 %v7630_v61  ;;  %4742 = vmatpush1.bf16.msra.mxu0 %v7633_v41  ;;  %v9442_v51 = vcombine.low %v1345_v9, %v1384_v45  ;;  %v1305_v57 = vrot.slane %v1230_v21, 1  ;;  %v1251_v63 = vor.u32 %v1250_v46, %v9393_v25  ;;  %v1259_v7 = vrot.slane %v9343_v1, 4  ;;  %v7650_v1 = vld [vmem:[#allocation7 + $0x484] ss:$16 sps:$4 sm:$0xff]   ;;  %v7648_v5 = vld [vmem:[#allocation7 + $0x480] ss:$16 sps:$4 sm:$0xff]  }
 0x278   :  { %4513 = vmatprep.mubr.bf16.mxu1 %v9435_v22  ;;  %4485 = vmatprep.subr.bf16.mxu1 %v7638_v26  ;;  %v1267_v59 = vrot.slane %v9393_v25, 3  ;;  %v1268_v2 = vrot.slane %v9396_v36, 4  ;;  %v6639_v8 = vrot.slane %v9328_v23, 7  ;;  %v1255_v37 = vrot.slane %v9346_v38, 3  ;;  %v7653_v25 = vld [vmem:[#allocation7 + $0x8c] ss:$16 sps:$4 sm:$0xff]  }
 0x279   :  { %4743 = vmatprep.subr.bf16.mxu0 %v7641_v43  ;;  %v1348_v47 = vsel %vm1324_vm9, %v1230_v21, %v1305_v57  ;;  %v1317_v61 = vrot.slane %v1251_v63, 1  ;;  %v1260_v42 = vor.u32 %v1259_v7, %v1258_v48  ;;  %v6642_v27 = vrot.slane %v9377_v10, 7  ;;  %v7656_v43 = vld [vmem:[#allocation7 + $0x4a4] ss:$16 sps:$4 sm:$0xff]   ;;  %v7659_v21 = vld [vmem:[#allocation7 + $0xac] ss:$16 sps:$4 sm:$0xff]  }
 0x27a   :  { %v1269_v41 = vor.u32 %v1268_v2, %v1267_v59  ;;  %v1256_v35 = vrot.slane %v9355_v62, 4  ;;  %v1264_v23 = vrot.slane %v9385_v15, 3  ;;  %v1265_v62 = vrot.slane %v9403_v20, 4  ;;  %v7660_v2 = vld [vmem:[#allocation7 + $0x4c0] ss:$16 sps:$4 sm:$0xff]  }
 0x27b   :  { %4486 = vmatpush1.bf16.msra.mxu1 %v7636_v52  ;;  %4744 = vmatpush1.bf16.msra.mxu0 %v7639_v56  ;;  %v1387_v36 = vsel %vm1324_vm9, %v1251_v63, %v1317_v61  ;;  %v1357_v38 = vsel %vm1324_vm9, %v1260_v42, %v6639_v8  ;;  %v6638_v10 = vrot.slane %v9325_v12, 7  ;;  %v1310_v30 = vrot.slane %v9333_v3, 1  ;;  %v7663_v61 = vld [vmem:[#allocation7 + $0xc8] ss:$16 sps:$4 sm:$0xff]   ;;  %v7668_v8 = vld [vmem:[#allocation7 + $0x4e4] ss:$16 sps:$4 sm:$0xff]  }
 0x27c   :  { %4487 = vmatprep.subr.bf16.mxu1 %v7644_v60  ;;  %4745 = vmatprep.subr.bf16.mxu0 %v7647_v13  ;;  %v9457_v9 = vcombine.low %v1348_v47, %v1387_v36  ;;  %v1396_v40 = vsel %vm1324_vm9, %v1269_v41, %v6642_v27  ;;  %v1257_v26 = vor.u32 %v1256_v35, %v1255_v37  ;;  %v1322_v15 = vrot.slane %v9382_v34, 1  ;;  %v7657_v13 = vld [vmem:[#allocation7 + $0xa8] ss:$16 sps:$4 sm:$0xff]   ;;  %v7671_v37 = vld [vmem:[#allocation7 + $0xec] ss:$16 sps:$4 sm:$0xff]  }
 0x27d   :  { %v9461_v16 = vcombine.low %v1357_v38, %v1396_v40  ;;  %v1309_v0 = vrot.slane %v9261_v24, 1  ;;  %v1321_v14 = vrot.slane %v9298_v18, 1  ;;  %v1266_v58 = vor.u32 %v1265_v62, %v1264_v23  ;;  %v7677_v42 = vld [vmem:[#allocation7 + $0x10c] ss:$16 sps:$4 sm:$0xff]   ;;  %v7675_v41 = vld [vmem:[#allocation7 + $0x108] ss:$16 sps:$4 sm:$0xff]  }
 0x27e   :  { %v6641_v20 = vrot.slane %v9368_v49, 7  ;;  %v1354_v12 = vsel %vm1324_vm9, %v1257_v26, %v6638_v10  ;;  %v1361_v45 = vsel %vm1324_vm9, %v9333_v3, %v1310_v30  ;;  %v1400_v46 = vsel %vm1324_vm9, %v9382_v34, %v1322_v15  ;;  %v7654_v3 = vld [vmem:[#allocation7 + $0x4a0] ss:$16 sps:$4 sm:$0xff]   ;;  %v7680_v27 = vld [vmem:[#allocation7 + $0x524] ss:$16 sps:$4 sm:$0xff]  }
 0x27f   :  { %4488 = vmatpush1.bf16.msra.mxu1 %v7642_v4  ;;  %4746 = vmatpush1.bf16.msra.mxu0 %v7645_v44  ;;  %v1359_v52 = vsel %vm1324_vm9, %v9261_v24, %v1309_v0  ;;  %v1398_v56 = vsel %vm1324_vm9, %v9298_v18, %v1321_v14  ;;  %v9480_v48 = vcombine.low %v1361_v45, %v1400_v46  ;;  %v1311_v49 = vrot.slane %v9340_v39, 1  ;;  %v7662_v24 = vld [vmem:[#allocation7 + $0x4c4] ss:$16 sps:$4 sm:$0xff]   ;;  %v7665_v18 = vld [vmem:[#allocation7 + $0xcc] ss:$16 sps:$4 sm:$0xff]  }
 0x280   :  { %4489 = vmatprep.subr.bf16.mxu1 %v7650_v1  ;;  %4747 = vmatprep.subr.bf16.mxu0 %v7653_v25  ;;  %v1393_v57 = vsel %vm1324_vm9, %v1266_v58, %v6641_v20  ;;  %v9482_v60 = vcombine.low %v1359_v52, %v1398_v56  ;;  %v1323_v34 = vrot.slane %v9390_v19, 1  ;;  %v7666_v4 = vld [vmem:[#allocation7 + $0x4e0] ss:$16 sps:$4 sm:$0xff]   ;;  %v7669_v44 = vld [vmem:[#allocation7 + $0xe8] ss:$16 sps:$4 sm:$0xff]  }
 0x281   :  { %v9485_v63 = vcombine.low %v1354_v12, %v1393_v57  ;;  %v1363_v47 = vsel %vm1324_vm9, %v9340_v39, %v1311_v49  ;;  %v7674_v39 = vld [vmem:[#allocation7 + $0x504] ss:$16 sps:$4 sm:$0xff]   ;;  %v7683_v35 = vld [vmem:[#allocation7 + $0x12c] ss:$16 sps:$4 sm:$0xff]   ;;  %v7678_v1 = vld [vmem:[#allocation7 + $0x520] ss:$16 sps:$4 sm:$0xff]  }
 0x282   :  { %v1402_v7 = vsel %vm1324_vm9, %v9390_v19, %v1323_v34  ;;  %v7672_v19 = vld [vmem:[#allocation7 + $0x500] ss:$16 sps:$4 sm:$0xff]   ;;  %v7681_v25 = vld [vmem:[#allocation7 + $0x128] ss:$16 sps:$4 sm:$0xff]   ;;  %v7686_v36 = vld [vmem:[#allocation7 + $0x544] ss:$16 sps:$4 sm:$0xff]  }
 0x283   :  { %4490 = vmatpush1.bf16.msra.mxu1 %v7648_v5  ;;  %4748 = vmatpush1.bf16.msra.mxu0 %v7651_v17  ;;  %v9492_v59 = vcombine.low %v1363_v47, %v1402_v7  ;;  %v7689_v23 = vld [vmem:[#allocation7 + $0x14c] ss:$16 sps:$4 sm:$0xff]   ;;  %v7684_v38 = vld [vmem:[#allocation7 + $0x540] ss:$16 sps:$4 sm:$0xff]   ;;  %v7687_v40 = vld [vmem:[#allocation7 + $0x148] ss:$16 sps:$4 sm:$0xff]  }
 0x284   :  { %4491 = vmatprep.subr.bf16.mxu1 %v7656_v43  ;;  %4749 = vmatprep.subr.bf16.mxu0 %v7659_v21  ;;  %v7692_v26 = vld [vmem:[#allocation7 + $0x564] ss:$16 sps:$4 sm:$0xff]   ;;  %v7695_v5 = vld [vmem:[#allocation7 + $0x16c] ss:$16 sps:$4 sm:$0xff]   ;;  %v7690_v62 = vld [vmem:[#allocation7 + $0x560] ss:$16 sps:$4 sm:$0xff]  }
 0x285   :  { %v7693_v10 = vld [vmem:[#allocation7 + $0x168] ss:$16 sps:$4 sm:$0xff]   ;;  %v7698_v17 = vld [vmem:[#allocation7 + $0x584] ss:$16 sps:$4 sm:$0xff]   ;;  %v7701_v30 = vld [vmem:[#allocation7 + $0x18c] ss:$16 sps:$4 sm:$0xff]  }
 0x286   :  { %v7696_v15 = vld [vmem:[#allocation7 + $0x580] ss:$16 sps:$4 sm:$0xff]   ;;  %v7699_v0 = vld [vmem:[#allocation7 + $0x188] ss:$16 sps:$4 sm:$0xff]   ;;  %v7704_v14 = vld [vmem:[#allocation7 + $0x5a4] ss:$16 sps:$4 sm:$0xff]  }
 0x287   :  { %4492 = vmatpush1.bf16.msra.mxu1 %v7654_v3  ;;  %4750 = vmatpush1.bf16.msra.mxu0 %v7657_v13  ;;  %v7707_v43 = vld [vmem:[#allocation7 + $0x1ac] ss:$16 sps:$4 sm:$0xff]   ;;  %v7702_v21 = vld [vmem:[#allocation7 + $0x5a0] ss:$16 sps:$4 sm:$0xff]   ;;  %v7705_v58 = vld [vmem:[#allocation7 + $0x1a8] ss:$16 sps:$4 sm:$0xff]  }
 0x288   :  { %4493 = vmatprep.subr.bf16.mxu1 %v7662_v24  ;;  %4751 = vmatprep.subr.bf16.mxu0 %v7665_v18  ;;  %v7710_v20 = vld [vmem:[#allocation7 + $0x5c4] ss:$16 sps:$4 sm:$0xff]   ;;  %v7713_v12 = vld [vmem:[#allocation7 + $0x1cc] ss:$16 sps:$4 sm:$0xff]   ;;  %v7708_v45 = vld [vmem:[#allocation7 + $0x5c0] ss:$16 sps:$4 sm:$0xff]  }
 0x289   :  { %v7711_v46 = vld [vmem:[#allocation7 + $0x1c8] ss:$16 sps:$4 sm:$0xff]   ;;  %v7716_v52 = vld [vmem:[#allocation7 + $0x5e4] ss:$16 sps:$4 sm:$0xff]   ;;  %v7719_v56 = vld [vmem:[#allocation7 + $0x1ec] ss:$16 sps:$4 sm:$0xff]  }
 0x28a   :  { %v7714_v57 = vld [vmem:[#allocation7 + $0x5e0] ss:$16 sps:$4 sm:$0xff]   ;;  %v7717_v49 = vld [vmem:[#allocation7 + $0x1e8] ss:$16 sps:$4 sm:$0xff]   ;;  %v7722_v3 = vld [vmem:[#allocation7 + $0x604] ss:$16 sps:$4 sm:$0xff]  }
 0x28b   :  { %4494 = vmatpush1.bf16.msra.mxu1 %v7660_v2  ;;  %4752 = vmatpush1.bf16.msra.mxu0 %v7663_v61  ;;  %v7725_v13 = vld [vmem:[#allocation7 + $0x20c] ss:$16 sps:$4 sm:$0xff]   ;;  %v7720_v34 = vld [vmem:[#allocation7 + $0x600] ss:$16 sps:$4 sm:$0xff]   ;;  %v7723_v24 = vld [vmem:[#allocation7 + $0x208] ss:$16 sps:$4 sm:$0xff]  }
 0x28c   :  { %4495 = vmatprep.subr.bf16.mxu1 %v7668_v8  ;;  %4753 = vmatprep.subr.bf16.mxu0 %v7671_v37  ;;  %v7728_v18 = vld [vmem:[#allocation7 + $0x624] ss:$16 sps:$4 sm:$0xff]   ;;  %v7731_v47 = vld [vmem:[#allocation7 + $0x22c] ss:$16 sps:$4 sm:$0xff]   ;;  %v7726_v7 = vld [vmem:[#allocation7 + $0x620] ss:$16 sps:$4 sm:$0xff]  }
 0x28d   :  { %v7729_v2 = vld [vmem:[#allocation7 + $0x228] ss:$16 sps:$4 sm:$0xff]   ;;  %v7734_v61 = vld [vmem:[#allocation7 + $0x644] ss:$16 sps:$4 sm:$0xff]   ;;  %v7737_v8 = vld [vmem:[#allocation7 + $0x24c] ss:$16 sps:$4 sm:$0xff]  }
 0x28e   :  { %v7732_v37 = vld [vmem:[#allocation7 + $0x640] ss:$16 sps:$4 sm:$0xff]  }
 0x28f   :  { %4496 = vmatpush1.bf16.msra.mxu1 %v7666_v4  ;;  %4754 = vmatpush1.bf16.msra.mxu0 %v7669_v44  ;;  %v7735_v4 = vld [vmem:[#allocation7 + $0x248] ss:$16 sps:$4 sm:$0xff]   ;;  %v7740_v44 = vld [vmem:[#allocation7 + $0x664] ss:$16 sps:$4 sm:$0xff]  }
 0x290   :  { %4497 = vmatprep.subr.bf16.mxu1 %v7674_v39  ;;  %4755 = vmatprep.subr.bf16.mxu0 %v7677_v42  ;;  %v7738_v39 = vld [vmem:[#allocation7 + $0x660] ss:$16 sps:$4 sm:$0xff]   ;;  %v7741_v42 = vld [vmem:[#allocation7 + $0x268] ss:$16 sps:$4 sm:$0xff]  }
 0x293   :  { %4498 = vmatpush1.bf16.msra.mxu1 %v7672_v19  ;;  %4756 = vmatpush1.bf16.msra.mxu0 %v7675_v41  ;;  %v7746_v19 = vld [vmem:[#allocation7 + $0x684] ss:$16 sps:$4 sm:$0xff]   ;;  %v7744_v41 = vld [vmem:[#allocation7 + $0x680] ss:$16 sps:$4 sm:$0xff]  }
 0x294   :  { %4499 = vmatprep.subr.bf16.mxu1 %v7680_v27  ;;  %4757 = vmatprep.subr.bf16.mxu0 %v7683_v35  ;;  %v7747_v27 = vld [vmem:[#allocation7 + $0x288] ss:$16 sps:$4 sm:$0xff]   ;;  %v7752_v35 = vld [vmem:[#allocation7 + $0x6a4] ss:$16 sps:$4 sm:$0xff]  }
 0x297   :  { %4500 = vmatpush1.bf16.msra.mxu1 %v7678_v1  ;;  %4758 = vmatpush1.bf16.msra.mxu0 %v7681_v25  ;;  %v7755_v1 = vld [vmem:[#allocation7 + $0x2ac] ss:$16 sps:$4 sm:$0xff]   ;;  %v7750_v25 = vld [vmem:[#allocation7 + $0x6a0] ss:$16 sps:$4 sm:$0xff]  }
 0x298   :  { %4501 = vmatprep.subr.bf16.mxu1 %v7686_v36  ;;  %4759 = vmatprep.subr.bf16.mxu0 %v7689_v23  ;;  %v7753_v36 = vld [vmem:[#allocation7 + $0x2a8] ss:$16 sps:$4 sm:$0xff]   ;;  %v7758_v23 = vld [vmem:[#allocation7 + $0x6c4] ss:$16 sps:$4 sm:$0xff]  }
 0x29b   :  { %4502 = vmatpush1.bf16.msra.mxu1 %v7684_v38  ;;  %4760 = vmatpush1.bf16.msra.mxu0 %v7687_v40  ;;  %v7761_v38 = vld [vmem:[#allocation7 + $0x2cc] ss:$16 sps:$4 sm:$0xff]   ;;  %v7756_v40 = vld [vmem:[#allocation7 + $0x6c0] ss:$16 sps:$4 sm:$0xff]  }
 0x29c   :  { %4503 = vmatprep.subr.bf16.mxu1 %v7692_v26  ;;  %4761 = vmatprep.subr.bf16.mxu0 %v7695_v5  ;;  %v7759_v26 = vld [vmem:[#allocation7 + $0x2c8] ss:$16 sps:$4 sm:$0xff]   ;;  %v7764_v5 = vld [vmem:[#allocation7 + $0x6e4] ss:$16 sps:$4 sm:$0xff]  }
 0x29f   :  { %4504 = vmatpush1.bf16.msra.mxu1 %v7690_v62  ;;  %4762 = vmatpush1.bf16.msra.mxu0 %v7693_v10  ;;  %v7767_v62 = vld [vmem:[#allocation7 + $0x2ec] ss:$16 sps:$4 sm:$0xff]   ;;  %v7762_v10 = vld [vmem:[#allocation7 + $0x6e0] ss:$16 sps:$4 sm:$0xff]  }
 0x2a0   :  { %4505 = vmatprep.subr.bf16.mxu1 %v7698_v17  ;;  %4763 = vmatprep.subr.bf16.mxu0 %v7701_v30  ;;  %v7765_v17 = vld [vmem:[#allocation7 + $0x2e8] ss:$16 sps:$4 sm:$0xff]   ;;  %v7770_v30 = vld [vmem:[#allocation7 + $0x704] ss:$16 sps:$4 sm:$0xff]  }
 0x2a3   :  { %4506 = vmatpush1.bf16.msra.mxu1 %v7696_v15  ;;  %4764 = vmatpush1.bf16.msra.mxu0 %v7699_v0  ;;  %v7773_v15 = vld [vmem:[#allocation7 + $0x30c] ss:$16 sps:$4 sm:$0xff]   ;;  %v7768_v0 = vld [vmem:[#allocation7 + $0x700] ss:$16 sps:$4 sm:$0xff]  }
 0x2a4   :  { %4507 = vmatprep.subr.bf16.mxu1 %v7704_v14  ;;  %4765 = vmatprep.subr.bf16.mxu0 %v7707_v43  ;;  %v7771_v14 = vld [vmem:[#allocation7 + $0x308] ss:$16 sps:$4 sm:$0xff]   ;;  %v7776_v43 = vld [vmem:[#allocation7 + $0x724] ss:$16 sps:$4 sm:$0xff]  }
 0x2a7   :  { %4508 = vmatpush1.bf16.msra.mxu1 %v7702_v21  ;;  %4766 = vmatpush1.bf16.msra.mxu0 %v7705_v58  ;;  %v7779_v21 = vld [vmem:[#allocation7 + $0x32c] ss:$16 sps:$4 sm:$0xff]   ;;  %v7774_v58 = vld [vmem:[#allocation7 + $0x720] ss:$16 sps:$4 sm:$0xff]  }
 0x2a8   :  { %4509 = vmatprep.subr.bf16.mxu1 %v7710_v20  ;;  %4767 = vmatprep.subr.bf16.mxu0 %v7713_v12  ;;  %v7777_v20 = vld [vmem:[#allocation7 + $0x328] ss:$16 sps:$4 sm:$0xff]   ;;  %v7782_v12 = vld [vmem:[#allocation7 + $0x744] ss:$16 sps:$4 sm:$0xff]  }
 0x2ab   :  { %4510 = vmatpush1.bf16.msra.mxu1 %v7708_v45  ;;  %4768 = vmatpush1.bf16.msra.mxu0 %v7711_v46  ;;  %v7785_v45 = vld [vmem:[#allocation7 + $0x34c] ss:$16 sps:$4 sm:$0xff]   ;;  %v7780_v46 = vld [vmem:[#allocation7 + $0x740] ss:$16 sps:$4 sm:$0xff]  }
 0x2ac   :  { %4511 = vmatprep.subr.bf16.mxu1 %v7716_v52  ;;  %4769 = vmatprep.subr.bf16.mxu0 %v7719_v56  ;;  %v7783_v52 = vld [vmem:[#allocation7 + $0x348] ss:$16 sps:$4 sm:$0xff]   ;;  %v7788_v56 = vld [vmem:[#allocation7 + $0x764] ss:$16 sps:$4 sm:$0xff]  }
 0x2af   :  { %4512 = vmatpush1.bf16.msra.mxu1 %v7714_v57  ;;  %4770 = vmatpush1.bf16.msra.mxu0 %v7717_v49  ;;  %v7791_v57 = vld [vmem:[#allocation7 + $0x36c] ss:$16 sps:$4 sm:$0xff]   ;;  %v7786_v49 = vld [vmem:[#allocation7 + $0x760] ss:$16 sps:$4 sm:$0xff]  }
 0x2b0   :  { %4524 = vmatprep.subr.bf16.mxu1 %v7722_v3  ;;  %4782 = vmatprep.subr.bf16.mxu0 %v7725_v13  ;;  %v7789_v3 = vld [vmem:[#allocation7 + $0x368] ss:$16 sps:$4 sm:$0xff]   ;;  %v7794_v13 = vld [vmem:[#allocation7 + $0x784] ss:$16 sps:$4 sm:$0xff]  }
 0x2b2   :  { %4514 = vmatmul.mubr.bf16.vlgmr.msra.gmra.mrb[12].mxu1 %v9440_v50  ;;  %4772 = vmatmul.mubr.bf16.vlgmr.msra.gmra.mrb[28].mxu0 %v9309_v6  ;;  %v7743_v6 = vld [vmem:[#allocation7 + $0x26c] ss:$16 sps:$4 sm:$0xff]  }
 0x2b3   :  { %4525 = vmatpush1.bf16.msra.mxu1 %v7720_v34  ;;  %4556 = vmatprep.mubr.bf16.mxu1 %v9442_v51  ;;  %v7797_v34 = vld [vmem:[#allocation7 + $0x38c] ss:$16 sps:$4 sm:$0xff]  }
 0x2b4   :  { %4783 = vmatpush1.bf16.msra.mxu0 %v7723_v24  ;;  %4814 = vmatprep.mubr.bf16.mxu0 %v9323_v11  ;;  %v7749_v11 = vld [vmem:[#allocation7 + $0x28c] ss:$16 sps:$4 sm:$0xff]   ;;  %v7792_v24 = vld [vmem:[#allocation7 + $0x780] ss:$16 sps:$4 sm:$0xff]  }
 0x2b5   :  { %4526 = vmatprep.subr.bf16.mxu1 %v7728_v18  ;;  %4784 = vmatprep.subr.bf16.mxu0 %v7731_v47  ;;  %v7795_v18 = vld [vmem:[#allocation7 + $0x388] ss:$16 sps:$4 sm:$0xff]   ;;  %v7800_v47 = vld [vmem:[#allocation7 + $0x7a4] ss:$16 sps:$4 sm:$0xff]  }
 0x2b7   :  { %4527 = vmatpush1.bf16.msra.mxu1 %v7726_v7  ;;  %v7803_v7 = vld [vmem:[#allocation7 + $0x3ac] ss:$16 sps:$4 sm:$0xff]  }
 0x2b8   :  { %4785 = vmatpush1.bf16.msra.mxu0 %v7729_v2  ;;  %4528 = vmatprep.subr.bf16.mxu1 %v7734_v61  ;;  %v7798_v2 = vld [vmem:[#allocation7 + $0x7a0] ss:$16 sps:$4 sm:$0xff]   ;;  %v7801_v61 = vld [vmem:[#allocation7 + $0x3a8] ss:$16 sps:$4 sm:$0xff]  }
 0x2b9   :  { %4786 = vmatprep.subr.bf16.mxu0 %v7737_v8  ;;  %v7806_v8 = vld [vmem:[#allocation7 + $0x7c4] ss:$16 sps:$4 sm:$0xff]  }
 0x2bb   :  { %4529 = vmatpush1.bf16.msra.mxu1 %v7732_v37  ;;  %v7809_v37 = vld [vmem:[#allocation7 + $0x3cc] ss:$16 sps:$4 sm:$0xff]  }
 0x2bc   :  { %4787 = vmatpush1.bf16.msra.mxu0 %v7735_v4  ;;  %4530 = vmatprep.subr.bf16.mxu1 %v7740_v44  ;;  %v7804_v4 = vld [vmem:[#allocation7 + $0x7c0] ss:$16 sps:$4 sm:$0xff]   ;;  %v7807_v44 = vld [vmem:[#allocation7 + $0x3c8] ss:$16 sps:$4 sm:$0xff]  }
 0x2bd   :  { %4788 = vmatprep.subr.bf16.mxu0 %v7743_v6  ;;  %v7812_v6 = vld [vmem:[#allocation7 + $0x7e4] ss:$16 sps:$4 sm:$0xff]  }
 0x2bf   :  { %4531 = vmatpush1.bf16.msra.mxu1 %v7738_v39  ;;  %v7815_v39 = vld [vmem:[#allocation7 + $0x3ec] ss:$16 sps:$4 sm:$0xff]  }
 0x2c0   :  { %4789 = vmatpush1.bf16.msra.mxu0 %v7741_v42  ;;  %4532 = vmatprep.subr.bf16.mxu1 %v7746_v19  ;;  %v7810_v42 = vld [vmem:[#allocation7 + $0x7e0] ss:$16 sps:$4 sm:$0xff]   ;;  %v7813_v19 = vld [vmem:[#allocation7 + $0x3e8] ss:$16 sps:$4 sm:$0xff]  }
 0x2c1   :  { %4790 = vmatprep.subr.bf16.mxu0 %v7749_v11  ;;  %v7818_v11 = vld [vmem:[#allocation7 + $0x804] ss:$16 sps:$4 sm:$0xff]  }
 0x2c3   :  { %4533 = vmatpush1.bf16.msra.mxu1 %v7744_v41  ;;  %v7821_v41 = vld [vmem:[#allocation7 + $0x40c] ss:$16 sps:$4 sm:$0xff]  }
 0x2c4   :  { %4791 = vmatpush1.bf16.msra.mxu0 %v7747_v27  ;;  %4534 = vmatprep.subr.bf16.mxu1 %v7752_v35  ;;  %v7816_v27 = vld [vmem:[#allocation7 + $0x800] ss:$16 sps:$4 sm:$0xff]   ;;  %v7819_v35 = vld [vmem:[#allocation7 + $0x408] ss:$16 sps:$4 sm:$0xff]  }
 0x2c5   :  { %4792 = vmatprep.subr.bf16.mxu0 %v7755_v1  ;;  %v7824_v1 = vld [vmem:[#allocation7 + $0x824] ss:$16 sps:$4 sm:$0xff]  }
 0x2c7   :  { %4535 = vmatpush1.bf16.msra.mxu1 %v7750_v25  ;;  %v7827_v25 = vld [vmem:[#allocation7 + $0x42c] ss:$16 sps:$4 sm:$0xff]  }
 0x2c8   :  { %4793 = vmatpush1.bf16.msra.mxu0 %v7753_v36  ;;  %4536 = vmatprep.subr.bf16.mxu1 %v7758_v23  ;;  %v7822_v36 = vld [vmem:[#allocation7 + $0x820] ss:$16 sps:$4 sm:$0xff]   ;;  %v7825_v23 = vld [vmem:[#allocation7 + $0x428] ss:$16 sps:$4 sm:$0xff]  }
 0x2c9   :  { %4794 = vmatprep.subr.bf16.mxu0 %v7761_v38  ;;  %v7830_v38 = vld [vmem:[#allocation7 + $0x844] ss:$16 sps:$4 sm:$0xff]  }
 0x2cb   :  { %4537 = vmatpush1.bf16.msra.mxu1 %v7756_v40  ;;  %v7833_v40 = vld [vmem:[#allocation7 + $0x44c] ss:$16 sps:$4 sm:$0xff]  }
 0x2cc   :  { %4795 = vmatpush1.bf16.msra.mxu0 %v7759_v26  ;;  %4538 = vmatprep.subr.bf16.mxu1 %v7764_v5  ;;  %v7828_v26 = vld [vmem:[#allocation7 + $0x840] ss:$16 sps:$4 sm:$0xff]   ;;  %v7831_v5 = vld [vmem:[#allocation7 + $0x448] ss:$16 sps:$4 sm:$0xff]  }
 0x2cd   :  { %4796 = vmatprep.subr.bf16.mxu0 %v7767_v62  ;;  %v7836_v62 = vld [vmem:[#allocation7 + $0x864] ss:$16 sps:$4 sm:$0xff]  }
 0x2cf   :  { %4539 = vmatpush1.bf16.msra.mxu1 %v7762_v10  ;;  %v7834_v10 = vld [vmem:[#allocation7 + $0x860] ss:$16 sps:$4 sm:$0xff]  }
 0x2d0   :  { %4797 = vmatpush1.bf16.msra.mxu0 %v7765_v17  ;;  %4540 = vmatprep.subr.bf16.mxu1 %v7770_v30  ;;  %v7837_v17 = vld [vmem:[#allocation7 + $0x468] ss:$16 sps:$4 sm:$0xff]   ;;  %v7842_v30 = vld [vmem:[#allocation7 + $0x884] ss:$16 sps:$4 sm:$0xff]  }
 0x2d1   :  { %4798 = vmatprep.subr.bf16.mxu0 %v7773_v15  ;;  %v7845_v15 = vld [vmem:[#allocation7 + $0x48c] ss:$16 sps:$4 sm:$0xff]  }
 0x2d3   :  { %4541 = vmatpush1.bf16.msra.mxu1 %v7768_v0  ;;  %v7843_v0 = vld [vmem:[#allocation7 + $0x488] ss:$16 sps:$4 sm:$0xff]  }
 0x2d4   :  { %4799 = vmatpush1.bf16.msra.mxu0 %v7771_v14  ;;  %4542 = vmatprep.subr.bf16.mxu1 %v7776_v43  ;;  %v7848_v14 = vld [vmem:[#allocation7 + $0x8a4] ss:$16 sps:$4 sm:$0xff]   ;;  %v7851_v43 = vld [vmem:[#allocation7 + $0x4ac] ss:$16 sps:$4 sm:$0xff]  }
 0x2d5   :  { %4800 = vmatprep.subr.bf16.mxu0 %v7779_v21  ;;  %v7846_v21 = vld [vmem:[#allocation7 + $0x8a0] ss:$16 sps:$4 sm:$0xff]  }
 0x2d7   :  { %4543 = vmatpush1.bf16.msra.mxu1 %v7774_v58  ;;  %v7849_v58 = vld [vmem:[#allocation7 + $0x4a8] ss:$16 sps:$4 sm:$0xff]  }
 0x2d8   :  { %4801 = vmatpush1.bf16.msra.mxu0 %v7777_v20  ;;  %4544 = vmatprep.subr.bf16.mxu1 %v7782_v12  ;;  %v7854_v20 = vld [vmem:[#allocation7 + $0x8c4] ss:$16 sps:$4 sm:$0xff]   ;;  %v7857_v12 = vld [vmem:[#allocation7 + $0x4cc] ss:$16 sps:$4 sm:$0xff]  }
 0x2d9   :  { %4802 = vmatprep.subr.bf16.mxu0 %v7785_v45  ;;  %v7852_v45 = vld [vmem:[#allocation7 + $0x8c0] ss:$16 sps:$4 sm:$0xff]  }
 0x2db   :  { %4545 = vmatpush1.bf16.msra.mxu1 %v7780_v46  ;;  %v7855_v46 = vld [vmem:[#allocation7 + $0x4c8] ss:$16 sps:$4 sm:$0xff]  }
 0x2dc   :  { %4803 = vmatpush1.bf16.msra.mxu0 %v7783_v52  ;;  %4546 = vmatprep.subr.bf16.mxu1 %v7788_v56  ;;  %v7860_v52 = vld [vmem:[#allocation7 + $0x8e4] ss:$16 sps:$4 sm:$0xff]   ;;  %v7863_v56 = vld [vmem:[#allocation7 + $0x4ec] ss:$16 sps:$4 sm:$0xff]  }
 0x2dd   :  { %4804 = vmatprep.subr.bf16.mxu0 %v7791_v57  ;;  %v7858_v57 = vld [vmem:[#allocation7 + $0x8e0] ss:$16 sps:$4 sm:$0xff]  }
 0x2df   :  { %4547 = vmatpush1.bf16.msra.mxu1 %v7786_v49  ;;  %v7861_v49 = vld [vmem:[#allocation7 + $0x4e8] ss:$16 sps:$4 sm:$0xff]  }
 0x2e0   :  { %4805 = vmatpush1.bf16.msra.mxu0 %v7789_v3  ;;  %4548 = vmatprep.subr.bf16.mxu1 %v7794_v13  ;;  %v7866_v3 = vld [vmem:[#allocation7 + $0x904] ss:$16 sps:$4 sm:$0xff]   ;;  %v7869_v13 = vld [vmem:[#allocation7 + $0x50c] ss:$16 sps:$4 sm:$0xff]  }
 0x2e1   :  { %4806 = vmatprep.subr.bf16.mxu0 %v7797_v34  ;;  %v7864_v34 = vld [vmem:[#allocation7 + $0x900] ss:$16 sps:$4 sm:$0xff]  }
 0x2e3   :  { %4549 = vmatpush1.bf16.msra.mxu1 %v7792_v24  ;;  %v7867_v24 = vld [vmem:[#allocation7 + $0x508] ss:$16 sps:$4 sm:$0xff]  }
 0x2e4   :  { %4807 = vmatpush1.bf16.msra.mxu0 %v7795_v18  ;;  %4550 = vmatprep.subr.bf16.mxu1 %v7800_v47  ;;  %v7872_v18 = vld [vmem:[#allocation7 + $0x924] ss:$16 sps:$4 sm:$0xff]   ;;  %v7875_v47 = vld [vmem:[#allocation7 + $0x52c] ss:$16 sps:$4 sm:$0xff]  }
 0x2e5   :  { %4808 = vmatprep.subr.bf16.mxu0 %v7803_v7  ;;  %v7870_v7 = vld [vmem:[#allocation7 + $0x920] ss:$16 sps:$4 sm:$0xff]  }
 0x2e7   :  { %4551 = vmatpush1.bf16.msra.mxu1 %v7798_v2  ;;  %v7873_v2 = vld [vmem:[#allocation7 + $0x528] ss:$16 sps:$4 sm:$0xff]  }
 0x2e8   :  { %4809 = vmatpush1.bf16.msra.mxu0 %v7801_v61  ;;  %4552 = vmatprep.subr.bf16.mxu1 %v7806_v8  ;;  %v7878_v61 = vld [vmem:[#allocation7 + $0x944] ss:$16 sps:$4 sm:$0xff]   ;;  %v7881_v8 = vld [vmem:[#allocation7 + $0x54c] ss:$16 sps:$4 sm:$0xff]  }
 0x2e9   :  { %4810 = vmatprep.subr.bf16.mxu0 %v7809_v37  ;;  %v7876_v37 = vld [vmem:[#allocation7 + $0x940] ss:$16 sps:$4 sm:$0xff]  }
 0x2eb   :  { %4553 = vmatpush1.bf16.msra.mxu1 %v7804_v4  ;;  %v7879_v4 = vld [vmem:[#allocation7 + $0x548] ss:$16 sps:$4 sm:$0xff]  }
 0x2ec   :  { %4811 = vmatpush1.bf16.msra.mxu0 %v7807_v44  ;;  %4554 = vmatprep.subr.bf16.mxu1 %v7812_v6  ;;  %v7884_v44 = vld [vmem:[#allocation7 + $0x964] ss:$16 sps:$4 sm:$0xff]   ;;  %v7887_v6 = vld [vmem:[#allocation7 + $0x56c] ss:$16 sps:$4 sm:$0xff]  }
 0x2ed   :  { %4812 = vmatprep.subr.bf16.mxu0 %v7815_v39  ;;  %v7882_v39 = vld [vmem:[#allocation7 + $0x960] ss:$16 sps:$4 sm:$0xff]  }
 0x2ef   :  { %4555 = vmatpush1.bf16.msra.mxu1 %v7810_v42  ;;  %v7885_v42 = vld [vmem:[#allocation7 + $0x568] ss:$16 sps:$4 sm:$0xff]  }
 0x2f0   :  { %4813 = vmatpush1.bf16.msra.mxu0 %v7813_v19  ;;  %4567 = vmatprep.subr.bf16.mxu1 %v7818_v11  ;;  %v7890_v19 = vld [vmem:[#allocation7 + $0x984] ss:$16 sps:$4 sm:$0xff]   ;;  %v7893_v11 = vld [vmem:[#allocation7 + $0x58c] ss:$16 sps:$4 sm:$0xff]  }
 0x2f1   :  { %4825 = vmatprep.subr.bf16.mxu0 %v7821_v41  ;;  %v7888_v41 = vld [vmem:[#allocation7 + $0x980] ss:$16 sps:$4 sm:$0xff]  }
 0x2f2   :  { %4557 = vmatmul.mubr.bf16.vlgmr.msra.gmra.mrb[12].mxu1 %v9366_v53 }
 0x2f3   :  { %4815 = vmatmul.mubr.bf16.vlgmr.msra.gmra.mrb[28].mxu0 %v9411_v54  ;;  %4568 = vmatpush1.bf16.msra.mxu1 %v7816_v27  ;;  %v7839_v54 = vld [vmem:[#allocation7 + $0x46c] ss:$16 sps:$4 sm:$0xff]   ;;  %v7891_v27 = vld [vmem:[#allocation7 + $0x588] ss:$16 sps:$4 sm:$0xff]  }
 0x2f4   :  { %4599 = vmatprep.mubr.bf16.mxu1 %v9432_v55  ;;  %4826 = vmatpush1.bf16.msra.mxu0 %v7819_v35  ;;  %v7896_v35 = vld [vmem:[#allocation7 + $0x9a4] ss:$16 sps:$4 sm:$0xff]  }
 0x2f5   :  { %4857 = vmatprep.mubr.bf16.mxu0 %v9435_v22  ;;  %4569 = vmatprep.subr.bf16.mxu1 %v7824_v1  ;;  %v7840_v22 = vld [vmem:[#allocation7 + $0x880] ss:$16 sps:$4 sm:$0xff]   ;;  %v7899_v1 = vld [vmem:[#allocation7 + $0x5ac] ss:$16 sps:$4 sm:$0xff]  }
 0x2f6   :  { %4827 = vmatprep.subr.bf16.mxu0 %v7827_v25  ;;  %v7894_v25 = vld [vmem:[#allocation7 + $0x9a0] ss:$16 sps:$4 sm:$0xff]  }
 0x2f7   :  { %4570 = vmatpush1.bf16.msra.mxu1 %v7822_v36  ;;  %v7897_v36 = vld [vmem:[#allocation7 + $0x5a8] ss:$16 sps:$4 sm:$0xff]  }
 0x2f8   :  { %4828 = vmatpush1.bf16.msra.mxu0 %v7825_v23  ;;  %4571 = vmatprep.subr.bf16.mxu1 %v7830_v38  ;;  %v7902_v23 = vld [vmem:[#allocation7 + $0x9c4] ss:$16 sps:$4 sm:$0xff]   ;;  %v7905_v38 = vld [vmem:[#allocation7 + $0x5cc] ss:$16 sps:$4 sm:$0xff]  }
 0x2f9   :  { %4829 = vmatprep.subr.bf16.mxu0 %v7833_v40  ;;  %v7900_v40 = vld [vmem:[#allocation7 + $0x9c0] ss:$16 sps:$4 sm:$0xff]  }
 0x2fb   :  { %4572 = vmatpush1.bf16.msra.mxu1 %v7828_v26  ;;  %v7903_v26 = vld [vmem:[#allocation7 + $0x5c8] ss:$16 sps:$4 sm:$0xff]  }
 0x2fc   :  { %4830 = vmatpush1.bf16.msra.mxu0 %v7831_v5  ;;  %4573 = vmatprep.subr.bf16.mxu1 %v7836_v62  ;;  %v7908_v5 = vld [vmem:[#allocation7 + $0x9e4] ss:$16 sps:$4 sm:$0xff]   ;;  %v7911_v62 = vld [vmem:[#allocation7 + $0x5ec] ss:$16 sps:$4 sm:$0xff]  }
 0x2fd   :  { %4831 = vmatprep.subr.bf16.mxu0 %v7839_v54  ;;  %v7906_v54 = vld [vmem:[#allocation7 + $0x9e0] ss:$16 sps:$4 sm:$0xff]  }
 0x2ff   :  { %4574 = vmatpush1.bf16.msra.mxu1 %v7834_v10  ;;  %v7909_v10 = vld [vmem:[#allocation7 + $0x5e8] ss:$16 sps:$4 sm:$0xff]  }
 0x300   :  { %4832 = vmatpush1.bf16.msra.mxu0 %v7837_v17  ;;  %4575 = vmatprep.subr.bf16.mxu1 %v7842_v30  ;;  %v7914_v17 = vld [vmem:[#allocation7 + $0xa04] ss:$16 sps:$4 sm:$0xff]   ;;  %v7917_v30 = vld [vmem:[#allocation7 + $0x60c] ss:$16 sps:$4 sm:$0xff]  }
 0x301   :  { %4833 = vmatprep.subr.bf16.mxu0 %v7845_v15  ;;  %v7912_v15 = vld [vmem:[#allocation7 + $0xa00] ss:$16 sps:$4 sm:$0xff]  }
 0x303   :  { %4576 = vmatpush1.bf16.msra.mxu1 %v7840_v22  ;;  %v7915_v22 = vld [vmem:[#allocation7 + $0x608] ss:$16 sps:$4 sm:$0xff]  }
 0x304   :  { %4834 = vmatpush1.bf16.msra.mxu0 %v7843_v0  ;;  %4577 = vmatprep.subr.bf16.mxu1 %v7848_v14  ;;  %v7920_v0 = vld [vmem:[#allocation7 + $0xa24] ss:$16 sps:$4 sm:$0xff]   ;;  %v7923_v14 = vld [vmem:[#allocation7 + $0x62c] ss:$16 sps:$4 sm:$0xff]  }
 0x305   :  { %4835 = vmatprep.subr.bf16.mxu0 %v7851_v43  ;;  %v7918_v43 = vld [vmem:[#allocation7 + $0xa20] ss:$16 sps:$4 sm:$0xff]  }
 0x307   :  { %4578 = vmatpush1.bf16.msra.mxu1 %v7846_v21  ;;  %v7921_v21 = vld [vmem:[#allocation7 + $0x628] ss:$16 sps:$4 sm:$0xff]  }
 0x308   :  { %4836 = vmatpush1.bf16.msra.mxu0 %v7849_v58  ;;  %4579 = vmatprep.subr.bf16.mxu1 %v7854_v20  ;;  %v7926_v58 = vld [vmem:[#allocation7 + $0xa44] ss:$16 sps:$4 sm:$0xff]   ;;  %v7929_v20 = vld [vmem:[#allocation7 + $0x64c] ss:$16 sps:$4 sm:$0xff]  }
 0x309   :  { %4837 = vmatprep.subr.bf16.mxu0 %v7857_v12  ;;  %v7924_v12 = vld [vmem:[#allocation7 + $0xa40] ss:$16 sps:$4 sm:$0xff]  }
 0x30b   :  { %4580 = vmatpush1.bf16.msra.mxu1 %v7852_v45  ;;  %v7927_v45 = vld [vmem:[#allocation7 + $0x648] ss:$16 sps:$4 sm:$0xff]  }
 0x30c   :  { %4838 = vmatpush1.bf16.msra.mxu0 %v7855_v46  ;;  %4581 = vmatprep.subr.bf16.mxu1 %v7860_v52  ;;  %v7932_v46 = vld [vmem:[#allocation7 + $0xa64] ss:$16 sps:$4 sm:$0xff]   ;;  %v7930_v52 = vld [vmem:[#allocation7 + $0xa60] ss:$16 sps:$4 sm:$0xff]  }
 0x30d   :  { %4839 = vmatprep.subr.bf16.mxu0 %v7863_v56  ;;  %v7933_v56 = vld [vmem:[#allocation7 + $0x668] ss:$16 sps:$4 sm:$0xff]  }
 0x30f   :  { %4582 = vmatpush1.bf16.msra.mxu1 %v7858_v57  ;;  %v7938_v57 = vld [vmem:[#allocation7 + $0xa84] ss:$16 sps:$4 sm:$0xff]  }
 0x310   :  { %4840 = vmatpush1.bf16.msra.mxu0 %v7861_v49  ;;  %4583 = vmatprep.subr.bf16.mxu1 %v7866_v3  ;;  %v7941_v49 = vld [vmem:[#allocation7 + $0x68c] ss:$16 sps:$4 sm:$0xff]   ;;  %v7939_v3 = vld [vmem:[#allocation7 + $0x688] ss:$16 sps:$4 sm:$0xff]  }
 0x311   :  { %4841 = vmatprep.subr.bf16.mxu0 %v7869_v13  ;;  %v7944_v13 = vld [vmem:[#allocation7 + $0xaa4] ss:$16 sps:$4 sm:$0xff]  }
 0x313   :  { %4584 = vmatpush1.bf16.msra.mxu1 %v7864_v34  ;;  %v7947_v34 = vld [vmem:[#allocation7 + $0x6ac] ss:$16 sps:$4 sm:$0xff]  }
 0x314   :  { %4842 = vmatpush1.bf16.msra.mxu0 %v7867_v24  ;;  %4585 = vmatprep.subr.bf16.mxu1 %v7872_v18  ;;  %v7942_v24 = vld [vmem:[#allocation7 + $0xaa0] ss:$16 sps:$4 sm:$0xff]   ;;  %v7945_v18 = vld [vmem:[#allocation7 + $0x6a8] ss:$16 sps:$4 sm:$0xff]  }
 0x315   :  { %4843 = vmatprep.subr.bf16.mxu0 %v7875_v47  ;;  %v7950_v47 = vld [vmem:[#allocation7 + $0xac4] ss:$16 sps:$4 sm:$0xff]  }
 0x317   :  { %4586 = vmatpush1.bf16.msra.mxu1 %v7870_v7 }
 0x318   :  { %4844 = vmatpush1.bf16.msra.mxu0 %v7873_v2  ;;  %4587 = vmatprep.subr.bf16.mxu1 %v7878_v61  ;;  %v7953_v2 = vld [vmem:[#allocation7 + $0x6cc] ss:$16 sps:$4 sm:$0xff]  }
 0x319   :  { %4845 = vmatprep.subr.bf16.mxu0 %v7881_v8 }
 0x31b   :  { %4588 = vmatpush1.bf16.msra.mxu1 %v7876_v37  ;;  %v7948_v37 = vld [vmem:[#allocation7 + $0xac0] ss:$16 sps:$4 sm:$0xff]  }
 0x31c   :  { %4846 = vmatpush1.bf16.msra.mxu0 %v7879_v4  ;;  %4589 = vmatprep.subr.bf16.mxu1 %v7884_v44  ;;  %v7951_v44 = vld [vmem:[#allocation7 + $0x6c8] ss:$16 sps:$4 sm:$0xff]  }
 0x31d   :  { %4847 = vmatprep.subr.bf16.mxu0 %v7887_v6  ;;  %v7956_v6 = vld [vmem:[#allocation7 + $0xae4] ss:$16 sps:$4 sm:$0xff]  }
 0x31f   :  { %4590 = vmatpush1.bf16.msra.mxu1 %v7882_v39  ;;  %v7959_v39 = vld [vmem:[#allocation7 + $0x6ec] ss:$16 sps:$4 sm:$0xff]  }
 0x320   :  { %4848 = vmatpush1.bf16.msra.mxu0 %v7885_v42  ;;  %4591 = vmatprep.subr.bf16.mxu1 %v7890_v19  ;;  %v7954_v42 = vld [vmem:[#allocation7 + $0xae0] ss:$16 sps:$4 sm:$0xff]   ;;  %v7957_v19 = vld [vmem:[#allocation7 + $0x6e8] ss:$16 sps:$4 sm:$0xff]  }
 0x321   :  { %4849 = vmatprep.subr.bf16.mxu0 %v7893_v11  ;;  %v7962_v11 = vld [vmem:[#allocation7 + $0xb04] ss:$16 sps:$4 sm:$0xff]  }
 0x323   :  { %4592 = vmatpush1.bf16.msra.mxu1 %v7888_v41  ;;  %v7965_v41 = vld [vmem:[#allocation7 + $0x70c] ss:$16 sps:$4 sm:$0xff]  }
 0x324   :  { %4850 = vmatpush1.bf16.msra.mxu0 %v7891_v27  ;;  %4593 = vmatprep.subr.bf16.mxu1 %v7896_v35  ;;  %v7960_v27 = vld [vmem:[#allocation7 + $0xb00] ss:$16 sps:$4 sm:$0xff]   ;;  %v7963_v35 = vld [vmem:[#allocation7 + $0x708] ss:$16 sps:$4 sm:$0xff]  }
 0x325   :  { %4851 = vmatprep.subr.bf16.mxu0 %v7899_v1  ;;  %v7968_v1 = vld [vmem:[#allocation7 + $0xb24] ss:$16 sps:$4 sm:$0xff]  }
 0x327   :  { %4594 = vmatpush1.bf16.msra.mxu1 %v7894_v25  ;;  %v7971_v25 = vld [vmem:[#allocation7 + $0x72c] ss:$16 sps:$4 sm:$0xff]  }
 0x328   :  { %4852 = vmatpush1.bf16.msra.mxu0 %v7897_v36  ;;  %4595 = vmatprep.subr.bf16.mxu1 %v7902_v23  ;;  %v7966_v36 = vld [vmem:[#allocation7 + $0xb20] ss:$16 sps:$4 sm:$0xff]   ;;  %v7969_v23 = vld [vmem:[#allocation7 + $0x728] ss:$16 sps:$4 sm:$0xff]  }
 0x329   :  { %4853 = vmatprep.subr.bf16.mxu0 %v7905_v38  ;;  %v7974_v38 = vld [vmem:[#allocation7 + $0xb44] ss:$16 sps:$4 sm:$0xff]  }
 0x32b   :  { %4596 = vmatpush1.bf16.msra.mxu1 %v7900_v40  ;;  %v7977_v40 = vld [vmem:[#allocation7 + $0x74c] ss:$16 sps:$4 sm:$0xff]  }
 0x32c   :  { %4854 = vmatpush1.bf16.msra.mxu0 %v7903_v26  ;;  %4597 = vmatprep.subr.bf16.mxu1 %v7908_v5  ;;  %v7972_v26 = vld [vmem:[#allocation7 + $0xb40] ss:$16 sps:$4 sm:$0xff]   ;;  %v7975_v5 = vld [vmem:[#allocation7 + $0x748] ss:$16 sps:$4 sm:$0xff]  }
 0x32d   :  { %4855 = vmatprep.subr.bf16.mxu0 %v7911_v62  ;;  %v7980_v62 = vld [vmem:[#allocation7 + $0xb64] ss:$16 sps:$4 sm:$0xff]  }
 0x32f   :  { %4598 = vmatpush1.bf16.msra.mxu1 %v7906_v54  ;;  %v7983_v54 = vld [vmem:[#allocation7 + $0x76c] ss:$16 sps:$4 sm:$0xff]  }
 0x330   :  { %4856 = vmatpush1.bf16.msra.mxu0 %v7909_v10  ;;  %4610 = vmatprep.subr.bf16.mxu1 %v7914_v17  ;;  %v7978_v10 = vld [vmem:[#allocation7 + $0xb60] ss:$16 sps:$4 sm:$0xff]   ;;  %v7981_v17 = vld [vmem:[#allocation7 + $0x768] ss:$16 sps:$4 sm:$0xff]  }
 0x331   :  { %4868 = vmatprep.subr.bf16.mxu0 %v7917_v30  ;;  %v7986_v30 = vld [vmem:[#allocation7 + $0xb84] ss:$16 sps:$4 sm:$0xff]  }
 0x332   :  { %4600 = vmatmul.mubr.bf16.vlgmr.msra.gmra.mrb[12].mxu1 %v9457_v9 }
 0x333   :  { %4858 = vmatmul.mubr.bf16.vlgmr.msra.gmra.mrb[28].mxu0 %v9440_v50  ;;  %4611 = vmatpush1.bf16.msra.mxu1 %v7912_v15  ;;  %v7935_v50 = vld [vmem:[#allocation7 + $0x66c] ss:$16 sps:$4 sm:$0xff]  }
 0x334   :  { %4642 = vmatprep.mubr.bf16.mxu1 %v9461_v16  ;;  %4869 = vmatpush1.bf16.msra.mxu0 %v7915_v22  ;;  %v7989_v15 = vld [vmem:[#allocation7 + $0x78c] ss:$16 sps:$4 sm:$0xff]   ;;  %v7984_v22 = vld [vmem:[#allocation7 + $0xb80] ss:$16 sps:$4 sm:$0xff]  }
 0x335   :  { %4900 = vmatprep.mubr.bf16.mxu0 %v9442_v51  ;;  %4612 = vmatprep.subr.bf16.mxu1 %v7920_v0  ;;  %v7936_v51 = vld [vmem:[#allocation7 + $0xa80] ss:$16 sps:$4 sm:$0xff]   ;;  %v7987_v0 = vld [vmem:[#allocation7 + $0x788] ss:$16 sps:$4 sm:$0xff]  }
 0x336   :  { %4870 = vmatprep.subr.bf16.mxu0 %v7923_v14  ;;  %v7992_v14 = vld [vmem:[#allocation7 + $0xba4] ss:$16 sps:$4 sm:$0xff]  }
 0x337   :  { %4613 = vmatpush1.bf16.msra.mxu1 %v7918_v43  ;;  %v7995_v43 = vld [vmem:[#allocation7 + $0x7ac] ss:$16 sps:$4 sm:$0xff]  }
 0x338   :  { %4871 = vmatpush1.bf16.msra.mxu0 %v7921_v21  ;;  %4614 = vmatprep.subr.bf16.mxu1 %v7926_v58  ;;  %v7990_v21 = vld [vmem:[#allocation7 + $0xba0] ss:$16 sps:$4 sm:$0xff]   ;;  %v7993_v58 = vld [vmem:[#allocation7 + $0x7a8] ss:$16 sps:$4 sm:$0xff]  }
 0x339   :  { %4872 = vmatprep.subr.bf16.mxu0 %v7929_v20  ;;  %v7998_v20 = vld [vmem:[#allocation7 + $0xbc4] ss:$16 sps:$4 sm:$0xff]  }
 0x33b   :  { %4615 = vmatpush1.bf16.msra.mxu1 %v7924_v12  ;;  %v8001_v12 = vld [vmem:[#allocation7 + $0x7cc] ss:$16 sps:$4 sm:$0xff]  }
 0x33c   :  { %4873 = vmatpush1.bf16.msra.mxu0 %v7927_v45  ;;  %4616 = vmatprep.subr.bf16.mxu1 %v7932_v46  ;;  %v7996_v45 = vld [vmem:[#allocation7 + $0xbc0] ss:$16 sps:$4 sm:$0xff]   ;;  %v7999_v46 = vld [vmem:[#allocation7 + $0x7c8] ss:$16 sps:$4 sm:$0xff]  }
 0x33d   :  { %4874 = vmatprep.subr.bf16.mxu0 %v7935_v50  ;;  %v8004_v50 = vld [vmem:[#allocation7 + $0xbe4] ss:$16 sps:$4 sm:$0xff]  }
 0x33f   :  { %4617 = vmatpush1.bf16.msra.mxu1 %v7930_v52  ;;  %v8007_v52 = vld [vmem:[#allocation7 + $0x7ec] ss:$16 sps:$4 sm:$0xff]  }
 0x340   :  { %4875 = vmatpush1.bf16.msra.mxu0 %v7933_v56  ;;  %4618 = vmatprep.subr.bf16.mxu1 %v7938_v57  ;;  %v8002_v56 = vld [vmem:[#allocation7 + $0xbe0] ss:$16 sps:$4 sm:$0xff]   ;;  %v8005_v57 = vld [vmem:[#allocation7 + $0x7e8] ss:$16 sps:$4 sm:$0xff]  }
 0x341   :  { %4876 = vmatprep.subr.bf16.mxu0 %v7941_v49  ;;  %v8010_v49 = vld [vmem:[#allocation7 + $0xc04] ss:$16 sps:$4 sm:$0xff]  }
 0x343   :  { %4619 = vmatpush1.bf16.msra.mxu1 %v7936_v51  ;;  %v8013_v51 = vld [vmem:[#allocation7 + $0x80c] ss:$16 sps:$4 sm:$0xff]  }
 0x344   :  { %4877 = vmatpush1.bf16.msra.mxu0 %v7939_v3  ;;  %4620 = vmatprep.subr.bf16.mxu1 %v7944_v13  ;;  %v8008_v3 = vld [vmem:[#allocation7 + $0xc00] ss:$16 sps:$4 sm:$0xff]   ;;  %v8011_v13 = vld [vmem:[#allocation7 + $0x808] ss:$16 sps:$4 sm:$0xff]  }
 0x345   :  { %v9506_v7 = vpop.f32.mrb[24].mxu0  ;;  %4878 = vmatprep.subr.bf16.mxu0 %v7947_v34  ;;  %v8016_v34 = vld [vmem:[#allocation7 + $0xc24] ss:$16 sps:$4 sm:$0xff]  }
 0x346   :  { %v9508_v61 = vpop.f32.mrb[25].mxu0 }
 0x347   :  { %4621 = vmatpush1.bf16.msra.mxu1 %v7942_v24  ;;  %v9510_v8 = vpop.f32.mrb[26].mxu0  ;;  %v8019_v24 = vld [vmem:[#allocation7 + $0x82c] ss:$16 sps:$4 sm:$0xff]  }
 0x348   :  { %4879 = vmatpush1.bf16.msra.mxu0 %v7945_v18  ;;  %v9512_v4 = vpop.f32.mrb[27].mxu0  ;;  %4622 = vmatprep.subr.bf16.mxu1 %v7950_v47  ;;  %v8014_v18 = vld [vmem:[#allocation7 + $0xc20] ss:$16 sps:$4 sm:$0xff]   ;;  %v8017_v47 = vld [vmem:[#allocation7 + $0x828] ss:$16 sps:$4 sm:$0xff]  }
 0x349   :  { %4880 = vmatprep.subr.bf16.mxu0 %v7953_v2  ;;  %v8022_v2 = vld [vmem:[#allocation7 + $0xc44] ss:$16 sps:$4 sm:$0xff]  }
 0x34b   :  { %4623 = vmatpush1.bf16.msra.mxu1 %v7948_v37  ;;  %v8025_v37 = vld [vmem:[#allocation7 + $0x84c] ss:$16 sps:$4 sm:$0xff]  }
 0x34c   :  { %4881 = vmatpush1.bf16.msra.mxu0 %v7951_v44  ;;  %4624 = vmatprep.subr.bf16.mxu1 %v7956_v6  ;;  %v8020_v44 = vld [vmem:[#allocation7 + $0xc40] ss:$16 sps:$4 sm:$0xff]   ;;  %v8023_v6 = vld [vmem:[#allocation7 + $0x848] ss:$16 sps:$4 sm:$0xff]  }
 0x34d   :  { %4882 = vmatprep.subr.bf16.mxu0 %v7959_v39  ;;  %v8028_v39 = vld [vmem:[#allocation7 + $0xc64] ss:$16 sps:$4 sm:$0xff]  }
 0x34f   :  { %4625 = vmatpush1.bf16.msra.mxu1 %v7954_v42  ;;  %v8026_v42 = vld [vmem:[#allocation7 + $0xc60] ss:$16 sps:$4 sm:$0xff]  }
 0x350   :  { %4883 = vmatpush1.bf16.msra.mxu0 %v7957_v19  ;;  %4626 = vmatprep.subr.bf16.mxu1 %v7962_v11  ;;  %v8029_v19 = vld [vmem:[#allocation7 + $0x868] ss:$16 sps:$4 sm:$0xff]   ;;  %v8034_v11 = vld [vmem:[#allocation7 + $0xc84] ss:$16 sps:$4 sm:$0xff]  }
 0x351   :  { %4884 = vmatprep.subr.bf16.mxu0 %v7965_v41  ;;  %v8037_v41 = vld [vmem:[#allocation7 + $0x88c] ss:$16 sps:$4 sm:$0xff]  }
 0x353   :  { %4627 = vmatpush1.bf16.msra.mxu1 %v7960_v27  ;;  %v8035_v27 = vld [vmem:[#allocation7 + $0x888] ss:$16 sps:$4 sm:$0xff]  }
 0x354   :  { %4885 = vmatpush1.bf16.msra.mxu0 %v7963_v35  ;;  %4628 = vmatprep.subr.bf16.mxu1 %v7968_v1  ;;  %v8040_v35 = vld [vmem:[#allocation7 + $0xca4] ss:$16 sps:$4 sm:$0xff]   ;;  %v8043_v1 = vld [vmem:[#allocation7 + $0x8ac] ss:$16 sps:$4 sm:$0xff]  }
 0x355   :  { %4886 = vmatprep.subr.bf16.mxu0 %v7971_v25  ;;  %v8038_v25 = vld [vmem:[#allocation7 + $0xca0] ss:$16 sps:$4 sm:$0xff]  }
 0x357   :  { %4629 = vmatpush1.bf16.msra.mxu1 %v7966_v36  ;;  %v8041_v36 = vld [vmem:[#allocation7 + $0x8a8] ss:$16 sps:$4 sm:$0xff]  }
 0x358   :  { %4887 = vmatpush1.bf16.msra.mxu0 %v7969_v23  ;;  %4630 = vmatprep.subr.bf16.mxu1 %v7974_v38  ;;  %v8046_v23 = vld [vmem:[#allocation7 + $0xcc4] ss:$16 sps:$4 sm:$0xff]   ;;  %v8049_v38 = vld [vmem:[#allocation7 + $0x8cc] ss:$16 sps:$4 sm:$0xff]  }
 0x359   :  { %4888 = vmatprep.subr.bf16.mxu0 %v7977_v40  ;;  %v8044_v40 = vld [vmem:[#allocation7 + $0xcc0] ss:$16 sps:$4 sm:$0xff]  }
 0x35b   :  { %4631 = vmatpush1.bf16.msra.mxu1 %v7972_v26  ;;  %v8047_v26 = vld [vmem:[#allocation7 + $0x8c8] ss:$16 sps:$4 sm:$0xff]  }
 0x35c   :  { %4889 = vmatpush1.bf16.msra.mxu0 %v7975_v5  ;;  %4632 = vmatprep.subr.bf16.mxu1 %v7980_v62  ;;  %v8052_v5 = vld [vmem:[#allocation7 + $0xce4] ss:$16 sps:$4 sm:$0xff]   ;;  %v8055_v62 = vld [vmem:[#allocation7 + $0x8ec] ss:$16 sps:$4 sm:$0xff]  }
 0x35d   :  { %4890 = vmatprep.subr.bf16.mxu0 %v7983_v54  ;;  %v8050_v54 = vld [vmem:[#allocation7 + $0xce0] ss:$16 sps:$4 sm:$0xff]  }
 0x35f   :  { %4633 = vmatpush1.bf16.msra.mxu1 %v7978_v10  ;;  %v8053_v10 = vld [vmem:[#allocation7 + $0x8e8] ss:$16 sps:$4 sm:$0xff]  }
 0x360   :  { %4891 = vmatpush1.bf16.msra.mxu0 %v7981_v17  ;;  %4634 = vmatprep.subr.bf16.mxu1 %v7986_v30  ;;  %v8058_v17 = vld [vmem:[#allocation7 + $0xd04] ss:$16 sps:$4 sm:$0xff]   ;;  %v8061_v30 = vld [vmem:[#allocation7 + $0x90c] ss:$16 sps:$4 sm:$0xff]  }
 0x361   :  { %4892 = vmatprep.subr.bf16.mxu0 %v7989_v15  ;;  %v8056_v15 = vld [vmem:[#allocation7 + $0xd00] ss:$16 sps:$4 sm:$0xff]  }
 0x363   :  { %4635 = vmatpush1.bf16.msra.mxu1 %v7984_v22  ;;  %v8059_v22 = vld [vmem:[#allocation7 + $0x908] ss:$16 sps:$4 sm:$0xff]  }
 0x364   :  { %4893 = vmatpush1.bf16.msra.mxu0 %v7987_v0  ;;  %4636 = vmatprep.subr.bf16.mxu1 %v7992_v14  ;;  %v8064_v0 = vld [vmem:[#allocation7 + $0xd24] ss:$16 sps:$4 sm:$0xff]   ;;  %v8067_v14 = vld [vmem:[#allocation7 + $0x92c] ss:$16 sps:$4 sm:$0xff]  }
 0x365   :  { %4894 = vmatprep.subr.bf16.mxu0 %v7995_v43  ;;  %v8062_v43 = vld [vmem:[#allocation7 + $0xd20] ss:$16 sps:$4 sm:$0xff]  }
 0x367   :  { %4637 = vmatpush1.bf16.msra.mxu1 %v7990_v21  ;;  %v8065_v21 = vld [vmem:[#allocation7 + $0x928] ss:$16 sps:$4 sm:$0xff]  }
 0x368   :  { %4895 = vmatpush1.bf16.msra.mxu0 %v7993_v58  ;;  %4638 = vmatprep.subr.bf16.mxu1 %v7998_v20  ;;  %v8070_v58 = vld [vmem:[#allocation7 + $0xd44] ss:$16 sps:$4 sm:$0xff]   ;;  %v8073_v20 = vld [vmem:[#allocation7 + $0x94c] ss:$16 sps:$4 sm:$0xff]  }
 0x369   :  { %4896 = vmatprep.subr.bf16.mxu0 %v8001_v12  ;;  %v8068_v12 = vld [vmem:[#allocation7 + $0xd40] ss:$16 sps:$4 sm:$0xff]  }
 0x36b   :  { %4639 = vmatpush1.bf16.msra.mxu1 %v7996_v45  ;;  %v8071_v45 = vld [vmem:[#allocation7 + $0x948] ss:$16 sps:$4 sm:$0xff]  }
 0x36c   :  { %4897 = vmatpush1.bf16.msra.mxu0 %v7999_v46  ;;  %4640 = vmatprep.subr.bf16.mxu1 %v8004_v50  ;;  %v8076_v46 = vld [vmem:[#allocation7 + $0xd64] ss:$16 sps:$4 sm:$0xff]   ;;  %v8079_v50 = vld [vmem:[#allocation7 + $0x96c] ss:$16 sps:$4 sm:$0xff]  }
 0x36d   :  { %4898 = vmatprep.subr.bf16.mxu0 %v8007_v52  ;;  %v8074_v52 = vld [vmem:[#allocation7 + $0xd60] ss:$16 sps:$4 sm:$0xff]  }
 0x36f   :  { %4641 = vmatpush1.bf16.msra.mxu1 %v8002_v56  ;;  %v8077_v56 = vld [vmem:[#allocation7 + $0x968] ss:$16 sps:$4 sm:$0xff]  }
 0x370   :  { %4899 = vmatpush1.bf16.msra.mxu0 %v8005_v57  ;;  %4653 = vmatprep.subr.bf16.mxu1 %v8010_v49  ;;  %v8082_v57 = vld [vmem:[#allocation7 + $0xd84] ss:$16 sps:$4 sm:$0xff]   ;;  %v8085_v49 = vld [vmem:[#allocation7 + $0x98c] ss:$16 sps:$4 sm:$0xff]  }
 0x371   :  { %4911 = vmatprep.subr.bf16.mxu0 %v8013_v51  ;;  %v8080_v51 = vld [vmem:[#allocation7 + $0xd80] ss:$16 sps:$4 sm:$0xff]  }
 0x372   :  { %4643 = vmatmul.mubr.bf16.vlgmr.msra.gmra.mrb[12].mxu1 %v9485_v63 }
 0x373   :  { %4901 = vmatmul.mubr.bf16.vlgmr.msra.gmra.mrb[28].mxu0 %v9366_v53  ;;  %4654 = vmatpush1.bf16.msra.mxu1 %v8008_v3  ;;  %v8031_v53 = vld [vmem:[#allocation7 + $0x86c] ss:$16 sps:$4 sm:$0xff]   ;;  %v8083_v3 = vld [vmem:[#allocation7 + $0x988] ss:$16 sps:$4 sm:$0xff]  }
 0x374   :  { %4685 = vmatprep.mubr.bf16.mxu1 %v9480_v48  ;;  %4912 = vmatpush1.bf16.msra.mxu0 %v8011_v13  ;;  %v8088_v13 = vld [vmem:[#allocation7 + $0xda4] ss:$16 sps:$4 sm:$0xff]  }
 0x375   :  { %4943 = vmatprep.mubr.bf16.mxu0 %v9432_v55  ;;  %4655 = vmatprep.subr.bf16.mxu1 %v8016_v34  ;;  %v8032_v55 = vld [vmem:[#allocation7 + $0xc80] ss:$16 sps:$4 sm:$0xff]   ;;  %v8091_v34 = vld [vmem:[#allocation7 + $0x9ac] ss:$16 sps:$4 sm:$0xff]  }
 0x376   :  { %4913 = vmatprep.subr.bf16.mxu0 %v8019_v24  ;;  %v8086_v24 = vld [vmem:[#allocation7 + $0xda0] ss:$16 sps:$4 sm:$0xff]  }
 0x377   :  { %4656 = vmatpush1.bf16.msra.mxu1 %v8014_v18  ;;  %v8089_v18 = vld [vmem:[#allocation7 + $0x9a8] ss:$16 sps:$4 sm:$0xff]  }
 0x378   :  { %4914 = vmatpush1.bf16.msra.mxu0 %v8017_v47  ;;  %4657 = vmatprep.subr.bf16.mxu1 %v8022_v2  ;;  %v8094_v47 = vld [vmem:[#allocation7 + $0xdc4] ss:$16 sps:$4 sm:$0xff]   ;;  %v8097_v2 = vld [vmem:[#allocation7 + $0x9cc] ss:$16 sps:$4 sm:$0xff]  }
 0x379   :  { %4915 = vmatprep.subr.bf16.mxu0 %v8025_v37  ;;  %v8092_v37 = vld [vmem:[#allocation7 + $0xdc0] ss:$16 sps:$4 sm:$0xff]  }
 0x37b   :  { %4658 = vmatpush1.bf16.msra.mxu1 %v8020_v44  ;;  %v8095_v44 = vld [vmem:[#allocation7 + $0x9c8] ss:$16 sps:$4 sm:$0xff]  }
 0x37c   :  { %4916 = vmatpush1.bf16.msra.mxu0 %v8023_v6  ;;  %4659 = vmatprep.subr.bf16.mxu1 %v8028_v39  ;;  %v8100_v6 = vld [vmem:[#allocation7 + $0xde4] ss:$16 sps:$4 sm:$0xff]   ;;  %v8103_v39 = vld [vmem:[#allocation7 + $0x9ec] ss:$16 sps:$4 sm:$0xff]  }
 0x37d   :  { %4917 = vmatprep.subr.bf16.mxu0 %v8031_v53  ;;  %v8098_v53 = vld [vmem:[#allocation7 + $0xde0] ss:$16 sps:$4 sm:$0xff]  }
 0x37f   :  { %4660 = vmatpush1.bf16.msra.mxu1 %v8026_v42  ;;  %v8101_v42 = vld [vmem:[#allocation7 + $0x9e8] ss:$16 sps:$4 sm:$0xff]  }
 0x380   :  { %4918 = vmatpush1.bf16.msra.mxu0 %v8029_v19  ;;  %4661 = vmatprep.subr.bf16.mxu1 %v8034_v11  ;;  %v8106_v19 = vld [vmem:[#allocation7 + $0xe04] ss:$16 sps:$4 sm:$0xff]   ;;  %v8109_v11 = vld [vmem:[#allocation7 + $0xa0c] ss:$16 sps:$4 sm:$0xff]  }
 0x381   :  { %4919 = vmatprep.subr.bf16.mxu0 %v8037_v41  ;;  %v8104_v41 = vld [vmem:[#allocation7 + $0xe00] ss:$16 sps:$4 sm:$0xff]  }
 0x383   :  { %4662 = vmatpush1.bf16.msra.mxu1 %v8032_v55  ;;  %v8107_v55 = vld [vmem:[#allocation7 + $0xa08] ss:$16 sps:$4 sm:$0xff]  }
 0x384   :  { %4920 = vmatpush1.bf16.msra.mxu0 %v8035_v27  ;;  %4663 = vmatprep.subr.bf16.mxu1 %v8040_v35  ;;  %v8112_v27 = vld [vmem:[#allocation7 + $0xe24] ss:$16 sps:$4 sm:$0xff]   ;;  %v8115_v35 = vld [vmem:[#allocation7 + $0xa2c] ss:$16 sps:$4 sm:$0xff]  }
 0x385   :  { %4921 = vmatprep.subr.bf16.mxu0 %v8043_v1  ;;  %v8110_v1 = vld [vmem:[#allocation7 + $0xe20] ss:$16 sps:$4 sm:$0xff]  }
 0x387   :  { %4664 = vmatpush1.bf16.msra.mxu1 %v8038_v25  ;;  %v8113_v25 = vld [vmem:[#allocation7 + $0xa28] ss:$16 sps:$4 sm:$0xff]  }
 0x388   :  { %4922 = vmatpush1.bf16.msra.mxu0 %v8041_v36  ;;  %4665 = vmatprep.subr.bf16.mxu1 %v8046_v23  ;;  %v8118_v36 = vld [vmem:[#allocation7 + $0xe44] ss:$16 sps:$4 sm:$0xff]   ;;  %v8121_v23 = vld [vmem:[#allocation7 + $0xa4c] ss:$16 sps:$4 sm:$0xff]  }
 0x389   :  { %4923 = vmatprep.subr.bf16.mxu0 %v8049_v38  ;;  %v8787_v38 = vmov 0  }
 0x38b   :  { %4666 = vmatpush1.bf16.msra.mxu1 %v8044_v40  ;;  %v8116_v40 = vld [vmem:[#allocation7 + $0xe40] ss:$16 sps:$4 sm:$0xff]  }
 0x38c   :  { %4924 = vmatpush1.bf16.msra.mxu0 %v8047_v26  ;;  %4667 = vmatprep.subr.bf16.mxu1 %v8052_v5  ;;  %v8119_v26 = vld [vmem:[#allocation7 + $0xa48] ss:$16 sps:$4 sm:$0xff]   ;;  %v8124_v5 = vld [vmem:[#allocation7 + $0xe64] ss:$16 sps:$4 sm:$0xff]  }
 0x38d   :  { %4925 = vmatprep.subr.bf16.mxu0 %v8055_v62  ;;  %v8122_v62 = vld [vmem:[#allocation7 + $0xe60] ss:$16 sps:$4 sm:$0xff]  }
 0x38f   :  { %4668 = vmatpush1.bf16.msra.mxu1 %v8050_v54  ;;  %v8130_v54 = vld [vmem:[#allocation7 + $0xe84] ss:$16 sps:$4 sm:$0xff]  }
 0x390   :  { %4926 = vmatpush1.bf16.msra.mxu0 %v8053_v10  ;;  %4669 = vmatprep.subr.bf16.mxu1 %v8058_v17  ;;  %v8133_v10 = vld [vmem:[#allocation7 + $0xa8c] ss:$16 sps:$4 sm:$0xff]   ;;  %v8128_v17 = vld [vmem:[#allocation7 + $0xe80] ss:$16 sps:$4 sm:$0xff]  }
 0x391   :  { %4927 = vmatprep.subr.bf16.mxu0 %v8061_v30  ;;  %v8131_v30 = vld [vmem:[#allocation7 + $0xa88] ss:$16 sps:$4 sm:$0xff]  }
 0x393   :  { %4670 = vmatpush1.bf16.msra.mxu1 %v8056_v15  ;;  %v8136_v15 = vld [vmem:[#allocation7 + $0xea4] ss:$16 sps:$4 sm:$0xff]  }
 0x394   :  { %4928 = vmatpush1.bf16.msra.mxu0 %v8059_v22  ;;  %4671 = vmatprep.subr.bf16.mxu1 %v8064_v0  ;;  %v8139_v22 = vld [vmem:[#allocation7 + $0xaac] ss:$16 sps:$4 sm:$0xff]   ;;  %v8134_v0 = vld [vmem:[#allocation7 + $0xea0] ss:$16 sps:$4 sm:$0xff]  }
 0x395   :  { %4929 = vmatprep.subr.bf16.mxu0 %v8067_v14  ;;  %v8137_v14 = vld [vmem:[#allocation7 + $0xaa8] ss:$16 sps:$4 sm:$0xff]  }
 0x397   :  { %4672 = vmatpush1.bf16.msra.mxu1 %v8062_v43  ;;  %v8142_v43 = vld [vmem:[#allocation7 + $0xec4] ss:$16 sps:$4 sm:$0xff]  }
 0x398   :  { %4930 = vmatpush1.bf16.msra.mxu0 %v8065_v21  ;;  %4673 = vmatprep.subr.bf16.mxu1 %v8070_v58  ;;  %v8145_v21 = vld [vmem:[#allocation7 + $0xacc] ss:$16 sps:$4 sm:$0xff]   ;;  %v8140_v58 = vld [vmem:[#allocation7 + $0xec0] ss:$16 sps:$4 sm:$0xff]  }
 0x399   :  { %4931 = vmatprep.subr.bf16.mxu0 %v8073_v20  ;;  %v8143_v20 = vld [vmem:[#allocation7 + $0xac8] ss:$16 sps:$4 sm:$0xff]  }
 0x39b   :  { %4674 = vmatpush1.bf16.msra.mxu1 %v8068_v12  ;;  %v8148_v12 = vld [vmem:[#allocation7 + $0xee4] ss:$16 sps:$4 sm:$0xff]  }
 0x39c   :  { %4932 = vmatpush1.bf16.msra.mxu0 %v8071_v45  ;;  %4675 = vmatprep.subr.bf16.mxu1 %v8076_v46  ;;  %v8151_v45 = vld [vmem:[#allocation7 + $0xaec] ss:$16 sps:$4 sm:$0xff]   ;;  %v8146_v46 = vld [vmem:[#allocation7 + $0xee0] ss:$16 sps:$4 sm:$0xff]  }
 0x39d   :  { %4933 = vmatprep.subr.bf16.mxu0 %v8079_v50  ;;  %v8149_v50 = vld [vmem:[#allocation7 + $0xae8] ss:$16 sps:$4 sm:$0xff]  }
 0x39f   :  { %4676 = vmatpush1.bf16.msra.mxu1 %v8074_v52  ;;  %v8154_v52 = vld [vmem:[#allocation7 + $0xb0c] ss:$16 sps:$4 sm:$0xff]  }
 0x3a0   :  { %4934 = vmatpush1.bf16.msra.mxu0 %v8077_v56  ;;  %4677 = vmatprep.subr.bf16.mxu1 %v8082_v57  ;;  %v8152_v56 = vld [vmem:[#allocation7 + $0xb08] ss:$16 sps:$4 sm:$0xff]   ;;  %v8157_v57 = vld [vmem:[#allocation7 + $0xb2c] ss:$16 sps:$4 sm:$0xff]  }
 0x3a1   :  { %4935 = vmatprep.subr.bf16.mxu0 %v8085_v49  ;;  %v8155_v49 = vld [vmem:[#allocation7 + $0xb28] ss:$16 sps:$4 sm:$0xff]  }
 0x3a3   :  { %4678 = vmatpush1.bf16.msra.mxu1 %v8080_v51  ;;  %v8160_v51 = vld [vmem:[#allocation7 + $0xb4c] ss:$16 sps:$4 sm:$0xff]  }
 0x3a4   :  { %4936 = vmatpush1.bf16.msra.mxu0 %v8083_v3  ;;  %4679 = vmatprep.subr.bf16.mxu1 %v8088_v13  ;;  %v8158_v3 = vld [vmem:[#allocation7 + $0xb48] ss:$16 sps:$4 sm:$0xff]   ;;  %v8163_v13 = vld [vmem:[#allocation7 + $0xb6c] ss:$16 sps:$4 sm:$0xff]  }
 0x3a5   :  { %4937 = vmatprep.subr.bf16.mxu0 %v8091_v34  ;;  %v8161_v34 = vld [vmem:[#allocation7 + $0xb68] ss:$16 sps:$4 sm:$0xff]  }
 0x3a7   :  { %4680 = vmatpush1.bf16.msra.mxu1 %v8086_v24  ;;  %v8166_v24 = vld [vmem:[#allocation7 + $0xb8c] ss:$16 sps:$4 sm:$0xff]  }
 0x3a8   :  { %4938 = vmatpush1.bf16.msra.mxu0 %v8089_v18  ;;  %4681 = vmatprep.subr.bf16.mxu1 %v8094_v47  ;;  %v8164_v18 = vld [vmem:[#allocation7 + $0xb88] ss:$16 sps:$4 sm:$0xff]   ;;  %v8169_v47 = vld [vmem:[#allocation7 + $0xbac] ss:$16 sps:$4 sm:$0xff]  }
 0x3a9   :  { %4939 = vmatprep.subr.bf16.mxu0 %v8097_v2  ;;  %v8167_v2 = vld [vmem:[#allocation7 + $0xba8] ss:$16 sps:$4 sm:$0xff]  }
 0x3ab   :  { %4682 = vmatpush1.bf16.msra.mxu1 %v8092_v37  ;;  %v8172_v37 = vld [vmem:[#allocation7 + $0xbcc] ss:$16 sps:$4 sm:$0xff]  }
 0x3ac   :  { %4940 = vmatpush1.bf16.msra.mxu0 %v8095_v44  ;;  %4683 = vmatprep.subr.bf16.mxu1 %v8100_v6  ;;  %v8170_v44 = vld [vmem:[#allocation7 + $0xbc8] ss:$16 sps:$4 sm:$0xff]   ;;  %v8175_v6 = vld [vmem:[#allocation7 + $0xbec] ss:$16 sps:$4 sm:$0xff]  }
 0x3ad   :  { %4941 = vmatprep.subr.bf16.mxu0 %v8103_v39  ;;  %v8173_v39 = vld [vmem:[#allocation7 + $0xbe8] ss:$16 sps:$4 sm:$0xff]  }
 0x3af   :  { %4684 = vmatpush1.bf16.msra.mxu1 %v8098_v53  ;;  %v8178_v53 = vld [vmem:[#allocation7 + $0xc0c] ss:$16 sps:$4 sm:$0xff]  }
 0x3b0   :  { %4942 = vmatpush1.bf16.msra.mxu0 %v8101_v42  ;;  %4696 = vmatprep.subr.bf16.mxu1 %v8106_v19  ;;  %v8176_v42 = vld [vmem:[#allocation7 + $0xc08] ss:$16 sps:$4 sm:$0xff]   ;;  %v8181_v19 = vld [vmem:[#allocation7 + $0xc2c] ss:$16 sps:$4 sm:$0xff]  }
 0x3b1   :  { %4954 = vmatprep.subr.bf16.mxu0 %v8109_v11  ;;  %v8179_v11 = vld [vmem:[#allocation7 + $0xc28] ss:$16 sps:$4 sm:$0xff]  }
 0x3b2   :  { %4686 = vmatmul.mubr.bf16.vlgmr.msra.gmra.mrb[12].mxu1 %v9482_v60 }
 0x3b3   :  { %4944 = vmatmul.mubr.bf16.vlgmr.msra.gmra.mrb[28].mxu0 %v9457_v9  ;;  %4697 = vmatpush1.bf16.msra.mxu1 %v8104_v41  ;;  %v8127_v9 = vld [vmem:[#allocation7 + $0xa6c] ss:$16 sps:$4 sm:$0xff]  }
 0x3b4   :  { %4955 = vmatpush1.bf16.msra.mxu0 %v8107_v55  ;;  %4986 = vmatprep.mubr.bf16.mxu0 %v9461_v16  ;;  %v8125_v16 = vld [vmem:[#allocation7 + $0xa68] ss:$16 sps:$4 sm:$0xff]   ;;  %v8184_v41 = vld [vmem:[#allocation7 + $0xc4c] ss:$16 sps:$4 sm:$0xff]  }
 0x3b5   :  { %4698 = vmatprep.subr.bf16.mxu1 %v8112_v27  ;;  %4956 = vmatprep.subr.bf16.mxu0 %v8115_v35  ;;  %v8182_v55 = vld [vmem:[#allocation7 + $0xc48] ss:$16 sps:$4 sm:$0xff]   ;;  %v8187_v27 = vld [vmem:[#allocation7 + $0xc6c] ss:$16 sps:$4 sm:$0xff]  }
 0x3b6   :  { %4728 = vmatprep.mubr.bf16.mxu1 %v8787_v38  ;;  %v8185_v35 = vld [vmem:[#allocation7 + $0xc68] ss:$16 sps:$4 sm:$0xff]  }
 0x3b7   :  { %4699 = vmatpush1.bf16.msra.mxu1 %v8110_v1  ;;  %v8190_v1 = vld [vmem:[#allocation7 + $0xc8c] ss:$16 sps:$4 sm:$0xff]  }
 0x3b8   :  { %4957 = vmatpush1.bf16.msra.mxu0 %v8113_v25  ;;  %4700 = vmatprep.subr.bf16.mxu1 %v8118_v36  ;;  %v8188_v25 = vld [vmem:[#allocation7 + $0xc88] ss:$16 sps:$4 sm:$0xff]   ;;  %v8193_v36 = vld [vmem:[#allocation7 + $0xcac] ss:$16 sps:$4 sm:$0xff]  }
 0x3b9   :  { %4958 = vmatprep.subr.bf16.mxu0 %v8121_v23  ;;  %v8196_v23 = vld [vmem:[#allocation7 + $0xccc] ss:$16 sps:$4 sm:$0xff]  }
 0x3bb   :  { %4701 = vmatpush1.bf16.msra.mxu1 %v8116_v40  ;;  %v8199_v40 = vld [vmem:[#allocation7 + $0xcec] ss:$16 sps:$4 sm:$0xff]  }
 0x3bc   :  { %4959 = vmatpush1.bf16.msra.mxu0 %v8119_v26  ;;  %4702 = vmatprep.subr.bf16.mxu1 %v8124_v5  ;;  %v8197_v26 = vld [vmem:[#allocation7 + $0xce8] ss:$16 sps:$4 sm:$0xff]   ;;  %v8202_v5 = vld [vmem:[#allocation7 + $0xd0c] ss:$16 sps:$4 sm:$0xff]  }
 0x3bd   :  { %4960 = vmatprep.subr.bf16.mxu0 %v8127_v9  ;;  %v8200_v9 = vld [vmem:[#allocation7 + $0xd08] ss:$16 sps:$4 sm:$0xff]  }
 0x3bf   :  { %4703 = vmatpush1.bf16.msra.mxu1 %v8122_v62  ;;  %v8205_v62 = vld [vmem:[#allocation7 + $0xd2c] ss:$16 sps:$4 sm:$0xff]  }
 0x3c0   :  { %4961 = vmatpush1.bf16.msra.mxu0 %v8125_v16  ;;  %4704 = vmatprep.subr.bf16.mxu1 %v8130_v54  ;;  %v8203_v16 = vld [vmem:[#allocation7 + $0xd28] ss:$16 sps:$4 sm:$0xff]   ;;  %v8208_v54 = vld [vmem:[#allocation7 + $0xd4c] ss:$16 sps:$4 sm:$0xff]  }
 0x3c1   :  { %4962 = vmatprep.subr.bf16.mxu0 %v8133_v10  ;;  %v8206_v10 = vld [vmem:[#allocation7 + $0xd48] ss:$16 sps:$4 sm:$0xff]  }
 0x3c3   :  { %4705 = vmatpush1.bf16.msra.mxu1 %v8128_v17  ;;  %v8211_v17 = vld [vmem:[#allocation7 + $0xd6c] ss:$16 sps:$4 sm:$0xff]  }
 0x3c4   :  { %4963 = vmatpush1.bf16.msra.mxu0 %v8131_v30  ;;  %4706 = vmatprep.subr.bf16.mxu1 %v8136_v15  ;;  %v8209_v30 = vld [vmem:[#allocation7 + $0xd68] ss:$16 sps:$4 sm:$0xff]   ;;  %v8214_v15 = vld [vmem:[#allocation7 + $0xd8c] ss:$16 sps:$4 sm:$0xff]  }
 0x3c5   :  { %4964 = vmatprep.subr.bf16.mxu0 %v8139_v22  ;;  %v8212_v22 = vld [vmem:[#allocation7 + $0xd88] ss:$16 sps:$4 sm:$0xff]  }
 0x3c7   :  { %4707 = vmatpush1.bf16.msra.mxu1 %v8134_v0  ;;  %v8217_v0 = vld [vmem:[#allocation7 + $0xdac] ss:$16 sps:$4 sm:$0xff]  }
 0x3c8   :  { %4965 = vmatpush1.bf16.msra.mxu0 %v8137_v14  ;;  %4708 = vmatprep.subr.bf16.mxu1 %v8142_v43  ;;  %v8215_v14 = vld [vmem:[#allocation7 + $0xda8] ss:$16 sps:$4 sm:$0xff]   ;;  %v8220_v43 = vld [vmem:[#allocation7 + $0xdcc] ss:$16 sps:$4 sm:$0xff]  }
 0x3c9   :  { %4966 = vmatprep.subr.bf16.mxu0 %v8145_v21  ;;  %v8218_v21 = vld [vmem:[#allocation7 + $0xdc8] ss:$16 sps:$4 sm:$0xff]  }
 0x3cb   :  { %4709 = vmatpush1.bf16.msra.mxu1 %v8140_v58  ;;  %v8223_v58 = vld [vmem:[#allocation7 + $0xdec] ss:$16 sps:$4 sm:$0xff]  }
 0x3cc   :  { %4967 = vmatpush1.bf16.msra.mxu0 %v8143_v20  ;;  %4710 = vmatprep.subr.bf16.mxu1 %v8148_v12  ;;  %v8221_v20 = vld [vmem:[#allocation7 + $0xde8] ss:$16 sps:$4 sm:$0xff]   ;;  %v8226_v12 = vld [vmem:[#allocation7 + $0xe0c] ss:$16 sps:$4 sm:$0xff]  }
 0x3cd   :  { %4968 = vmatprep.subr.bf16.mxu0 %v8151_v45  ;;  %v8248_v45 = vld [vmem:[#allocation10] ss:$8 sps:$4 sm:$0xff]  }
 0x3cf   :  { %4711 = vmatpush1.bf16.msra.mxu1 %v8146_v46  ;;  %v8250_v46 = vld [vmem:[#allocation10 + $0x4] ss:$8 sps:$4 sm:$0xff]  }
 0x3d0   :  { %4969 = vmatpush1.bf16.msra.mxu0 %v8149_v50  ;;  %v8224_v50 = vld [vmem:[#allocation7 + $0xe08] ss:$16 sps:$4 sm:$0xff]   ;;  %5948 = vmatprep.subr.bf16.mxu1 %v8250_v46 }
 0x3d1   :  { %4970 = vmatprep.subr.bf16.mxu0 %v8154_v52  ;;  %v8253_v52 = vld [vmem:[#allocation10 + $0x14] ss:$8 sps:$4 sm:$0xff]  }
 0x3d2   :  { %4729 = vmatmul.mubr.bf16.vlgmr.msra.gmra.mrb[12].mxu1 %v9492_v59  ;;  %v8289_v46 = vld [vmem:[#allocation10 + $0xd4] ss:$8 sps:$4 sm:$0xff]  }
 0x3d3   :  { %5949 = vmatpush1.bf16.msra.mxu1 %v8248_v45  ;;  %v8286_v45 = vld [vmem:[#allocation10 + $0xc4] ss:$8 sps:$4 sm:$0xff]  }
 0x3d4   :  { %4971 = vmatpush1.bf16.msra.mxu0 %v8152_v56  ;;  %v8229_v56 = vld [vmem:[#allocation7 + $0xe2c] ss:$16 sps:$4 sm:$0xff]   ;;  %5950 = vmatprep.subr.bf16.mxu1 %v8253_v52 }
 0x3d5   :  { %4972 = vmatprep.subr.bf16.mxu0 %v8157_v57  ;;  %v8251_v57 = vld [vmem:[#allocation10 + $0x10] ss:$8 sps:$4 sm:$0xff]  }
 0x3d6   :  { %v8293_v52 = vld [vmem:[#allocation10 + $0xf0] ss:$8 sps:$4 sm:$0xff]  }
 0x3d7   :  { %5951 = vmatpush1.bf16.msra.mxu1 %v8251_v57 }
 0x3d8   :  { %4973 = vmatpush1.bf16.msra.mxu0 %v8155_v49  ;;  %v8256_v49 = vld [vmem:[#allocation10 + $0x24] ss:$8 sps:$4 sm:$0xff]  }
 0x3d9   :  { %4974 = vmatprep.subr.bf16.mxu0 %v8160_v51  ;;  %v8227_v51 = vld [vmem:[#allocation7 + $0xe28] ss:$16 sps:$4 sm:$0xff]   ;;  %5952 = vmatprep.subr.bf16.mxu1 %v8256_v49 }
 0x3dc   :  { %4975 = vmatpush1.bf16.msra.mxu0 %v8158_v3  ;;  %v8232_v3 = vld [vmem:[#allocation7 + $0xe4c] ss:$16 sps:$4 sm:$0xff]  }
 0x3dd   :  { %4976 = vmatprep.subr.bf16.mxu0 %v8163_v13  ;;  %v8254_v13 = vld [vmem:[#allocation10 + $0x20] ss:$8 sps:$4 sm:$0xff]  }
 0x3de   :  { %5953 = vmatpush1.bf16.msra.mxu1 %v8254_v13 }
 0x3e0   :  { %4977 = vmatpush1.bf16.msra.mxu0 %v8161_v34  ;;  %v8259_v34 = vld [vmem:[#allocation10 + $0x34] ss:$8 sps:$4 sm:$0xff]  }
 0x3e1   :  { %4978 = vmatprep.subr.bf16.mxu0 %v8166_v24  ;;  %v8230_v24 = vld [vmem:[#allocation7 + $0xe48] ss:$16 sps:$4 sm:$0xff]   ;;  %5954 = vmatprep.subr.bf16.mxu1 %v8259_v34 }
 0x3e4   :  { %4979 = vmatpush1.bf16.msra.mxu0 %v8164_v18  ;;  %v8235_v18 = vld [vmem:[#allocation7 + $0xe6c] ss:$16 sps:$4 sm:$0xff]  }
 0x3e5   :  { %4980 = vmatprep.subr.bf16.mxu0 %v8169_v47  ;;  %v8257_v47 = vld [vmem:[#allocation10 + $0x30] ss:$8 sps:$4 sm:$0xff]  }
 0x3e6   :  { %5955 = vmatpush1.bf16.msra.mxu1 %v8257_v47 }
 0x3e8   :  { %4981 = vmatpush1.bf16.msra.mxu0 %v8167_v2  ;;  %v8233_v2 = vld [vmem:[#allocation7 + $0xe68] ss:$16 sps:$4 sm:$0xff]  }
 0x3e9   :  { %4982 = vmatprep.subr.bf16.mxu0 %v8172_v37  ;;  %v8238_v37 = vld [vmem:[#allocation7 + $0xe8c] ss:$16 sps:$4 sm:$0xff]  }
 0x3ec   :  { %4983 = vmatpush1.bf16.msra.mxu0 %v8170_v44  ;;  %v8265_v44 = vld [vmem:[#allocation10 + $0x54] ss:$8 sps:$4 sm:$0xff]  }
 0x3ed   :  { %4984 = vmatprep.subr.bf16.mxu0 %v8175_v6  ;;  %v8236_v6 = vld [vmem:[#allocation7 + $0xe88] ss:$16 sps:$4 sm:$0xff]  }
 0x3f0   :  { %4985 = vmatpush1.bf16.msra.mxu0 %v8173_v39  ;;  %v8241_v39 = vld [vmem:[#allocation7 + $0xeac] ss:$16 sps:$4 sm:$0xff]  }
 0x3f1   :  { %4997 = vmatprep.subr.bf16.mxu0 %v8178_v53  ;;  %v8263_v53 = vld [vmem:[#allocation10 + $0x50] ss:$8 sps:$4 sm:$0xff]  }
 0x3f3   :  { %4987 = vmatmul.mubr.bf16.vlgmr.msra.gmra.mrb[28].mxu0 %v9485_v63  ;;  %v8191_v63 = vld [vmem:[#allocation7 + $0xca8] ss:$16 sps:$4 sm:$0xff]  }
 0x3f4   :  { %4998 = vmatpush1.bf16.msra.mxu0 %v8176_v42  ;;  %5029 = vmatprep.mubr.bf16.mxu0 %v9480_v48  ;;  %v8194_v48 = vld [vmem:[#allocation7 + $0xcc8] ss:$16 sps:$4 sm:$0xff]  }
 0x3f5   :  { %4999 = vmatprep.subr.bf16.mxu0 %v8181_v19  ;;  %v8268_v42 = vld [vmem:[#allocation10 + $0x64] ss:$8 sps:$4 sm:$0xff]  }
 0x3f6   :  { %v8239_v19 = vld [vmem:[#allocation7 + $0xea8] ss:$16 sps:$4 sm:$0xff]  }
 0x3f8   :  { %5000 = vmatpush1.bf16.msra.mxu0 %v8179_v11  ;;  %v8244_v11 = vld [vmem:[#allocation7 + $0xecc] ss:$16 sps:$4 sm:$0xff]  }
 0x3f9   :  { %5001 = vmatprep.subr.bf16.mxu0 %v8184_v41  ;;  %v8266_v41 = vld [vmem:[#allocation10 + $0x60] ss:$8 sps:$4 sm:$0xff]  }
 0x3fc   :  { %5002 = vmatpush1.bf16.msra.mxu0 %v8182_v55  ;;  %v8271_v55 = vld [vmem:[#allocation10 + $0x74] ss:$8 sps:$4 sm:$0xff]  }
 0x3fd   :  { %5003 = vmatprep.subr.bf16.mxu0 %v8187_v27  ;;  %v8242_v27 = vld [vmem:[#allocation7 + $0xec8] ss:$16 sps:$4 sm:$0xff]  }
 0x400   :  { %5004 = vmatpush1.bf16.msra.mxu0 %v8185_v35  ;;  %v8247_v35 = vld [vmem:[#allocation7 + $0xeec] ss:$16 sps:$4 sm:$0xff]  }
 0x401   :  { %5005 = vmatprep.subr.bf16.mxu0 %v8190_v1  ;;  %v8269_v1 = vld [vmem:[#allocation10 + $0x70] ss:$8 sps:$4 sm:$0xff]  }
 0x404   :  { %5006 = vmatpush1.bf16.msra.mxu0 %v8188_v25  ;;  %v8274_v25 = vld [vmem:[#allocation10 + $0x84] ss:$8 sps:$4 sm:$0xff]  }
 0x405   :  { %5007 = vmatprep.subr.bf16.mxu0 %v8193_v36  ;;  %v8245_v36 = vld [vmem:[#allocation7 + $0xee8] ss:$16 sps:$4 sm:$0xff]  }
 0x408   :  { %5008 = vmatpush1.bf16.msra.mxu0 %v8191_v63  ;;  %v8272_v63 = vld [vmem:[#allocation10 + $0x80] ss:$8 sps:$4 sm:$0xff]  }
 0x409   :  { %5009 = vmatprep.subr.bf16.mxu0 %v8196_v23  ;;  %v8277_v23 = vld [vmem:[#allocation10 + $0x94] ss:$8 sps:$4 sm:$0xff]  }
 0x40c   :  { %5010 = vmatpush1.bf16.msra.mxu0 %v8194_v48  ;;  %v8275_v48 = vld [vmem:[#allocation10 + $0x90] ss:$8 sps:$4 sm:$0xff]  }
 0x40d   :  { %5011 = vmatprep.subr.bf16.mxu0 %v8199_v40  ;;  %v8280_v40 = vld [vmem:[#allocation10 + $0xa4] ss:$8 sps:$4 sm:$0xff]  }
 0x410   :  { %5012 = vmatpush1.bf16.msra.mxu0 %v8197_v26  ;;  %v8278_v26 = vld [vmem:[#allocation10 + $0xa0] ss:$8 sps:$4 sm:$0xff]  }
 0x411   :  { %5013 = vmatprep.subr.bf16.mxu0 %v8202_v5  ;;  %v8283_v5 = vld [vmem:[#allocation10 + $0xb4] ss:$8 sps:$4 sm:$0xff]  }
 0x414   :  { %5014 = vmatpush1.bf16.msra.mxu0 %v8200_v9  ;;  %v8281_v9 = vld [vmem:[#allocation10 + $0xb0] ss:$8 sps:$4 sm:$0xff]  }
 0x415   :  { %5015 = vmatprep.subr.bf16.mxu0 %v8205_v62  ;;  %v1943_v62 = vld [vmem:[#allocation8] sm:$0xf] }
 0x416   :  { %v1960_v57 = vrot.slane %v1943_v62, %v529_v33 }
 0x418   :  { %5016 = vmatpush1.bf16.msra.mxu0 %v8203_v16  ;;  %v1948_v16 = vrot.slane %v1943_v62, %v9177_v29 }
 0x419   :  { %5017 = vmatprep.subr.bf16.mxu0 %v8208_v54  ;;  %v1952_v54 = vrot.slane %v1943_v62, %v9183_v32 }
 0x41c   :  { %5018 = vmatpush1.bf16.msra.mxu0 %v8206_v10  ;;  %v4430_v10 = vadd.f32 %v9506_v7, %v1948_v16  ;;  %v8287_v7 = vld [vmem:[#allocation10 + $0xd0] ss:$8 sps:$4 sm:$0xff]  }
 0x41d   :  { %5019 = vmatprep.subr.bf16.mxu0 %v8211_v17  ;;  %v4432_v17 = vadd.f32 %v9508_v61, %v1952_v54  ;;  %v8292_v61 = vld [vmem:[#allocation10 + $0xe4] ss:$8 sps:$4 sm:$0xff]  }
 0x420   :  { %5020 = vmatpush1.bf16.msra.mxu0 %v8209_v30  ;;  %v4434_v30 = vadd.f32 %v9510_v8, %v1948_v16  ;;  %v8295_v8 = vld [vmem:[#allocation10 + $0xf4] ss:$8 sps:$4 sm:$0xff]  }
 0x421   :  { %5021 = vmatprep.subr.bf16.mxu0 %v8214_v15 }
 0x424   :  { %5022 = vmatpush1.bf16.msra.mxu0 %v8212_v22 }
 0x425   :  { %5023 = vmatprep.subr.bf16.mxu0 %v8217_v0  ;;  %v4436_v0 = vadd.f32 %v9512_v4, %v1952_v54  ;;  %v8298_v4 = vld [vmem:[#allocation10 + $0x104] ss:$8 sps:$4 sm:$0xff]  }
 0x428   :  { %5024 = vmatpush1.bf16.msra.mxu0 %v8215_v14 }
 0x429   :  { %5025 = vmatprep.subr.bf16.mxu0 %v8220_v43 }
 0x42c   :  { %5026 = vmatpush1.bf16.msra.mxu0 %v8218_v21 }
 0x42d   :  { %5027 = vmatprep.subr.bf16.mxu0 %v8223_v58 }
 0x430   :  { %5028 = vmatpush1.bf16.msra.mxu0 %v8221_v20 }
 0x431   :  { %5040 = vmatprep.subr.bf16.mxu0 %v8226_v12  ;;  %v8284_v12 = vld [vmem:[#allocation10 + $0xc0] ss:$8 sps:$4 sm:$0xff]  }
 0x433   :  { %5030 = vmatmul.mubr.bf16.vlgmr.msra.gmra.mrb[28].mxu0 %v9482_v60  ;;  %v8262_v60 = vld [vmem:[#allocation10 + $0x44] ss:$8 sps:$4 sm:$0xff]  }
 0x434   :  { %5041 = vmatpush1.bf16.msra.mxu0 %v8224_v50  ;;  %5072 = vmatprep.mubr.bf16.mxu0 %v8787_v38  ;;  %v8260_v38 = vld [vmem:[#allocation10 + $0x40] ss:$8 sps:$4 sm:$0xff]  }
 0x435   :  { %5042 = vmatprep.subr.bf16.mxu0 %v8229_v56  ;;  %5956 = vmatprep.subr.bf16.mxu1 %v8262_v60  ;;  %v8290_v50 = vld [vmem:[#allocation10 + $0xe0] ss:$8 sps:$4 sm:$0xff]   ;;  %v1956_v56 = vrot.slane %v1943_v62, %v525_v31 }
 0x436   :  { %5957 = vmatpush1.bf16.msra.mxu1 %v8260_v38 }
 0x437   :  { %5958 = vmatprep.subr.bf16.mxu1 %v8265_v44 }
 0x438   :  { %5043 = vmatpush1.bf16.msra.mxu0 %v8227_v51 }
 0x439   :  { %5044 = vmatprep.subr.bf16.mxu0 %v8232_v3 }
 0x43a   :  { %5959 = vmatpush1.bf16.msra.mxu1 %v8263_v53 }
 0x43b   :  { %5960 = vmatprep.subr.bf16.mxu1 %v8268_v42 }
 0x43c   :  { %5045 = vmatpush1.bf16.msra.mxu0 %v8230_v24 }
 0x43d   :  { %5046 = vmatprep.subr.bf16.mxu0 %v8235_v18 }
 0x43e   :  { %5961 = vmatpush1.bf16.msra.mxu1 %v8266_v41 }
 0x43f   :  { %5962 = vmatprep.subr.bf16.mxu1 %v8271_v55 }
 0x440   :  { %5047 = vmatpush1.bf16.msra.mxu0 %v8233_v2 }
 0x441   :  { %5048 = vmatprep.subr.bf16.mxu0 %v8238_v37 }
 0x442   :  { %5963 = vmatpush1.bf16.msra.mxu1 %v8269_v1 }
 0x443   :  { %5964 = vmatprep.subr.bf16.mxu1 %v8274_v25 }
 0x444   :  { %5049 = vmatpush1.bf16.msra.mxu0 %v8236_v6 }
 0x445   :  { %5050 = vmatprep.subr.bf16.mxu0 %v8241_v39 }
 0x446   :  { %5965 = vmatpush1.bf16.msra.mxu1 %v8272_v63 }
 0x447   :  { %5966 = vmatprep.subr.bf16.mxu1 %v8277_v23 }
 0x448   :  { %5051 = vmatpush1.bf16.msra.mxu0 %v8239_v19 }
 0x449   :  { %5052 = vmatprep.subr.bf16.mxu0 %v8244_v11 }
 0x44a   :  { %5967 = vmatpush1.bf16.msra.mxu1 %v8275_v48 }
 0x44b   :  { %5968 = vmatprep.subr.bf16.mxu1 %v8280_v40 }
 0x44c   :  { %5053 = vmatpush1.bf16.msra.mxu0 %v8242_v27 }
 0x44d   :  { %5054 = vmatprep.subr.bf16.mxu0 %v8247_v35 }
 0x44e   :  { %5969 = vmatpush1.bf16.msra.mxu1 %v8278_v26 }
 0x44f   :  { %5970 = vmatprep.subr.bf16.mxu1 %v8283_v5 }
 0x450   :  { %5055 = vmatpush1.bf16.msra.mxu0 %v8245_v36 }
 0x452   :  { %5971 = vmatpush1.bf16.msra.mxu1 %v8281_v9 }
 0x453   :  { %5073 = vmatmul.mubr.bf16.vlgmr.msra.gmra.mrb[28].mxu0 %v9492_v59  ;;  %5972 = vmatprep.subr.bf16.mxu1 %v8286_v45 }
 0x456   :  { %5973 = vmatpush1.bf16.msra.mxu1 %v8284_v12 }
 0x457   :  { %5974 = vmatprep.subr.bf16.mxu1 %v8289_v46  ;;  %v8296_v46 = vld [vmem:[#allocation10 + $0x100] ss:$8 sps:$4 sm:$0xff]  }
 0x45a   :  { %5975 = vmatpush1.bf16.msra.mxu1 %v8287_v7 }
 0x45b   :  { %5976 = vmatprep.subr.bf16.mxu1 %v8292_v61 }
 0x45e   :  { %5977 = vmatpush1.bf16.msra.mxu1 %v8290_v50 }
 0x45f   :  { %5978 = vmatprep.subr.bf16.mxu1 %v8295_v8 }
 0x462   :  { %5979 = vmatpush1.bf16.msra.mxu1 %v8293_v52  ;;  %v8301_v52 = vld [vmem:[#allocation10 + $0x114] ss:$8 sps:$4 sm:$0xff]  }
 0x463   :  { %5989 = vmatprep.subr.bf16.mxu1 %v8298_v4 }
 0x4a5   :  { %v4730_v59 = vpop.f32.mrb[12].mxu1 }
 0x4a6   :  { %v7338_v15 = vadd.f32 %v4730_v59, %v4430_v10  ;;  %v4732_v22 = vpop.f32.mrb[13].mxu1 }
 0x4a7   :  { %v7340_v14 = vadd.f32 %v4732_v22, %v4432_v17  ;;  %v4734_v43 = vpop.f32.mrb[14].mxu1 }
 0x4a8   :  { %v7342_v21 = vadd.f32 %v4734_v43, %v4434_v30  ;;  %v4736_v58 = vpop.f32.mrb[15].mxu1  ;;  %v5083_v49 = vmax.f32 %v7338_v15, 0.0 }
 0x4a9   :  { %v7344_v20 = vadd.f32 %v4736_v58, %v4436_v0  ;;  %v5084_v51 = vmax.f32 %v7340_v14, 0.0 }
 0x4aa   :  { %v5087_v13 = vmax.f32 %v7342_v21, 0.0  ;;  %v5099_v2 = vrot.slane %v5083_v49, 4 }
 0x4ab   :  { %v5088_v18 = vmax.f32 %v7344_v20, 0.0  ;;  %v5100_v6 = vrot.slane %v5084_v51, 4 }
 0x4ac   :  { %v5103_v31 = vrot.slane %v5087_v13, 4  ;;  %v5115_v41 = vmax.f32 %v5083_v49, %v5099_v2  ;;  %v8304_v49 = vld [vmem:[#allocation10 + $0x124] ss:$8 sps:$4 sm:$0xff]   ;;  %v8314_v2 = vld [vmem:[#allocation10 + $0x160] ss:$8 sps:$4 sm:$0xff]  }
 0x4ad   :  { %v5104_v33 = vrot.slane %v5088_v18, 4  ;;  %v5116_v35 = vmax.f32 %v5084_v51, %v5100_v6  ;;  %v8302_v51 = vld [vmem:[#allocation10 + $0x120] ss:$8 sps:$4 sm:$0xff]  }
 0x4ae   :  { %v5119_v36 = vmax.f32 %v5087_v13, %v5103_v31  ;;  %v8305_v13 = vld [vmem:[#allocation10 + $0x130] ss:$8 sps:$4 sm:$0xff]   ;;  %v8320_v6 = vld [vmem:[#allocation10 + $0x180] ss:$8 sps:$4 sm:$0xff]   ;;  %v8328_v31 = vld [vmem:[#allocation10 + $0x1a4] ss:$8 sps:$4 sm:$0xff]  }
 0x4af   :  { %v5120_v48 = vmax.f32 %v5088_v18, %v5104_v33  ;;  %v8313_v18 = vld [vmem:[#allocation10 + $0x154] ss:$8 sps:$4 sm:$0xff]   ;;  %v8329_v33 = vld [vmem:[#allocation10 + $0x1b0] ss:$8 sps:$4 sm:$0xff]  }
 0x526   :  { %v5074_v3 = vpop.f32.mrb[28].mxu0 }
 0x527   :  { %v7345_v34 = vadd.f32 %v5074_v3, %v1956_v56  ;;  %v5076_v24 = vpop.f32.mrb[29].mxu0  ;;  %v8307_v3 = vld [vmem:[#allocation10 + $0x134] ss:$8 sps:$4 sm:$0xff]  }
 0x528   :  { %v7346_v47 = vadd.f32 %v5076_v24, %v1960_v57  ;;  %v5078_v60 = vpop.f32.mrb[30].mxu0  ;;  %v8308_v24 = vld [vmem:[#allocation10 + $0x140] ss:$8 sps:$4 sm:$0xff]  }
 0x529   :  { %v5085_v37 = vmax.f32 %v7345_v34, 0.0  ;;  %v7347_v38 = vadd.f32 %v5078_v60, %v1956_v56  ;;  %v5080_v44 = vpop.f32.mrb[31].mxu0  ;;  %v8310_v34 = vld [vmem:[#allocation10 + $0x144] ss:$8 sps:$4 sm:$0xff]  }
 0x52a   :  { %v5086_v39 = vmax.f32 %v7346_v47, 0.0  ;;  %v7348_v53 = vadd.f32 %v5080_v44, %v1960_v57  ;;  %v8299_v57 = vld [vmem:[#allocation10 + $0x110] ss:$8 sps:$4 sm:$0xff]   ;;  %v8316_v60 = vld [vmem:[#allocation10 + $0x164] ss:$8 sps:$4 sm:$0xff]  }
 0x52b   :  { %v5101_v42 = vrot.slane %v5085_v37, 4  ;;  %v5089_v28 = vmax.f32 %v7347_v38, 0.0  ;;  %v8311_v47 = vld [vmem:[#allocation10 + $0x150] ss:$8 sps:$4 sm:$0xff]   ;;  %v8322_v44 = vld [vmem:[#allocation10 + $0x184] ss:$8 sps:$4 sm:$0xff]  }
 0x52c   :  { %v5102_v19 = vrot.slane %v5086_v39, 4  ;;  %v5090_v11 = vmax.f32 %v7348_v53, 0.0  ;;  %v8317_v38 = vld [vmem:[#allocation10 + $0x170] ss:$8 sps:$4 sm:$0xff]  }
 0x52d   :  { %v5117_v55 = vmax.f32 %v5085_v37, %v5101_v42  ;;  %v5105_v27 = vrot.slane %v5089_v28, 4  ;;  %v8319_v37 = vld [vmem:[#allocation10 + $0x174] ss:$8 sps:$4 sm:$0xff]   ;;  %v8323_v53 = vld [vmem:[#allocation10 + $0x190] ss:$8 sps:$4 sm:$0xff]  }
 0x52e   :  { %v5118_v1 = vmax.f32 %v5086_v39, %v5102_v19  ;;  %v5106_v25 = vrot.slane %v5090_v11, 4  ;;  %v8325_v39 = vld [vmem:[#allocation10 + $0x194] ss:$8 sps:$4 sm:$0xff]   ;;  %v8326_v42 = vld [vmem:[#allocation10 + $0x1a0] ss:$8 sps:$4 sm:$0xff]  }
 0x52f   :  { %v5123_v63 = vmax.f32 %v5115_v41, %v5117_v55  ;;  %v5121_v23 = vmax.f32 %v5089_v28, %v5105_v27  ;;  %v8331_v28 = vld [vmem:[#allocation10 + $0x1b4] ss:$8 sps:$4 sm:$0xff]   ;;  %v8334_v19 = vld [vmem:[#allocation10 + $0x1c4] ss:$8 sps:$4 sm:$0xff]   ;;  %v8335_v55 = vld [vmem:[#allocation10 + $0x1d0] ss:$8 sps:$4 sm:$0xff]  }
 0x530   :  { %v5124_v40 = vmax.f32 %v5116_v35, %v5118_v1  ;;  %v5122_v26 = vmax.f32 %v5090_v11, %v5106_v25  ;;  %v8332_v11 = vld [vmem:[#allocation10 + $0x1c0] ss:$8 sps:$4 sm:$0xff]   ;;  %v8337_v41 = vld [vmem:[#allocation10 + $0x1d4] ss:$8 sps:$4 sm:$0xff]   ;;  %v8340_v27 = vld [vmem:[#allocation10 + $0x1e4] ss:$8 sps:$4 sm:$0xff]  }
 0x531   :  { %v5125_v5 = vmax.f32 %v5119_v36, %v5121_v23  ;;  %v5138_v9 = vrot.slane %v5123_v63, 1  ;;  %v5144_v17 = vrot.slane %v5123_v63, 2  ;;  %v5152_v61 = vrot.slane %v5123_v63, 3  ;;  %v8338_v35 = vld [vmem:[#allocation10 + $0x1e0] ss:$8 sps:$4 sm:$0xff]  }
 0x532   :  { %v5126_v62 = vmax.f32 %v5120_v48, %v5122_v26  ;;  %v5140_v16 = vrot.slane %v5124_v40, 1  ;;  %v5147_v22 = vrot.slane %v5124_v40, 2  ;;  %v5155_v21 = vrot.slane %v5124_v40, 3  ;;  %v8343_v1 = vld [vmem:[#allocation10 + $0x1f4] ss:$8 sps:$4 sm:$0xff]  }
 0x533   :  { %v5131_v54 = vrot.slane %v5125_v5, 7  ;;  %v9539_v10 = vsel %vm5132_vm10, %v5125_v5, %v5138_v9  ;;  %v5145_v59 = vrot.slane %v5125_v5, 1  ;;  %v5153_v50 = vrot.slane %v5125_v5, 2  ;;  %v8341_v25 = vld [vmem:[#allocation10 + $0x1f0] ss:$8 sps:$4 sm:$0xff]  }
 0x534   :  { %v5134_v30 = vrot.slane %v5126_v62, 7  ;;  %v5141_v15 = vsel %vm5132_vm10, %v5126_v62, %v5140_v16  ;;  %v5148_v0 = vrot.slane %v5126_v62, 1  ;;  %v5156_v58 = vrot.slane %v5126_v62, 2  ;;  %v8346_v36 = vld [vmem:[#allocation10 + $0x204] ss:$8 sps:$4 sm:$0xff]  }
 0x535   :  { %v5133_v14 = vsel %vm5132_vm10, %v5131_v54, %v5123_v63  ;;  %v9544_v43 = vsel %vm5132_vm10, %v5145_v59, %v5144_v17  ;;  %v5163_v4 = vpack.c.bf16 %v5141_v15, %v5141_v15  ;;  %v9554_v56 = vsel %vm5132_vm10, %v5153_v50, %v5152_v61  ;;  %v8344_v63 = vld [vmem:[#allocation10 + $0x200] ss:$8 sps:$4 sm:$0xff]   ;;  %v8349_v48 = vld [vmem:[#allocation10 + $0x214] ss:$8 sps:$4 sm:$0xff]   ;;  %v8347_v9 = vld [vmem:[#allocation10 + $0x210] ss:$8 sps:$4 sm:$0xff]  }
 0x536   :  { %v5135_v20 = vsel %vm5132_vm10, %v5134_v30, %v5124_v40  ;;  %v9548_v12 = vsel %vm5132_vm10, %v5148_v0, %v5147_v22  ;;  %v9551_v7 = vsel %vm5132_vm10, %v5156_v58, %v5155_v21  ;;  %v5160_v8 = vpack.c.bf16 %v5133_v14, %v5133_v14  ;;  %v8440_v26 = vld [vmem:[#allocation13] ss:$8 sps:$4 sm:$0xff]   ;;  %v8442_v5 = vld [vmem:[#allocation13 + $0x4] ss:$8 sps:$4 sm:$0xff]   ;;  %v8445_v62 = vld [vmem:[#allocation13 + $0x14] ss:$8 sps:$4 sm:$0xff]  }
 0x537   :  { %v5161_v45 = vpack.c.bf16 %v5135_v20, %v5135_v20  ;;  %v5162_v23 = vpack.c.bf16 %v9539_v10, %v9539_v10  ;;  %v5165_v40 = vpack.c.bf16 %v9548_v12, %v9548_v12  ;;  %v8352_v16 = vld [vmem:[#allocation10 + $0x224] ss:$8 sps:$4 sm:$0xff]   ;;  %6320 = vmatprep.subr.bf16.mxu0 %v8442_v5  ;;  %v8443_v54 = vld [vmem:[#allocation13 + $0x10] ss:$8 sps:$4 sm:$0xff]   ;;  %v8350_v10 = vld [vmem:[#allocation10 + $0x220] ss:$8 sps:$4 sm:$0xff]  }
 0x538   :  { %6321 = vmatpush1.bf16.msra.mxu0 %v8440_v26  ;;  %v8448_v17 = vld [vmem:[#allocation13 + $0x24] ss:$8 sps:$4 sm:$0xff]   ;;  %v8355_v59 = vld [vmem:[#allocation10 + $0x234] ss:$8 sps:$4 sm:$0xff]   ;;  %v8446_v30 = vld [vmem:[#allocation13 + $0x20] ss:$8 sps:$4 sm:$0xff]   ;;  %v5164_v26 = vpack.c.bf16 %v9544_v43, %v9544_v43 }
 0x539   :  { %5980 = vmatprep.mubr.bf16.mxu1 %v5161_v45  ;;  %6322 = vmatprep.subr.bf16.mxu0 %v8445_v62  ;;  %v8451_v15 = vld [vmem:[#allocation13 + $0x34] ss:$8 sps:$4 sm:$0xff]   ;;  %v8358_v0 = vld [vmem:[#allocation10 + $0x244] ss:$8 sps:$4 sm:$0xff]   ;;  %v8449_v14 = vld [vmem:[#allocation13 + $0x30] ss:$8 sps:$4 sm:$0xff]  }
 0x53a   :  { %5981 = vmatmul.mubr.bf16.vlgmr.msra.gmra.mrb[16].mxu1 %v5160_v8  ;;  %v8353_v22 = vld [vmem:[#allocation10 + $0x230] ss:$8 sps:$4 sm:$0xff]   ;;  %v8356_v58 = vld [vmem:[#allocation10 + $0x240] ss:$8 sps:$4 sm:$0xff]   ;;  %v8361_v20 = vld [vmem:[#allocation10 + $0x254] ss:$8 sps:$4 sm:$0xff]  }
 0x53b   :  { %5990 = vmatpush1.bf16.msra.mxu1 %v8296_v46  ;;  %6021 = vmatprep.mubr.bf16.mxu1 %v5163_v4  ;;  %v8454_v21 = vld [vmem:[#allocation13 + $0x44] ss:$8 sps:$4 sm:$0xff]   ;;  %v8452_v12 = vld [vmem:[#allocation13 + $0x40] ss:$8 sps:$4 sm:$0xff]   ;;  %v8457_v45 = vld [vmem:[#allocation13 + $0x54] ss:$8 sps:$4 sm:$0xff]  }
 0x53c   :  { %5991 = vmatprep.subr.bf16.mxu1 %v8301_v52  ;;  %6323 = vmatpush1.bf16.msra.mxu0 %v8443_v54  ;;  %v8359_v46 = vld [vmem:[#allocation10 + $0x250] ss:$8 sps:$4 sm:$0xff]   ;;  %v8364_v61 = vld [vmem:[#allocation10 + $0x264] ss:$8 sps:$4 sm:$0xff]   ;;  %v8362_v52 = vld [vmem:[#allocation10 + $0x260] ss:$8 sps:$4 sm:$0xff]  }
 0x53d   :  { %6324 = vmatprep.subr.bf16.mxu0 %v8448_v17  ;;  %v8455_v50 = vld [vmem:[#allocation13 + $0x50] ss:$8 sps:$4 sm:$0xff]   ;;  %v8460_v8 = vld [vmem:[#allocation13 + $0x64] ss:$8 sps:$4 sm:$0xff]  }
 0x53e   :  { %v8367_v4 = vld [vmem:[#allocation10 + $0x274] ss:$8 sps:$4 sm:$0xff]   ;;  %v8395_v62 = vld [vmem:[#allocation10 + $0x310] ss:$8 sps:$4 sm:$0xff]   ;;  %v8398_v54 = vld [vmem:[#allocation10 + $0x320] ss:$8 sps:$4 sm:$0xff]  }
 0x53f   :  { %5992 = vmatpush1.bf16.msra.mxu1 %v8299_v57  ;;  %v8458_v57 = vld [vmem:[#allocation13 + $0x60] ss:$8 sps:$4 sm:$0xff]   ;;  %v8397_v5 = vld [vmem:[#allocation10 + $0x314] ss:$8 sps:$4 sm:$0xff]  }
 0x540   :  { %5993 = vmatprep.subr.bf16.mxu1 %v8304_v49  ;;  %6325 = vmatpush1.bf16.msra.mxu0 %v8446_v30  ;;  %v8463_v49 = vld [vmem:[#allocation13 + $0x74] ss:$8 sps:$4 sm:$0xff]  }
 0x541   :  { %6326 = vmatprep.subr.bf16.mxu0 %v8451_v15  ;;  %v8403_v17 = vld [vmem:[#allocation10 + $0x334] ss:$8 sps:$4 sm:$0xff]   ;;  %v8404_v43 = vld [vmem:[#allocation10 + $0x340] ss:$8 sps:$4 sm:$0xff]   ;;  %v8412_v15 = vld [vmem:[#allocation10 + $0x364] ss:$8 sps:$4 sm:$0xff]  }
 0x542   :  { %v8409_v30 = vld [vmem:[#allocation10 + $0x354] ss:$8 sps:$4 sm:$0xff]  }
 0x543   :  { %5994 = vmatpush1.bf16.msra.mxu1 %v8302_v51  ;;  %v8365_v51 = vld [vmem:[#allocation10 + $0x270] ss:$8 sps:$4 sm:$0xff]  }
 0x544   :  { %5995 = vmatprep.subr.bf16.mxu1 %v8307_v3  ;;  %6327 = vmatpush1.bf16.msra.mxu0 %v8449_v14  ;;  %v8370_v3 = vld [vmem:[#allocation10 + $0x284] ss:$8 sps:$4 sm:$0xff]   ;;  %v8413_v14 = vld [vmem:[#allocation10 + $0x370] ss:$8 sps:$4 sm:$0xff]  }
 0x545   :  { %6328 = vmatprep.subr.bf16.mxu0 %v8454_v21  ;;  %v8418_v21 = vld [vmem:[#allocation10 + $0x384] ss:$8 sps:$4 sm:$0xff]  }
 0x547   :  { %5996 = vmatpush1.bf16.msra.mxu1 %v8305_v13  ;;  %v8461_v13 = vld [vmem:[#allocation13 + $0x70] ss:$8 sps:$4 sm:$0xff]  }
 0x548   :  { %5997 = vmatprep.subr.bf16.mxu1 %v8310_v34  ;;  %6329 = vmatpush1.bf16.msra.mxu0 %v8452_v12  ;;  %v8466_v34 = vld [vmem:[#allocation13 + $0x84] ss:$8 sps:$4 sm:$0xff]  }
 0x549   :  { %6330 = vmatprep.subr.bf16.mxu0 %v8457_v45  ;;  %v8419_v12 = vld [vmem:[#allocation10 + $0x390] ss:$8 sps:$4 sm:$0xff]   ;;  %v8424_v45 = vld [vmem:[#allocation10 + $0x3a4] ss:$8 sps:$4 sm:$0xff]  }
 0x54b   :  { %5998 = vmatpush1.bf16.msra.mxu1 %v8308_v24  ;;  %v8368_v24 = vld [vmem:[#allocation10 + $0x280] ss:$8 sps:$4 sm:$0xff]  }
 0x54c   :  { %5999 = vmatprep.subr.bf16.mxu1 %v8313_v18  ;;  %6331 = vmatpush1.bf16.msra.mxu0 %v8455_v50  ;;  %v8373_v18 = vld [vmem:[#allocation10 + $0x294] ss:$8 sps:$4 sm:$0xff]   ;;  %v8425_v50 = vld [vmem:[#allocation10 + $0x3b0] ss:$8 sps:$4 sm:$0xff]  }
 0x54d   :  { %6332 = vmatprep.subr.bf16.mxu0 %v8460_v8  ;;  %v8430_v8 = vld [vmem:[#allocation10 + $0x3c4] ss:$8 sps:$4 sm:$0xff]  }
 0x54f   :  { %6000 = vmatpush1.bf16.msra.mxu1 %v8311_v47  ;;  %v8464_v47 = vld [vmem:[#allocation13 + $0x80] ss:$8 sps:$4 sm:$0xff]  }
 0x550   :  { %6001 = vmatprep.subr.bf16.mxu1 %v8316_v60  ;;  %6333 = vmatpush1.bf16.msra.mxu0 %v8458_v57  ;;  %v8469_v60 = vld [vmem:[#allocation13 + $0x94] ss:$8 sps:$4 sm:$0xff]  }
 0x551   :  { %6334 = vmatprep.subr.bf16.mxu0 %v8463_v49  ;;  %v8431_v57 = vld [vmem:[#allocation10 + $0x3d0] ss:$8 sps:$4 sm:$0xff]   ;;  %v8436_v49 = vld [vmem:[#allocation10 + $0x3e4] ss:$8 sps:$4 sm:$0xff]  }
 0x553   :  { %6002 = vmatpush1.bf16.msra.mxu1 %v8314_v2  ;;  %v8371_v2 = vld [vmem:[#allocation10 + $0x290] ss:$8 sps:$4 sm:$0xff]  }
 0x554   :  { %6003 = vmatprep.subr.bf16.mxu1 %v8319_v37  ;;  %6335 = vmatpush1.bf16.msra.mxu0 %v8461_v13  ;;  %v8376_v37 = vld [vmem:[#allocation10 + $0x2a4] ss:$8 sps:$4 sm:$0xff]   ;;  %v8437_v13 = vld [vmem:[#allocation10 + $0x3f0] ss:$8 sps:$4 sm:$0xff]  }
 0x555   :  { %6336 = vmatprep.subr.bf16.mxu0 %v8466_v34  ;;  %v5166_v34 = vpack.c.bf16 %v9554_v56, %v9554_v56 }
 0x557   :  { %6004 = vmatpush1.bf16.msra.mxu1 %v8317_v38  ;;  %v8467_v38 = vld [vmem:[#allocation13 + $0x90] ss:$8 sps:$4 sm:$0xff]  }
 0x558   :  { %6005 = vmatprep.subr.bf16.mxu1 %v8322_v44  ;;  %6337 = vmatpush1.bf16.msra.mxu0 %v8464_v47  ;;  %v8472_v44 = vld [vmem:[#allocation13 + $0xa4] ss:$8 sps:$4 sm:$0xff]   ;;  %v8487_v47 = vld [vmem:[#allocation13 + $0xf4] ss:$8 sps:$4 sm:$0xff]  }
 0x559   :  { %6338 = vmatprep.subr.bf16.mxu0 %v8469_v60  ;;  %v8485_v60 = vld [vmem:[#allocation13 + $0xf0] ss:$8 sps:$4 sm:$0xff]  }
 0x55b   :  { %6006 = vmatpush1.bf16.msra.mxu1 %v8320_v6  ;;  %v8374_v6 = vld [vmem:[#allocation10 + $0x2a0] ss:$8 sps:$4 sm:$0xff]  }
 0x55c   :  { %6007 = vmatprep.subr.bf16.mxu1 %v8325_v39  ;;  %v8379_v39 = vld [vmem:[#allocation10 + $0x2b4] ss:$8 sps:$4 sm:$0xff]   ;;  %6339 = vmatpush1.bf16.msra.mxu0 %v8467_v38 }
 0x55d   :  { %6340 = vmatprep.subr.bf16.mxu0 %v8472_v44 }
 0x55f   :  { %6008 = vmatpush1.bf16.msra.mxu1 %v8323_v53  ;;  %v8470_v53 = vld [vmem:[#allocation13 + $0xa0] ss:$8 sps:$4 sm:$0xff]  }
 0x560   :  { %6009 = vmatprep.subr.bf16.mxu1 %v8328_v31  ;;  %v8475_v31 = vld [vmem:[#allocation13 + $0xb4] ss:$8 sps:$4 sm:$0xff]   ;;  %6341 = vmatpush1.bf16.msra.mxu0 %v8470_v53 }
 0x561   :  { %6342 = vmatprep.subr.bf16.mxu0 %v8475_v31 }
 0x563   :  { %6010 = vmatpush1.bf16.msra.mxu1 %v8326_v42  ;;  %v8377_v42 = vld [vmem:[#allocation10 + $0x2b0] ss:$8 sps:$4 sm:$0xff]  }
 0x564   :  { %6011 = vmatprep.subr.bf16.mxu1 %v8331_v28  ;;  %v8382_v28 = vld [vmem:[#allocation10 + $0x2c4] ss:$8 sps:$4 sm:$0xff]  }
 0x567   :  { %6012 = vmatpush1.bf16.msra.mxu1 %v8329_v33  ;;  %v8473_v33 = vld [vmem:[#allocation13 + $0xb0] ss:$8 sps:$4 sm:$0xff]  }
 0x568   :  { %6013 = vmatprep.subr.bf16.mxu1 %v8334_v19  ;;  %v8478_v19 = vld [vmem:[#allocation13 + $0xc4] ss:$8 sps:$4 sm:$0xff]   ;;  %6343 = vmatpush1.bf16.msra.mxu0 %v8473_v33 }
 0x569   :  { %6344 = vmatprep.subr.bf16.mxu0 %v8478_v19 }
 0x56b   :  { %6014 = vmatpush1.bf16.msra.mxu1 %v8332_v11  ;;  %v8380_v11 = vld [vmem:[#allocation10 + $0x2c0] ss:$8 sps:$4 sm:$0xff]  }
 0x56c   :  { %6015 = vmatprep.subr.bf16.mxu1 %v8337_v41  ;;  %v8385_v41 = vld [vmem:[#allocation10 + $0x2d4] ss:$8 sps:$4 sm:$0xff]  }
 0x56f   :  { %6016 = vmatpush1.bf16.msra.mxu1 %v8335_v55  ;;  %v8476_v55 = vld [vmem:[#allocation13 + $0xc0] ss:$8 sps:$4 sm:$0xff]  }
 0x570   :  { %6017 = vmatprep.subr.bf16.mxu1 %v8340_v27  ;;  %v8481_v27 = vld [vmem:[#allocation13 + $0xd4] ss:$8 sps:$4 sm:$0xff]   ;;  %6345 = vmatpush1.bf16.msra.mxu0 %v8476_v55  ;;  %v8490_v55 = vld [vmem:[#allocation16 + $0x48] sm:$0xff]  }
 0x571   :  { %6346 = vmatprep.subr.bf16.mxu0 %v8481_v27  ;;  %v8491_v27 = vld [vmem:[#allocation16 + $0x8] sm:$0xff]  }
 0x573   :  { %6018 = vmatpush1.bf16.msra.mxu1 %v8338_v35  ;;  %v8383_v35 = vld [vmem:[#allocation10 + $0x2d0] ss:$8 sps:$4 sm:$0xff]  }
 0x574   :  { %6019 = vmatprep.subr.bf16.mxu1 %v8343_v1  ;;  %v8388_v1 = vld [vmem:[#allocation10 + $0x2e4] ss:$8 sps:$4 sm:$0xff]  }
 0x577   :  { %6020 = vmatpush1.bf16.msra.mxu1 %v8341_v25  ;;  %v8479_v25 = vld [vmem:[#allocation13 + $0xd0] ss:$8 sps:$4 sm:$0xff]  }
 0x578   :  { %6030 = vmatprep.subr.bf16.mxu1 %v8346_v36  ;;  %v8386_v36 = vld [vmem:[#allocation10 + $0x2e0] ss:$8 sps:$4 sm:$0xff]   ;;  %6347 = vmatpush1.bf16.msra.mxu0 %v8479_v25 }
 0x579   :  { %v8494_v25 = vld [vmem:[#allocation16 + $0x58] sm:$0xff]  }
 0x57a   :  { %6022 = vmatmul.mubr.bf16.vlgmr.msra.gmra.mrb[16].mxu1 %v5162_v23  ;;  %v8389_v23 = vld [vmem:[#allocation10 + $0x2f0] ss:$8 sps:$4 sm:$0xff]  }
 0x57b   :  { %6031 = vmatpush1.bf16.msra.mxu1 %v8344_v63  ;;  %6062 = vmatprep.mubr.bf16.mxu1 %v5165_v40  ;;  %v8391_v63 = vld [vmem:[#allocation10 + $0x2f4] ss:$8 sps:$4 sm:$0xff]   ;;  %v8392_v40 = vld [vmem:[#allocation10 + $0x300] ss:$8 sps:$4 sm:$0xff]  }
 0x57c   :  { %6032 = vmatprep.subr.bf16.mxu1 %v8349_v48  ;;  %v8394_v48 = vld [vmem:[#allocation10 + $0x304] ss:$8 sps:$4 sm:$0xff]  }
 0x57f   :  { %6033 = vmatpush1.bf16.msra.mxu1 %v8347_v9  ;;  %v5167_v9 = vpack.c.bf16 %v9551_v7, %v9551_v7  ;;  %v8407_v7 = vld [vmem:[#allocation10 + $0x350] ss:$8 sps:$4 sm:$0xff]  }
 0x580   :  { %6034 = vmatprep.subr.bf16.mxu1 %v8352_v16  ;;  %v8400_v16 = vld [vmem:[#allocation10 + $0x324] ss:$8 sps:$4 sm:$0xff]  }
 0x583   :  { %6035 = vmatpush1.bf16.msra.mxu1 %v8350_v10  ;;  %v8401_v10 = vld [vmem:[#allocation10 + $0x330] ss:$8 sps:$4 sm:$0xff]  }
 0x584   :  { %6036 = vmatprep.subr.bf16.mxu1 %v8355_v59  ;;  %v8406_v59 = vld [vmem:[#allocation10 + $0x344] ss:$8 sps:$4 sm:$0xff]  }
 0x587   :  { %6037 = vmatpush1.bf16.msra.mxu1 %v8353_v22  ;;  %v8410_v22 = vld [vmem:[#allocation10 + $0x360] ss:$8 sps:$4 sm:$0xff]  }
 0x588   :  { %6038 = vmatprep.subr.bf16.mxu1 %v8358_v0  ;;  %v8415_v0 = vld [vmem:[#allocation10 + $0x374] ss:$8 sps:$4 sm:$0xff]  }
 0x58b   :  { %6039 = vmatpush1.bf16.msra.mxu1 %v8356_v58  ;;  %v8416_v58 = vld [vmem:[#allocation10 + $0x380] ss:$8 sps:$4 sm:$0xff]  }
 0x58c   :  { %6040 = vmatprep.subr.bf16.mxu1 %v8361_v20  ;;  %v8421_v20 = vld [vmem:[#allocation10 + $0x394] ss:$8 sps:$4 sm:$0xff]  }
 0x58f   :  { %6041 = vmatpush1.bf16.msra.mxu1 %v8359_v46  ;;  %v8422_v46 = vld [vmem:[#allocation10 + $0x3a0] ss:$8 sps:$4 sm:$0xff]  }
 0x590   :  { %6042 = vmatprep.subr.bf16.mxu1 %v8364_v61  ;;  %v8427_v61 = vld [vmem:[#allocation10 + $0x3b4] ss:$8 sps:$4 sm:$0xff]  }
 0x593   :  { %6043 = vmatpush1.bf16.msra.mxu1 %v8362_v52  ;;  %v8428_v52 = vld [vmem:[#allocation10 + $0x3c0] ss:$8 sps:$4 sm:$0xff]  }
 0x594   :  { %6044 = vmatprep.subr.bf16.mxu1 %v8367_v4  ;;  %v8433_v4 = vld [vmem:[#allocation10 + $0x3d4] ss:$8 sps:$4 sm:$0xff]  }
 0x597   :  { %6045 = vmatpush1.bf16.msra.mxu1 %v8365_v51  ;;  %v8434_v51 = vld [vmem:[#allocation10 + $0x3e0] ss:$8 sps:$4 sm:$0xff]  }
 0x598   :  { %6046 = vmatprep.subr.bf16.mxu1 %v8370_v3  ;;  %v8439_v3 = vld [vmem:[#allocation10 + $0x3f4] ss:$8 sps:$4 sm:$0xff]  }
 0x59b   :  { %6047 = vmatpush1.bf16.msra.mxu1 %v8368_v24  ;;  %v8482_v24 = vld [vmem:[#allocation13 + $0xe0] ss:$8 sps:$4 sm:$0xff]  }
 0x59c   :  { %6048 = vmatprep.subr.bf16.mxu1 %v8373_v18  ;;  %v8484_v18 = vld [vmem:[#allocation13 + $0xe4] ss:$8 sps:$4 sm:$0xff]  }
 0x59d   :  { %6348 = vmatprep.subr.bf16.mxu0 %v8484_v18 }
 0x59e   :  { %6349 = vmatpush1.bf16.msra.mxu0 %v8482_v24 }
 0x59f   :  { %6049 = vmatpush1.bf16.msra.mxu1 %v8371_v2  ;;  %6350 = vmatprep.subr.bf16.mxu0 %v8487_v47  ;;  %v8488_v2 = vld [vmem:[#allocation16 + $0x40] sm:$0xff]  }
 0x5a0   :  { %6050 = vmatprep.subr.bf16.mxu1 %v8376_v37  ;;  %v5296_v37 = vld [vmem:[#allocation11] sm:$0x3] }
 0x5a1   :  { %v5301_v38 = vrot.slane %v5296_v37, %v9177_v29  ;;  %v5305_v44 = vrot.slane %v5296_v37, %v9183_v32 }
 0x5a2   :  { %6351 = vmatpush1.bf16.msra.mxu0 %v8485_v60 }
 0x5a3   :  { %6051 = vmatpush1.bf16.msra.mxu1 %v8374_v6  ;;  %7315 = vmatprep.subr.bf16.mxu0 %v8488_v2 }
 0x5a4   :  { %6052 = vmatprep.subr.bf16.mxu1 %v8379_v39 }
 0x5a7   :  { %6053 = vmatpush1.bf16.msra.mxu1 %v8377_v42 }
 0x5a8   :  { %6054 = vmatprep.subr.bf16.mxu1 %v8382_v28 }
 0x5ab   :  { %6055 = vmatpush1.bf16.msra.mxu1 %v8380_v11  ;;  %v8489_v11 = vld [vmem:[#allocation16] sm:$0xff]  }
 0x5ac   :  { %6056 = vmatprep.subr.bf16.mxu1 %v8385_v41 }
 0x5af   :  { %6057 = vmatpush1.bf16.msra.mxu1 %v8383_v35  ;;  %v8492_v35 = vld [vmem:[#allocation16 + $0x50] sm:$0xff]  }
 0x5b0   :  { %6058 = vmatprep.subr.bf16.mxu1 %v8388_v1  ;;  %v8493_v1 = vld [vmem:[#allocation16 + $0x10] sm:$0xff]  }
 0x5b3   :  { %6059 = vmatpush1.bf16.msra.mxu1 %v8386_v36  ;;  %v8495_v36 = vld [vmem:[#allocation16 + $0x18] sm:$0xff]  }
 0x5b4   :  { %6060 = vmatprep.subr.bf16.mxu1 %v8391_v63  ;;  %v8496_v63 = vld [vmem:[#allocation16 + $0x60] sm:$0xff]  }
 0x5b7   :  { %6061 = vmatpush1.bf16.msra.mxu1 %v8389_v23  ;;  %v8497_v23 = vld [vmem:[#allocation16 + $0x20] sm:$0xff]  }
 0x5b8   :  { %6071 = vmatprep.subr.bf16.mxu1 %v8394_v48  ;;  %v8498_v48 = vld [vmem:[#allocation16 + $0x68] sm:$0xff]  }
 0x5ba   :  { %6063 = vmatmul.mubr.bf16.vlgmr.msra.gmra.mrb[16].mxu1 %v5164_v26  ;;  %v8500_v26 = vld [vmem:[#allocation16 + $0x70] sm:$0xff]  }
 0x5bb   :  { %6072 = vmatpush1.bf16.msra.mxu1 %v8392_v40  ;;  %6103 = vmatprep.mubr.bf16.mxu1 %v5167_v9  ;;  %v8499_v40 = vld [vmem:[#allocation16 + $0x28] sm:$0xff]   ;;  %v8502_v9 = vld [vmem:[#allocation16 + $0x78] sm:$0xff]  }
 0x5bc   :  { %6073 = vmatprep.subr.bf16.mxu1 %v8397_v5  ;;  %v8501_v5 = vld [vmem:[#allocation16 + $0x30] sm:$0xff]  }
 0x5bf   :  { %6074 = vmatpush1.bf16.msra.mxu1 %v8395_v62  ;;  %v8503_v62 = vld [vmem:[#allocation16 + $0x38] sm:$0xff]  }
 0x5c0   :  { %6075 = vmatprep.subr.bf16.mxu1 %v8400_v16  ;;  %v6148_v16 = vld [vmem:[#allocation14] sm:$0x3] }
 0x5c3   :  { %6076 = vmatpush1.bf16.msra.mxu1 %v8398_v54  ;;  %v6153_v54 = vrot.slane %v6148_v16, %v9177_v29 }
 0x5c4   :  { %6077 = vmatprep.subr.bf16.mxu1 %v8403_v17  ;;  %v6157_v17 = vrot.slane %v6148_v16, %v9183_v32 }
 0x5c7   :  { %6078 = vmatpush1.bf16.msra.mxu1 %v8401_v10 }
 0x5c8   :  { %6079 = vmatprep.subr.bf16.mxu1 %v8406_v59 }
 0x5cb   :  { %6080 = vmatpush1.bf16.msra.mxu1 %v8404_v43 }
 0x5cc   :  { %6081 = vmatprep.subr.bf16.mxu1 %v8409_v30 }
 0x5cf   :  { %6082 = vmatpush1.bf16.msra.mxu1 %v8407_v7 }
 0x5d0   :  { %6083 = vmatprep.subr.bf16.mxu1 %v8412_v15 }
 0x5d3   :  { %6084 = vmatpush1.bf16.msra.mxu1 %v8410_v22 }
 0x5d4   :  { %6085 = vmatprep.subr.bf16.mxu1 %v8415_v0 }
 0x5d7   :  { %6086 = vmatpush1.bf16.msra.mxu1 %v8413_v14 }
 0x5d8   :  { %6087 = vmatprep.subr.bf16.mxu1 %v8418_v21 }
 0x5db   :  { %6088 = vmatpush1.bf16.msra.mxu1 %v8416_v58 }
 0x5dc   :  { %6089 = vmatprep.subr.bf16.mxu1 %v8421_v20  ;;  %v7298_v20 = vld [vmem:[#allocation17] ss:$0 sm:$0xff] }
 0x5df   :  { %6090 = vmatpush1.bf16.msra.mxu1 %v8419_v12 }
 0x5e0   :  { %6091 = vmatprep.subr.bf16.mxu1 %v8424_v45 }
 0x5e3   :  { %6092 = vmatpush1.bf16.msra.mxu1 %v8422_v46 }
 0x5e4   :  { %6093 = vmatprep.subr.bf16.mxu1 %v8427_v61 }
 0x5e7   :  { %6094 = vmatpush1.bf16.msra.mxu1 %v8425_v50 }
 0x5e8   :  { %6095 = vmatprep.subr.bf16.mxu1 %v8430_v8 }
 0x5eb   :  { %6096 = vmatpush1.bf16.msra.mxu1 %v8428_v52 }
 0x5ec   :  { %6097 = vmatprep.subr.bf16.mxu1 %v8433_v4 }
 0x5ef   :  { %6098 = vmatpush1.bf16.msra.mxu1 %v8431_v57 }
 0x5f0   :  { %6099 = vmatprep.subr.bf16.mxu1 %v8436_v49 }
 0x5f3   :  { %6100 = vmatpush1.bf16.msra.mxu1 %v8434_v51 }
 0x5f4   :  { %6101 = vmatprep.subr.bf16.mxu1 %v8439_v3 }
 0x5f7   :  { %6102 = vmatpush1.bf16.msra.mxu1 %v8437_v13 }
 0x5fa   :  { %6104 = vmatmul.mubr.bf16.vlgmr.msra.gmra.mrb[16].mxu1 %v5166_v34 }
 0x6cd   :  { %v6105_v6 = vpop.f32.mrb[16].mxu1 }
 0x6ce   :  { %v7349_v39 = vadd.f32 %v6105_v6, %v5301_v38  ;;  %v6107_v53 = vpop.f32.mrb[17].mxu1 }
 0x6cf   :  { %v7350_v56 = vadd.f32 %v6107_v53, %v5305_v44  ;;  %v6109_v31 = vpop.f32.mrb[18].mxu1 }
 0x6d0   :  { %v6112_v42 = vmax.f32 %v7349_v39, 0.0  ;;  %v6110_v28 = vpop.f32.mrb[19].mxu1 }
 0x6d1   :  { %v6113_v33 = vmax.f32 %v7350_v56, 0.0 }
 0x6d2   :  { %v6114_v41 = vpack.c.bf16 %v6112_v42, %v6112_v42 }
 0x6d3   :  { %v6115_v19 = vpack.c.bf16 %v6113_v33, %v6113_v33 }
 0x6d5   :  { %6352 = vmatprep.mubr.bf16.mxu0 %v6115_v19 }
 0x6d6   :  { %6353 = vmatmul.mubr.bf16.vlgmr.msra.gmra.mrb[32].mxu0 %v6114_v41 }
 0x6d7   :  { %7316 = vmatpush3.bf16.msra.mxu0 %v8489_v11 }
 0x6d8   :  { %7317 = vmatprep.subr.bf16.mxu0 %v8490_v55 }
 0x6db   :  { %7318 = vmatpush3.bf16.msra.mxu0 %v8491_v27 }
 0x6dc   :  { %7319 = vmatprep.subr.bf16.mxu0 %v8492_v35 }
 0x6df   :  { %7320 = vmatpush3.bf16.msra.mxu0 %v8493_v1 }
 0x6e0   :  { %7321 = vmatprep.subr.bf16.mxu0 %v8494_v25 }
 0x6e3   :  { %7322 = vmatpush3.bf16.msra.mxu0 %v8495_v36 }
 0x6e4   :  { %7323 = vmatprep.subr.bf16.mxu0 %v8496_v63 }
 0x6e7   :  { %7324 = vmatpush3.bf16.msra.mxu0 %v8497_v23 }
 0x6e8   :  { %7325 = vmatprep.subr.bf16.mxu0 %v8498_v48 }
 0x6eb   :  { %7326 = vmatpush3.bf16.msra.mxu0 %v8499_v40 }
 0x6ec   :  { %7327 = vmatprep.subr.bf16.mxu0 %v8500_v26 }
 0x6ef   :  { %7328 = vmatpush3.bf16.msra.mxu0 %v8501_v5 }
 0x6f0   :  { %7329 = vmatprep.subr.bf16.mxu0 %v8502_v9 }
 0x6f3   :  { %7330 = vmatpush3.bf16.msra.mxu0 %v8503_v62 }
 0x7a9   :  { %v6354_v10 = vpop.f32.mrb[32].mxu0 }
 0x7aa   :  { %v6355_v59 = vadd.f32 %v6354_v10, %v6153_v54  ;;  %v6356_v43 = vpop.f32.mrb[33].mxu0 }
 0x7ab   :  { %v6357_v30 = vadd.f32 %v6356_v43, %v6157_v17  ;;  %v6358_v7 = vpop.f32.mrb[34].mxu0 }
 0x7ac   :  { %v6361_v15 = vmax.f32 %v6355_v59, 0.0  ;;  %v6359_v22 = vpop.f32.mrb[35].mxu0 }
 0x7ad   :  { %v6362_v0 = vmax.f32 %v6357_v30, 0.0 }
 0x7ae   :  { %v6363_v21 = vpack.c.bf16 %v6361_v15, %v6361_v15 }
 0x7af   :  { %v6364_v14 = vpack.c.bf16 %v6362_v0, %v6362_v0 }
 0x7b1   :  { %6532 = vmatprep.mubr.bf16.mxu0 %v6364_v14 }
 0x7b2   :  { %6533 = vmatmul.mubr.bf16.vlgmr.msra.gmra.mrb[36].mxu0 %v6363_v21 }
 0x885   :  { %v7331_v58 = vpop.f32.mrb[36].mxu0 }
 0x886   :  { %v7332_v12 = vpop.f32.mrb[37].mxu0 }
 0x887   :  { %v7333_v29 = vadd.f32 %v7332_v12, %v7331_v58  ;;  %v7334_v45 = vpop.f32.mrb[38].mxu0 }
 0x888   :  { %v7335_v32 = vpop.f32.mrb[39].mxu0 }
 0x889   :  { %v6535_v46 = vadd.f32 %v7333_v29, %v7298_v20 }
 0x88b   :  { %6540 = vst [vmem:[#allocation19] sm:$0x3] %v6535_v46 }
 0x88c   :  { %8740 = shalt.err (!%p8737_p0)
}
 0x88d   :  { %s8741_s13 = scalar_lea.hbm %s9593_s11, 32 }
 0x88e   :  { %p8742_p1 = scmp.ne.s32.totalorder %s9593_s11, %s8741_s13  ;;  %p8745_p2 = scmp.lt.u32.totalorder %s8741_s13, %s9593_s11 }
 0x890   :  { %p8747_p3 = pnand %p8745_p2, %p8742_p1 }
 0x892   :  { %8750 = shalt.err (!%p8747_p3)
}
 0x893   :  { %6550 = dma.vmem_to_hbm [thread:$0]  %s6548_s29, 32, %s9593_s11, [#allocation4]  }
 0x894   :  { %8763 = dma.done.wait [#allocation4], 32  }
 0x895   :  { %8764 = vsyncadd [#allocation4], 4294967264 }
 0x896   :  { %6554 = vsyncpa [#allocation3], 1 }
 0x897   :  { %6555 = vsyncpa [#allocation6], 1 }
 0x898   :  { %6556 = vsyncpa [#allocation9], 1 }
 0x899   :  { %6557 = vsyncpa [#allocation12], 1 }
 0x89a   :  { %6558 = vsyncpa [#allocation15], 1 }
 0x89b   :  { %6559 = vsyncpa [#allocation18], 1 }
 0x89c   :  { %6560 = vsyncpa [#allocation4], 1 }

</bundles_post_ra>
